<compile_context>
chip_gen: v6e
topology: v6e:2x2x1
jax: 0.10.0
libtpu: 0.0.40
codegen_flags: <defaults>
</compile_context>

<pallas_src>
import functools

import jax
import jax.numpy as jnp
from jax.experimental import pallas as pl
from jax.experimental.pallas import tpu as pltpu

EPS = 1e-5          # nn.BatchNorm3d default eps
SLOPE = 0.2         # LeakyReLU negative slope
K = 3               # kernel_size
PAD = 1             # 'same' padding for k=3, stride=1
LANE = 128
SUB = 8


def _round_up(v, m):
    return ((v + m - 1) // m) * m


def _largest_divisor(n, cap):
    cap = max(1, min(n, cap))
    for d in range(cap, 0, -1):
        if n % d == 0:
            return d
    return 1


def conv_stats_kernel(x_ref, w_ref, mask_ref, y_ref, stats_ref, *,
                      tile_d, wp, pl_width):
    """Pass 1: assemble the 27-tap im2col patch in VMEM from the halo slab, run one
    K=27*Cin8 matmul, write y^T (Cout8, positions) and accumulate per-channel
    sum / sum-of-squares over the valid positions."""
    # Halo slab: (TILE_D+2) depth planes of (Cin8, LW) each, already in VMEM.
    planes = [x_ref[0, 0, r] for r in range(tile_d + 2)]

    cols = []
    for d in range(tile_d):
        pieces = []
        for kd in range(K):
            pln = planes[d + kd]
            for kh in range(K):
                for kw in range(K):
                    s = kh * wp + kw                        # in-plane tap shift
                    pieces.append(pln[:, s:s + pl_width])   # (Cin8, PL) window
        # contraction row order: (kd, kh, kw, cin) -- matches w_ref columns
        cols.append(jnp.concatenate(pieces, axis=0))        # (27*Cin8, PL)
    patch_t = jnp.concatenate(cols, axis=1)                 # (27*Cin8, TILE_D*PL)

    # Single MXU matmul per tile: (Cout8, 27*Cin8) x (27*Cin8, TILE_D*PL).
    y_t = jnp.dot(w_ref[...], patch_t, preferred_element_type=jnp.float32)

    y_ref[0] = y_t                                          # compact conv writeback

    valid = mask_ref[...]                                   # (1, TILE_D*PL) 1/0
    ym = y_t * valid
    tile_stats = jnp.concatenate(
        [jnp.sum(ym, axis=1, keepdims=True),
         jnp.sum(ym * y_t, axis=1, keepdims=True)], axis=1)  # (Cout8, 2)

    @pl.when(pl.program_id(1) == 0)
    def _():
        stats_ref[0] = jnp.zeros(stats_ref.shape[1:], stats_ref.dtype)

    stats_ref[0] += tile_stats


def bn_lrelu_kernel(y_ref, scale_ref, shift_ref, o_ref):
    """Pass 2: elementwise BatchNorm (precomputed scale/shift) + LeakyReLU."""
    z = y_ref[0] * scale_ref[...] + shift_ref[...]
    o_ref[0] = jnp.where(z >= 0.0, z, SLOPE * z).astype(o_ref.dtype)


def same_block3d(x, weight, bias, gamma, beta, padding=PAD):
    """x: (N, Cin, D, H, W); weight: (Cout, Cin, 3, 3, 3). Returns (N, Cout, D, H, W).

    Forward of SameBlock3d with padding_mode='reflect', use_norm=True (training-mode
    batch statistics).  The conv bias shifts the per-channel mean by the same
    constant, so it cancels exactly under train-mode BatchNorm and is not applied.
    """
    del bias  # cancels exactly under train-mode BatchNorm (see docstring)
    # TODO(synk): use_norm=False path (conv bias + LeakyReLU, no norm) not implemented.
    N, Cin, D, H, W = x.shape
    Cout = weight.shape[0]
    assert weight.shape == (Cout, Cin, K, K, K) and padding == PAD

    p = padding
    Dp, Hp, Wp = D + 2 * p, H + 2 * p, W + 2 * p
    HPWP = Hp * Wp
    PL = _round_up(HPWP, LANE)            # positions per depth plane (lane aligned)
    S_MAX = (K - 1) * Wp + (K - 1)        # largest in-plane tap shift
    LW = S_MAX + PL                       # slab lane width: every tap window in-bounds
    CIN8 = _round_up(Cin, SUB)
    COUT8 = _round_up(Cout, SUB)
    KDIM = K * K * K * CIN8

    # Depth tile: largest divisor of D under a VMEM-friendly cap (prefer big tiles).
    TILE_D = _largest_divisor(D, max(1, min(16, 4096 // PL)))
    DT = D // TILE_D
    PTILE = TILE_D * PL
    f32 = jnp.float32

    # ---- wrapper glue: reflect pad + per-plane channels-last + depth-halo slabs ----
    x_pad = jnp.pad(x, ((0, 0), (0, 0), (p, p), (p, p), (p, p)), mode="reflect")
    x_cl = jnp.transpose(x_pad, (0, 2, 1, 3, 4)).reshape(N, Dp, Cin, HPWP)
    x_cl = jnp.pad(x_cl, ((0, 0), (0, 0), (0, CIN8 - Cin), (0, LW - HPWP))).astype(f32)
    # Overlapping depth-halo slabs: (TILE_D+2)/TILE_D duplication (vs ~27-32x im2col).
    # TODO(synk): manual double-buffered make_async_copy halo DMA would remove even this.
    x_halo = jnp.stack(
        [x_cl[:, dt * TILE_D: dt * TILE_D + TILE_D + 2] for dt in range(DT)], axis=1)
    # (N, DT, TILE_D+2, CIN8, LW)

    # Weight -> (Cout8, 27*Cin8), contraction order (kd, kh, kw, cin).
    w_m = jnp.transpose(weight, (0, 2, 3, 4, 1))
    w_m = jnp.pad(w_m, ((0, COUT8 - Cout), (0, 0), (0, 0), (0, 0), (0, CIN8 - Cin)))
    w_m = w_m.reshape(COUT8, KDIM).astype(f32)
    # TODO(synk): bf16 slab/weight would halve pass-1 HBM traffic but needs a looser
    # tolerance than the 1e-4 parity check in __main__; kept f32.

    # Validity mask over a tile's positions (drops hp>=H, wp>=W and lane-pad tails).
    j = jnp.arange(PL)
    valid = ((j < HPWP) & ((j // Wp) < H) & ((j % Wp) < W)).astype(f32)
    mask = jnp.tile(valid, (TILE_D,))[None, :]              # (1, PTILE)

    # ---- pass 1: conv -> compact y^T writeback + per-channel stats accumulator ----
    x_spec = pl.BlockSpec((1, 1, TILE_D + 2, CIN8, LW), lambda n, d: (n, d, 0, 0, 0))
    w_spec = pl.BlockSpec((COUT8, KDIM), lambda n, d: (0, 0))
    m_spec = pl.BlockSpec((1, PTILE), lambda n, d: (0, 0))
    y_spec = pl.BlockSpec((1, COUT8, PTILE), lambda n, d: (n, 0, d))
    st_spec = pl.BlockSpec((1, COUT8, 2), lambda n, d: (n, 0, 0))

    patch_bytes = KDIM * PTILE * 4
    est1 = (2 * ((TILE_D + 2) * CIN8 * LW + COUT8 * PTILE + COUT8 * KDIM + PTILE) * 4
            + 3 * patch_bytes + (4 << 20))
    vmem1 = int(min(32 << 20, max(16 << 20, est1)))

    y_t, stats = pl.pallas_call(
        functools.partial(conv_stats_kernel, tile_d=TILE_D, wp=Wp, pl_width=PL),
        out_shape=(jax.ShapeDtypeStruct((N, COUT8, D * PL), f32),
                   jax.ShapeDtypeStruct((N, COUT8, 2), f32)),
        grid_spec=pltpu.PrefetchScalarGridSpec(
            num_scalar_prefetch=0, grid=(N, DT),
            in_specs=[x_spec, w_spec, m_spec],
            out_specs=[y_spec, st_spec]),
        compiler_params=pltpu.CompilerParams(
            dimension_semantics=("parallel", "arbitrary"),
            vmem_limit_bytes=vmem1),
    )(x_halo, w_m, mask)

    # ---- tiny stats reduction + BN scale/shift precompute in the wrapper ----
    inv_m = 1.0 / float(N * D * H * W)
    st = jnp.sum(stats, axis=0)                             # (Cout8, 2)
    mean = st[:, 0:1] * inv_m
    var = jnp.maximum(st[:, 1:2] * inv_m - mean * mean, 0.0)
    gamma_p = jnp.pad(gamma.astype(f32).reshape(Cout, 1), ((0, COUT8 - Cout), (0, 0)))
    beta_p = jnp.pad(beta.astype(f32).reshape(Cout, 1), ((0, COUT8 - Cout), (0, 0)))
    scale = gamma_p * jax.lax.rsqrt(var + EPS)
    shift = beta_p - mean * scale

    # ---- pass 2: elementwise BN + LeakyReLU over the compact y^T layout ----
    T2 = PL * _largest_divisor(D, max(1, 8192 // PL))
    y2_spec = pl.BlockSpec((1, COUT8, T2), lambda n, t: (n, 0, t))
    v2_spec = pl.BlockSpec((COUT8, 1), lambda n, t: (0, 0))
    vmem2 = int(min(32 << 20, max(16 << 20, 4 * COUT8 * T2 * 4 + (2 << 20))))

    out_t = pl.pallas_call(
        bn_lrelu_kernel,
        out_shape=jax.ShapeDtypeStruct((N, COUT8, D * PL), x.dtype),
        grid_spec=pltpu.PrefetchScalarGridSpec(
            num_scalar_prefetch=0, grid=(N, (D * PL) // T2),
            in_specs=[y2_spec, v2_spec, v2_spec],
            out_specs=y2_spec),
        compiler_params=pltpu.CompilerParams(
            dimension_semantics=("parallel", "parallel"),
            vmem_limit_bytes=vmem2),
    )(y_t, scale, shift)

    # glue: compact (Cout8, positions) -> NCDHW, dropping channel/lane padding.
    out = out_t[:, :Cout, :].reshape(N, Cout, D, PL)[..., :HPWP]
    out = out.reshape(N, Cout, D, Hp, Wp)[..., :H, :W]
    # TODO(synk): running_mean/running_var bookkeeping of nn.BatchNorm3d is training
    # state mutation, not part of the forward output; not reproduced.
    return out


def reference(x, weight, bias, gamma, beta, p=PAD):
    """Pure-JAX reference mirroring the PyTorch forward (training-mode BN)."""
    xp = jnp.pad(x, ((0, 0), (0, 0), (p, p), (p, p), (p, p)), mode="reflect")
    conv = jax.lax.conv_general_dilated(
        xp, weight, window_strides=(1, 1, 1), padding="VALID",
        dimension_numbers=("NCDHW", "OIDHW", "NCDHW"))
    conv = conv + bias.reshape(1, -1, 1, 1, 1)
    mean = jnp.mean(conv, axis=(0, 2, 3, 4), keepdims=True)
    var = jnp.mean((conv - mean) ** 2, axis=(0, 2, 3, 4), keepdims=True)
    y = (conv - mean) / jnp.sqrt(var + EPS) * gamma.reshape(1, -1, 1, 1, 1) \
        + beta.reshape(1, -1, 1, 1, 1)
    return jnp.where(y >= 0, y, SLOPE * y)


if __name__ == "__main__":
    # Small shapes consistent with the module: batch=2, in_features=4,
    # out_features=8, spatial D=H=W=8, kernel_size=3, padding=1 ('reflect').
    N, Cin, Cout, D, H, W = 2, 4, 8, 8, 8, 8

    key = jax.random.PRNGKey(0)
    kx, kw, kb = jax.random.split(key, 3)
    x = jax.random.normal(kx, (N, Cin, D, H, W), jnp.float32)

    # Deterministic parameter init (Conv3d-style uniform fan-in bound).
    fan_in = Cin * K * K * K
    bound = 1.0 / (fan_in ** 0.5)
    weight = jax.random.uniform(kw, (Cout, Cin, K, K, K), jnp.float32, -bound, bound)
    bias = jax.random.uniform(kb, (Cout,), jnp.float32, -bound, bound)
    gamma = jnp.ones((Cout,), jnp.float32)   # BatchNorm affine weight init
    beta = jnp.zeros((Cout,), jnp.float32)   # BatchNorm affine bias init

    out = jax.jit(same_block3d)(x, weight, bias, gamma, beta)
    out = jax.block_until_ready(out)

    ref = jax.block_until_ready(reference(x, weight, bias, gamma, beta))
    assert out.shape == (N, Cout, D, H, W)
    assert bool(jnp.all(jnp.isfinite(out)))
    assert bool(jnp.allclose(out, ref, rtol=1e-4, atol=1e-4)), \
        f"max abs err {float(jnp.max(jnp.abs(out - ref)))}"

    print("KERNEL_OK")
</pallas_src>

<mosaic_0001>
module attributes {stable_mosaic.version = 11 : i64} {
  func.func @conv_stats_kernel(%arg0: i32, %arg1: i32, %arg2: memref<1x1x10x8x150xf32, #tpu.memory_space<vmem>>, %arg3: memref<8x216xf32, #tpu.memory_space<vmem>>, %arg4: memref<1x1024xf32, #tpu.memory_space<vmem>>, %arg5: memref<1x8x1024xf32, #tpu.memory_space<vmem>>, %arg6: memref<1x8x2xf32, #tpu.memory_space<vmem>>) attributes {dimension_semantics = [#tpu.dimension_semantics<parallel>, #tpu.dimension_semantics<arbitrary>], iteration_bounds = array<i64: 2, 1>, scalar_prefetch = 0 : i64, scratch_operands = 0 : i64, tpu.core_type = #tpu.core_type<tc>, window_params = [{transform_indices = @transform_0, window_bounds = array<i64: 1, 1, 10, 8, 150>}, {pipeline_mode = #tpu.pipeline_mode<synchronous>, transform_indices = @transform_1, window_bounds = array<i64: 8, 216>}, {pipeline_mode = #tpu.pipeline_mode<synchronous>, transform_indices = @transform_2, window_bounds = array<i64: 1, 1024>}, {transform_indices = @transform_3, window_bounds = array<i64: 1, 8, 1024>}, {transform_indices = @transform_4, window_bounds = array<i64: 1, 8, 2>}]} {
    %c0 = arith.constant 0 : index
    %c0_0 = arith.constant 0 : index
    %c0_1 = arith.constant 0 : index
    %c0_2 = arith.constant 0 : index
    %c0_3 = arith.constant 0 : index
    %0 = vector.load %arg2[%c0, %c0_0, %c0_1, %c0_2, %c0_3] : memref<1x1x10x8x150xf32, #tpu.memory_space<vmem>>, vector<1x1x1x8x150xf32>
    %1 = vector.shape_cast %0 : vector<1x1x1x8x150xf32> to vector<8x150xf32>
    %c0_4 = arith.constant 0 : index
    %c0_5 = arith.constant 0 : index
    %c1 = arith.constant 1 : index
    %c0_6 = arith.constant 0 : index
    %c0_7 = arith.constant 0 : index
    %2 = vector.load %arg2[%c0_4, %c0_5, %c1, %c0_6, %c0_7] : memref<1x1x10x8x150xf32, #tpu.memory_space<vmem>>, vector<1x1x1x8x150xf32>
    %3 = vector.shape_cast %2 : vector<1x1x1x8x150xf32> to vector<8x150xf32>
    %c0_8 = arith.constant 0 : index
    %c0_9 = arith.constant 0 : index
    %c2 = arith.constant 2 : index
    %c0_10 = arith.constant 0 : index
    %c0_11 = arith.constant 0 : index
    %4 = vector.load %arg2[%c0_8, %c0_9, %c2, %c0_10, %c0_11] : memref<1x1x10x8x150xf32, #tpu.memory_space<vmem>>, vector<1x1x1x8x150xf32>
    %5 = vector.shape_cast %4 : vector<1x1x1x8x150xf32> to vector<8x150xf32>
    %c0_12 = arith.constant 0 : index
    %c0_13 = arith.constant 0 : index
    %c3 = arith.constant 3 : index
    %c0_14 = arith.constant 0 : index
    %c0_15 = arith.constant 0 : index
    %6 = vector.load %arg2[%c0_12, %c0_13, %c3, %c0_14, %c0_15] : memref<1x1x10x8x150xf32, #tpu.memory_space<vmem>>, vector<1x1x1x8x150xf32>
    %7 = vector.shape_cast %6 : vector<1x1x1x8x150xf32> to vector<8x150xf32>
    %c0_16 = arith.constant 0 : index
    %c0_17 = arith.constant 0 : index
    %c4 = arith.constant 4 : index
    %c0_18 = arith.constant 0 : index
    %c0_19 = arith.constant 0 : index
    %8 = vector.load %arg2[%c0_16, %c0_17, %c4, %c0_18, %c0_19] : memref<1x1x10x8x150xf32, #tpu.memory_space<vmem>>, vector<1x1x1x8x150xf32>
    %9 = vector.shape_cast %8 : vector<1x1x1x8x150xf32> to vector<8x150xf32>
    %c0_20 = arith.constant 0 : index
    %c0_21 = arith.constant 0 : index
    %c5 = arith.constant 5 : index
    %c0_22 = arith.constant 0 : index
    %c0_23 = arith.constant 0 : index
    %10 = vector.load %arg2[%c0_20, %c0_21, %c5, %c0_22, %c0_23] : memref<1x1x10x8x150xf32, #tpu.memory_space<vmem>>, vector<1x1x1x8x150xf32>
    %11 = vector.shape_cast %10 : vector<1x1x1x8x150xf32> to vector<8x150xf32>
    %c0_24 = arith.constant 0 : index
    %c0_25 = arith.constant 0 : index
    %c6 = arith.constant 6 : index
    %c0_26 = arith.constant 0 : index
    %c0_27 = arith.constant 0 : index
    %12 = vector.load %arg2[%c0_24, %c0_25, %c6, %c0_26, %c0_27] : memref<1x1x10x8x150xf32, #tpu.memory_space<vmem>>, vector<1x1x1x8x150xf32>
    %13 = vector.shape_cast %12 : vector<1x1x1x8x150xf32> to vector<8x150xf32>
    %c0_28 = arith.constant 0 : index
    %c0_29 = arith.constant 0 : index
    %c7 = arith.constant 7 : index
    %c0_30 = arith.constant 0 : index
    %c0_31 = arith.constant 0 : index
    %14 = vector.load %arg2[%c0_28, %c0_29, %c7, %c0_30, %c0_31] : memref<1x1x10x8x150xf32, #tpu.memory_space<vmem>>, vector<1x1x1x8x150xf32>
    %15 = vector.shape_cast %14 : vector<1x1x1x8x150xf32> to vector<8x150xf32>
    %c0_32 = arith.constant 0 : index
    %c0_33 = arith.constant 0 : index
    %c8 = arith.constant 8 : index
    %c0_34 = arith.constant 0 : index
    %c0_35 = arith.constant 0 : index
    %16 = vector.load %arg2[%c0_32, %c0_33, %c8, %c0_34, %c0_35] : memref<1x1x10x8x150xf32, #tpu.memory_space<vmem>>, vector<1x1x1x8x150xf32>
    %17 = vector.shape_cast %16 : vector<1x1x1x8x150xf32> to vector<8x150xf32>
    %c0_36 = arith.constant 0 : index
    %c0_37 = arith.constant 0 : index
    %c9 = arith.constant 9 : index
    %c0_38 = arith.constant 0 : index
    %c0_39 = arith.constant 0 : index
    %18 = vector.load %arg2[%c0_36, %c0_37, %c9, %c0_38, %c0_39] : memref<1x1x10x8x150xf32, #tpu.memory_space<vmem>>, vector<1x1x1x8x150xf32>
    %19 = vector.shape_cast %18 : vector<1x1x1x8x150xf32> to vector<8x150xf32>
    %20 = vector.extract_strided_slice %1 {offsets = [0, 0], sizes = [8, 128], strides = [1, 1]} : vector<8x150xf32> to vector<8x128xf32>
    %21 = vector.extract_strided_slice %1 {offsets = [0, 1], sizes = [8, 128], strides = [1, 1]} : vector<8x150xf32> to vector<8x128xf32>
    %22 = vector.extract_strided_slice %1 {offsets = [0, 2], sizes = [8, 128], strides = [1, 1]} : vector<8x150xf32> to vector<8x128xf32>
    %23 = vector.extract_strided_slice %1 {offsets = [0, 10], sizes = [8, 128], strides = [1, 1]} : vector<8x150xf32> to vector<8x128xf32>
    %24 = vector.extract_strided_slice %1 {offsets = [0, 11], sizes = [8, 128], strides = [1, 1]} : vector<8x150xf32> to vector<8x128xf32>
    %25 = vector.extract_strided_slice %1 {offsets = [0, 12], sizes = [8, 128], strides = [1, 1]} : vector<8x150xf32> to vector<8x128xf32>
    %26 = vector.extract_strided_slice %1 {offsets = [0, 20], sizes = [8, 128], strides = [1, 1]} : vector<8x150xf32> to vector<8x128xf32>
    %27 = vector.extract_strided_slice %1 {offsets = [0, 21], sizes = [8, 128], strides = [1, 1]} : vector<8x150xf32> to vector<8x128xf32>
    %28 = vector.extract_strided_slice %1 {offsets = [0, 22], sizes = [8, 128], strides = [1, 1]} : vector<8x150xf32> to vector<8x128xf32>
    %29 = vector.extract_strided_slice %3 {offsets = [0, 0], sizes = [8, 128], strides = [1, 1]} : vector<8x150xf32> to vector<8x128xf32>
    %30 = vector.extract_strided_slice %3 {offsets = [0, 1], sizes = [8, 128], strides = [1, 1]} : vector<8x150xf32> to vector<8x128xf32>
    %31 = vector.extract_strided_slice %3 {offsets = [0, 2], sizes = [8, 128], strides = [1, 1]} : vector<8x150xf32> to vector<8x128xf32>
    %32 = vector.extract_strided_slice %3 {offsets = [0, 10], sizes = [8, 128], strides = [1, 1]} : vector<8x150xf32> to vector<8x128xf32>
    %33 = vector.extract_strided_slice %3 {offsets = [0, 11], sizes = [8, 128], strides = [1, 1]} : vector<8x150xf32> to vector<8x128xf32>
    %34 = vector.extract_strided_slice %3 {offsets = [0, 12], sizes = [8, 128], strides = [1, 1]} : vector<8x150xf32> to vector<8x128xf32>
    %35 = vector.extract_strided_slice %3 {offsets = [0, 20], sizes = [8, 128], strides = [1, 1]} : vector<8x150xf32> to vector<8x128xf32>
    %36 = vector.extract_strided_slice %3 {offsets = [0, 21], sizes = [8, 128], strides = [1, 1]} : vector<8x150xf32> to vector<8x128xf32>
    %37 = vector.extract_strided_slice %3 {offsets = [0, 22], sizes = [8, 128], strides = [1, 1]} : vector<8x150xf32> to vector<8x128xf32>
    %38 = vector.extract_strided_slice %5 {offsets = [0, 0], sizes = [8, 128], strides = [1, 1]} : vector<8x150xf32> to vector<8x128xf32>
    %39 = vector.extract_strided_slice %5 {offsets = [0, 1], sizes = [8, 128], strides = [1, 1]} : vector<8x150xf32> to vector<8x128xf32>
    %40 = vector.extract_strided_slice %5 {offsets = [0, 2], sizes = [8, 128], strides = [1, 1]} : vector<8x150xf32> to vector<8x128xf32>
    %41 = vector.extract_strided_slice %5 {offsets = [0, 10], sizes = [8, 128], strides = [1, 1]} : vector<8x150xf32> to vector<8x128xf32>
    %42 = vector.extract_strided_slice %5 {offsets = [0, 11], sizes = [8, 128], strides = [1, 1]} : vector<8x150xf32> to vector<8x128xf32>
    %43 = vector.extract_strided_slice %5 {offsets = [0, 12], sizes = [8, 128], strides = [1, 1]} : vector<8x150xf32> to vector<8x128xf32>
    %44 = vector.extract_strided_slice %5 {offsets = [0, 20], sizes = [8, 128], strides = [1, 1]} : vector<8x150xf32> to vector<8x128xf32>
    %45 = vector.extract_strided_slice %5 {offsets = [0, 21], sizes = [8, 128], strides = [1, 1]} : vector<8x150xf32> to vector<8x128xf32>
    %46 = vector.extract_strided_slice %5 {offsets = [0, 22], sizes = [8, 128], strides = [1, 1]} : vector<8x150xf32> to vector<8x128xf32>
    %47 = tpu.concatenate %20, %21, %22, %23, %24, %25, %26, %27, %28, %29, %30, %31, %32, %33, %34, %35 in 0 : vector<8x128xf32>, vector<8x128xf32>, vector<8x128xf32>, vector<8x128xf32>, vector<8x128xf32>, vector<8x128xf32>, vector<8x128xf32>, vector<8x128xf32>, vector<8x128xf32>, vector<8x128xf32>, vector<8x128xf32>, vector<8x128xf32>, vector<8x128xf32>, vector<8x128xf32>, vector<8x128xf32>, vector<8x128xf32> -> vector<128x128xf32>
    %48 = tpu.concatenate %36, %37, %38, %39, %40, %41, %42, %43, %44, %45, %46 in 0 : vector<8x128xf32>, vector<8x128xf32>, vector<8x128xf32>, vector<8x128xf32>, vector<8x128xf32>, vector<8x128xf32>, vector<8x128xf32>, vector<8x128xf32>, vector<8x128xf32>, vector<8x128xf32>, vector<8x128xf32> -> vector<88x128xf32>
    %49 = tpu.concatenate %47, %48 in 0 : vector<128x128xf32>, vector<88x128xf32> -> vector<216x128xf32>
    %50 = vector.extract_strided_slice %3 {offsets = [0, 0], sizes = [8, 128], strides = [1, 1]} : vector<8x150xf32> to vector<8x128xf32>
    %51 = vector.extract_strided_slice %3 {offsets = [0, 1], sizes = [8, 128], strides = [1, 1]} : vector<8x150xf32> to vector<8x128xf32>
    %52 = vector.extract_strided_slice %3 {offsets = [0, 2], sizes = [8, 128], strides = [1, 1]} : vector<8x150xf32> to vector<8x128xf32>
    %53 = vector.extract_strided_slice %3 {offsets = [0, 10], sizes = [8, 128], strides = [1, 1]} : vector<8x150xf32> to vector<8x128xf32>
    %54 = vector.extract_strided_slice %3 {offsets = [0, 11], sizes = [8, 128], strides = [1, 1]} : vector<8x150xf32> to vector<8x128xf32>
    %55 = vector.extract_strided_slice %3 {offsets = [0, 12], sizes = [8, 128], strides = [1, 1]} : vector<8x150xf32> to vector<8x128xf32>
    %56 = vector.extract_strided_slice %3 {offsets = [0, 20], sizes = [8, 128], strides = [1, 1]} : vector<8x150xf32> to vector<8x128xf32>
    %57 = vector.extract_strided_slice %3 {offsets = [0, 21], sizes = [8, 128], strides = [1, 1]} : vector<8x150xf32> to vector<8x128xf32>
    %58 = vector.extract_strided_slice %3 {offsets = [0, 22], sizes = [8, 128], strides = [1, 1]} : vector<8x150xf32> to vector<8x128xf32>
    %59 = vector.extract_strided_slice %5 {offsets = [0, 0], sizes = [8, 128], strides = [1, 1]} : vector<8x150xf32> to vector<8x128xf32>
    %60 = vector.extract_strided_slice %5 {offsets = [0, 1], sizes = [8, 128], strides = [1, 1]} : vector<8x150xf32> to vector<8x128xf32>
    %61 = vector.extract_strided_slice %5 {offsets = [0, 2], sizes = [8, 128], strides = [1, 1]} : vector<8x150xf32> to vector<8x128xf32>
    %62 = vector.extract_strided_slice %5 {offsets = [0, 10], sizes = [8, 128], strides = [1, 1]} : vector<8x150xf32> to vector<8x128xf32>
    %63 = vector.extract_strided_slice %5 {offsets = [0, 11], sizes = [8, 128], strides = [1, 1]} : vector<8x150xf32> to vector<8x128xf32>
    %64 = vector.extract_strided_slice %5 {offsets = [0, 12], sizes = [8, 128], strides = [1, 1]} : vector<8x150xf32> to vector<8x128xf32>
    %65 = vector.extract_strided_slice %5 {offsets = [0, 20], sizes = [8, 128], strides = [1, 1]} : vector<8x150xf32> to vector<8x128xf32>
    %66 = vector.extract_strided_slice %5 {offsets = [0, 21], sizes = [8, 128], strides = [1, 1]} : vector<8x150xf32> to vector<8x128xf32>
    %67 = vector.extract_strided_slice %5 {offsets = [0, 22], sizes = [8, 128], strides = [1, 1]} : vector<8x150xf32> to vector<8x128xf32>
    %68 = vector.extract_strided_slice %7 {offsets = [0, 0], sizes = [8, 128], strides = [1, 1]} : vector<8x150xf32> to vector<8x128xf32>
    %69 = vector.extract_strided_slice %7 {offsets = [0, 1], sizes = [8, 128], strides = [1, 1]} : vector<8x150xf32> to vector<8x128xf32>
    %70 = vector.extract_strided_slice %7 {offsets = [0, 2], sizes = [8, 128], strides = [1, 1]} : vector<8x150xf32> to vector<8x128xf32>
    %71 = vector.extract_strided_slice %7 {offsets = [0, 10], sizes = [8, 128], strides = [1, 1]} : vector<8x150xf32> to vector<8x128xf32>
    %72 = vector.extract_strided_slice %7 {offsets = [0, 11], sizes = [8, 128], strides = [1, 1]} : vector<8x150xf32> to vector<8x128xf32>
    %73 = vector.extract_strided_slice %7 {offsets = [0, 12], sizes = [8, 128], strides = [1, 1]} : vector<8x150xf32> to vector<8x128xf32>
    %74 = vector.extract_strided_slice %7 {offsets = [0, 20], sizes = [8, 128], strides = [1, 1]} : vector<8x150xf32> to vector<8x128xf32>
    %75 = vector.extract_strided_slice %7 {offsets = [0, 21], sizes = [8, 128], strides = [1, 1]} : vector<8x150xf32> to vector<8x128xf32>
    %76 = vector.extract_strided_slice %7 {offsets = [0, 22], sizes = [8, 128], strides = [1, 1]} : vector<8x150xf32> to vector<8x128xf32>
    %77 = tpu.concatenate %50, %51, %52, %53, %54, %55, %56, %57, %58, %59, %60, %61, %62, %63, %64, %65 in 0 : vector<8x128xf32>, vector<8x128xf32>, vector<8x128xf32>, vector<8x128xf32>, vector<8x128xf32>, vector<8x128xf32>, vector<8x128xf32>, vector<8x128xf32>, vector<8x128xf32>, vector<8x128xf32>, vector<8x128xf32>, vector<8x128xf32>, vector<8x128xf32>, vector<8x128xf32>, vector<8x128xf32>, vector<8x128xf32> -> vector<128x128xf32>
    %78 = tpu.concatenate %66, %67, %68, %69, %70, %71, %72, %73, %74, %75, %76 in 0 : vector<8x128xf32>, vector<8x128xf32>, vector<8x128xf32>, vector<8x128xf32>, vector<8x128xf32>, vector<8x128xf32>, vector<8x128xf32>, vector<8x128xf32>, vector<8x128xf32>, vector<8x128xf32>, vector<8x128xf32> -> vector<88x128xf32>
    %79 = tpu.concatenate %77, %78 in 0 : vector<128x128xf32>, vector<88x128xf32> -> vector<216x128xf32>
    %80 = vector.extract_strided_slice %5 {offsets = [0, 0], sizes = [8, 128], strides = [1, 1]} : vector<8x150xf32> to vector<8x128xf32>
    %81 = vector.extract_strided_slice %5 {offsets = [0, 1], sizes = [8, 128], strides = [1, 1]} : vector<8x150xf32> to vector<8x128xf32>
    %82 = vector.extract_strided_slice %5 {offsets = [0, 2], sizes = [8, 128], strides = [1, 1]} : vector<8x150xf32> to vector<8x128xf32>
    %83 = vector.extract_strided_slice %5 {offsets = [0, 10], sizes = [8, 128], strides = [1, 1]} : vector<8x150xf32> to vector<8x128xf32>
    %84 = vector.extract_strided_slice %5 {offsets = [0, 11], sizes = [8, 128], strides = [1, 1]} : vector<8x150xf32> to vector<8x128xf32>
    %85 = vector.extract_strided_slice %5 {offsets = [0, 12], sizes = [8, 128], strides = [1, 1]} : vector<8x150xf32> to vector<8x128xf32>
    %86 = vector.extract_strided_slice %5 {offsets = [0, 20], sizes = [8, 128], strides = [1, 1]} : vector<8x150xf32> to vector<8x128xf32>
    %87 = vector.extract_strided_slice %5 {offsets = [0, 21], sizes = [8, 128], strides = [1, 1]} : vector<8x150xf32> to vector<8x128xf32>
    %88 = vector.extract_strided_slice %5 {offsets = [0, 22], sizes = [8, 128], strides = [1, 1]} : vector<8x150xf32> to vector<8x128xf32>
    %89 = vector.extract_strided_slice %7 {offsets = [0, 0], sizes = [8, 128], strides = [1, 1]} : vector<8x150xf32> to vector<8x128xf32>
    %90 = vector.extract_strided_slice %7 {offsets = [0, 1], sizes = [8, 128], strides = [1, 1]} : vector<8x150xf32> to vector<8x128xf32>
    %91 = vector.extract_strided_slice %7 {offsets = [0, 2], sizes = [8, 128], strides = [1, 1]} : vector<8x150xf32> to vector<8x128xf32>
    %92 = vector.extract_strided_slice %7 {offsets = [0, 10], sizes = [8, 128], strides = [1, 1]} : vector<8x150xf32> to vector<8x128xf32>
    %93 = vector.extract_strided_slice %7 {offsets = [0, 11], sizes = [8, 128], strides = [1, 1]} : vector<8x150xf32> to vector<8x128xf32>
    %94 = vector.extract_strided_slice %7 {offsets = [0, 12], sizes = [8, 128], strides = [1, 1]} : vector<8x150xf32> to vector<8x128xf32>
    %95 = vector.extract_strided_slice %7 {offsets = [0, 20], sizes = [8, 128], strides = [1, 1]} : vector<8x150xf32> to vector<8x128xf32>
    %96 = vector.extract_strided_slice %7 {offsets = [0, 21], sizes = [8, 128], strides = [1, 1]} : vector<8x150xf32> to vector<8x128xf32>
    %97 = vector.extract_strided_slice %7 {offsets = [0, 22], sizes = [8, 128], strides = [1, 1]} : vector<8x150xf32> to vector<8x128xf32>
    %98 = vector.extract_strided_slice %9 {offsets = [0, 0], sizes = [8, 128], strides = [1, 1]} : vector<8x150xf32> to vector<8x128xf32>
    %99 = vector.extract_strided_slice %9 {offsets = [0, 1], sizes = [8, 128], strides = [1, 1]} : vector<8x150xf32> to vector<8x128xf32>
    %100 = vector.extract_strided_slice %9 {offsets = [0, 2], sizes = [8, 128], strides = [1, 1]} : vector<8x150xf32> to vector<8x128xf32>
    %101 = vector.extract_strided_slice %9 {offsets = [0, 10], sizes = [8, 128], strides = [1, 1]} : vector<8x150xf32> to vector<8x128xf32>
    %102 = vector.extract_strided_slice %9 {offsets = [0, 11], sizes = [8, 128], strides = [1, 1]} : vector<8x150xf32> to vector<8x128xf32>
    %103 = vector.extract_strided_slice %9 {offsets = [0, 12], sizes = [8, 128], strides = [1, 1]} : vector<8x150xf32> to vector<8x128xf32>
    %104 = vector.extract_strided_slice %9 {offsets = [0, 20], sizes = [8, 128], strides = [1, 1]} : vector<8x150xf32> to vector<8x128xf32>
    %105 = vector.extract_strided_slice %9 {offsets = [0, 21], sizes = [8, 128], strides = [1, 1]} : vector<8x150xf32> to vector<8x128xf32>
    %106 = vector.extract_strided_slice %9 {offsets = [0, 22], sizes = [8, 128], strides = [1, 1]} : vector<8x150xf32> to vector<8x128xf32>
    %107 = tpu.concatenate %80, %81, %82, %83, %84, %85, %86, %87, %88, %89, %90, %91, %92, %93, %94, %95 in 0 : vector<8x128xf32>, vector<8x128xf32>, vector<8x128xf32>, vector<8x128xf32>, vector<8x128xf32>, vector<8x128xf32>, vector<8x128xf32>, vector<8x128xf32>, vector<8x128xf32>, vector<8x128xf32>, vector<8x128xf32>, vector<8x128xf32>, vector<8x128xf32>, vector<8x128xf32>, vector<8x128xf32>, vector<8x128xf32> -> vector<128x128xf32>
    %108 = tpu.concatenate %96, %97, %98, %99, %100, %101, %102, %103, %104, %105, %106 in 0 : vector<8x128xf32>, vector<8x128xf32>, vector<8x128xf32>, vector<8x128xf32>, vector<8x128xf32>, vector<8x128xf32>, vector<8x128xf32>, vector<8x128xf32>, vector<8x128xf32>, vector<8x128xf32>, vector<8x128xf32> -> vector<88x128xf32>
    %109 = tpu.concatenate %107, %108 in 0 : vector<128x128xf32>, vector<88x128xf32> -> vector<216x128xf32>
    %110 = vector.extract_strided_slice %7 {offsets = [0, 0], sizes = [8, 128], strides = [1, 1]} : vector<8x150xf32> to vector<8x128xf32>
    %111 = vector.extract_strided_slice %7 {offsets = [0, 1], sizes = [8, 128], strides = [1, 1]} : vector<8x150xf32> to vector<8x128xf32>
    %112 = vector.extract_strided_slice %7 {offsets = [0, 2], sizes = [8, 128], strides = [1, 1]} : vector<8x150xf32> to vector<8x128xf32>
    %113 = vector.extract_strided_slice %7 {offsets = [0, 10], sizes = [8, 128], strides = [1, 1]} : vector<8x150xf32> to vector<8x128xf32>
    %114 = vector.extract_strided_slice %7 {offsets = [0, 11], sizes = [8, 128], strides = [1, 1]} : vector<8x150xf32> to vector<8x128xf32>
    %115 = vector.extract_strided_slice %7 {offsets = [0, 12], sizes = [8, 128], strides = [1, 1]} : vector<8x150xf32> to vector<8x128xf32>
    %116 = vector.extract_strided_slice %7 {offsets = [0, 20], sizes = [8, 128], strides = [1, 1]} : vector<8x150xf32> to vector<8x128xf32>
    %117 = vector.extract_strided_slice %7 {offsets = [0, 21], sizes = [8, 128], strides = [1, 1]} : vector<8x150xf32> to vector<8x128xf32>
    %118 = vector.extract_strided_slice %7 {offsets = [0, 22], sizes = [8, 128], strides = [1, 1]} : vector<8x150xf32> to vector<8x128xf32>
    %119 = vector.extract_strided_slice %9 {offsets = [0, 0], sizes = [8, 128], strides = [1, 1]} : vector<8x150xf32> to vector<8x128xf32>
    %120 = vector.extract_strided_slice %9 {offsets = [0, 1], sizes = [8, 128], strides = [1, 1]} : vector<8x150xf32> to vector<8x128xf32>
    %121 = vector.extract_strided_slice %9 {offsets = [0, 2], sizes = [8, 128], strides = [1, 1]} : vector<8x150xf32> to vector<8x128xf32>
    %122 = vector.extract_strided_slice %9 {offsets = [0, 10], sizes = [8, 128], strides = [1, 1]} : vector<8x150xf32> to vector<8x128xf32>
    %123 = vector.extract_strided_slice %9 {offsets = [0, 11], sizes = [8, 128], strides = [1, 1]} : vector<8x150xf32> to vector<8x128xf32>
    %124 = vector.extract_strided_slice %9 {offsets = [0, 12], sizes = [8, 128], strides = [1, 1]} : vector<8x150xf32> to vector<8x128xf32>
    %125 = vector.extract_strided_slice %9 {offsets = [0, 20], sizes = [8, 128], strides = [1, 1]} : vector<8x150xf32> to vector<8x128xf32>
    %126 = vector.extract_strided_slice %9 {offsets = [0, 21], sizes = [8, 128], strides = [1, 1]} : vector<8x150xf32> to vector<8x128xf32>
    %127 = vector.extract_strided_slice %9 {offsets = [0, 22], sizes = [8, 128], strides = [1, 1]} : vector<8x150xf32> to vector<8x128xf32>
    %128 = vector.extract_strided_slice %11 {offsets = [0, 0], sizes = [8, 128], strides = [1, 1]} : vector<8x150xf32> to vector<8x128xf32>
    %129 = vector.extract_strided_slice %11 {offsets = [0, 1], sizes = [8, 128], strides = [1, 1]} : vector<8x150xf32> to vector<8x128xf32>
    %130 = vector.extract_strided_slice %11 {offsets = [0, 2], sizes = [8, 128], strides = [1, 1]} : vector<8x150xf32> to vector<8x128xf32>
    %131 = vector.extract_strided_slice %11 {offsets = [0, 10], sizes = [8, 128], strides = [1, 1]} : vector<8x150xf32> to vector<8x128xf32>
    %132 = vector.extract_strided_slice %11 {offsets = [0, 11], sizes = [8, 128], strides = [1, 1]} : vector<8x150xf32> to vector<8x128xf32>
    %133 = vector.extract_strided_slice %11 {offsets = [0, 12], sizes = [8, 128], strides = [1, 1]} : vector<8x150xf32> to vector<8x128xf32>
    %134 = vector.extract_strided_slice %11 {offsets = [0, 20], sizes = [8, 128], strides = [1, 1]} : vector<8x150xf32> to vector<8x128xf32>
    %135 = vector.extract_strided_slice %11 {offsets = [0, 21], sizes = [8, 128], strides = [1, 1]} : vector<8x150xf32> to vector<8x128xf32>
    %136 = vector.extract_strided_slice %11 {offsets = [0, 22], sizes = [8, 128], strides = [1, 1]} : vector<8x150xf32> to vector<8x128xf32>
    %137 = tpu.concatenate %110, %111, %112, %113, %114, %115, %116, %117, %118, %119, %120, %121, %122, %123, %124, %125 in 0 : vector<8x128xf32>, vector<8x128xf32>, vector<8x128xf32>, vector<8x128xf32>, vector<8x128xf32>, vector<8x128xf32>, vector<8x128xf32>, vector<8x128xf32>, vector<8x128xf32>, vector<8x128xf32>, vector<8x128xf32>, vector<8x128xf32>, vector<8x128xf32>, vector<8x128xf32>, vector<8x128xf32>, vector<8x128xf32> -> vector<128x128xf32>
    %138 = tpu.concatenate %126, %127, %128, %129, %130, %131, %132, %133, %134, %135, %136 in 0 : vector<8x128xf32>, vector<8x128xf32>, vector<8x128xf32>, vector<8x128xf32>, vector<8x128xf32>, vector<8x128xf32>, vector<8x128xf32>, vector<8x128xf32>, vector<8x128xf32>, vector<8x128xf32>, vector<8x128xf32> -> vector<88x128xf32>
    %139 = tpu.concatenate %137, %138 in 0 : vector<128x128xf32>, vector<88x128xf32> -> vector<216x128xf32>
    %140 = vector.extract_strided_slice %9 {offsets = [0, 0], sizes = [8, 128], strides = [1, 1]} : vector<8x150xf32> to vector<8x128xf32>
    %141 = vector.extract_strided_slice %9 {offsets = [0, 1], sizes = [8, 128], strides = [1, 1]} : vector<8x150xf32> to vector<8x128xf32>
    %142 = vector.extract_strided_slice %9 {offsets = [0, 2], sizes = [8, 128], strides = [1, 1]} : vector<8x150xf32> to vector<8x128xf32>
    %143 = vector.extract_strided_slice %9 {offsets = [0, 10], sizes = [8, 128], strides = [1, 1]} : vector<8x150xf32> to vector<8x128xf32>
    %144 = vector.extract_strided_slice %9 {offsets = [0, 11], sizes = [8, 128], strides = [1, 1]} : vector<8x150xf32> to vector<8x128xf32>
    %145 = vector.extract_strided_slice %9 {offsets = [0, 12], sizes = [8, 128], strides = [1, 1]} : vector<8x150xf32> to vector<8x128xf32>
    %146 = vector.extract_strided_slice %9 {offsets = [0, 20], sizes = [8, 128], strides = [1, 1]} : vector<8x150xf32> to vector<8x128xf32>
    %147 = vector.extract_strided_slice %9 {offsets = [0, 21], sizes = [8, 128], strides = [1, 1]} : vector<8x150xf32> to vector<8x128xf32>
    %148 = vector.extract_strided_slice %9 {offsets = [0, 22], sizes = [8, 128], strides = [1, 1]} : vector<8x150xf32> to vector<8x128xf32>
    %149 = vector.extract_strided_slice %11 {offsets = [0, 0], sizes = [8, 128], strides = [1, 1]} : vector<8x150xf32> to vector<8x128xf32>
    %150 = vector.extract_strided_slice %11 {offsets = [0, 1], sizes = [8, 128], strides = [1, 1]} : vector<8x150xf32> to vector<8x128xf32>
    %151 = vector.extract_strided_slice %11 {offsets = [0, 2], sizes = [8, 128], strides = [1, 1]} : vector<8x150xf32> to vector<8x128xf32>
    %152 = vector.extract_strided_slice %11 {offsets = [0, 10], sizes = [8, 128], strides = [1, 1]} : vector<8x150xf32> to vector<8x128xf32>
    %153 = vector.extract_strided_slice %11 {offsets = [0, 11], sizes = [8, 128], strides = [1, 1]} : vector<8x150xf32> to vector<8x128xf32>
    %154 = vector.extract_strided_slice %11 {offsets = [0, 12], sizes = [8, 128], strides = [1, 1]} : vector<8x150xf32> to vector<8x128xf32>
    %155 = vector.extract_strided_slice %11 {offsets = [0, 20], sizes = [8, 128], strides = [1, 1]} : vector<8x150xf32> to vector<8x128xf32>
    %156 = vector.extract_strided_slice %11 {offsets = [0, 21], sizes = [8, 128], strides = [1, 1]} : vector<8x150xf32> to vector<8x128xf32>
    %157 = vector.extract_strided_slice %11 {offsets = [0, 22], sizes = [8, 128], strides = [1, 1]} : vector<8x150xf32> to vector<8x128xf32>
    %158 = vector.extract_strided_slice %13 {offsets = [0, 0], sizes = [8, 128], strides = [1, 1]} : vector<8x150xf32> to vector<8x128xf32>
    %159 = vector.extract_strided_slice %13 {offsets = [0, 1], sizes = [8, 128], strides = [1, 1]} : vector<8x150xf32> to vector<8x128xf32>
    %160 = vector.extract_strided_slice %13 {offsets = [0, 2], sizes = [8, 128], strides = [1, 1]} : vector<8x150xf32> to vector<8x128xf32>
    %161 = vector.extract_strided_slice %13 {offsets = [0, 10], sizes = [8, 128], strides = [1, 1]} : vector<8x150xf32> to vector<8x128xf32>
    %162 = vector.extract_strided_slice %13 {offsets = [0, 11], sizes = [8, 128], strides = [1, 1]} : vector<8x150xf32> to vector<8x128xf32>
    %163 = vector.extract_strided_slice %13 {offsets = [0, 12], sizes = [8, 128], strides = [1, 1]} : vector<8x150xf32> to vector<8x128xf32>
    %164 = vector.extract_strided_slice %13 {offsets = [0, 20], sizes = [8, 128], strides = [1, 1]} : vector<8x150xf32> to vector<8x128xf32>
    %165 = vector.extract_strided_slice %13 {offsets = [0, 21], sizes = [8, 128], strides = [1, 1]} : vector<8x150xf32> to vector<8x128xf32>
    %166 = vector.extract_strided_slice %13 {offsets = [0, 22], sizes = [8, 128], strides = [1, 1]} : vector<8x150xf32> to vector<8x128xf32>
    %167 = tpu.concatenate %140, %141, %142, %143, %144, %145, %146, %147, %148, %149, %150, %151, %152, %153, %154, %155 in 0 : vector<8x128xf32>, vector<8x128xf32>, vector<8x128xf32>, vector<8x128xf32>, vector<8x128xf32>, vector<8x128xf32>, vector<8x128xf32>, vector<8x128xf32>, vector<8x128xf32>, vector<8x128xf32>, vector<8x128xf32>, vector<8x128xf32>, vector<8x128xf32>, vector<8x128xf32>, vector<8x128xf32>, vector<8x128xf32> -> vector<128x128xf32>
    %168 = tpu.concatenate %156, %157, %158, %159, %160, %161, %162, %163, %164, %165, %166 in 0 : vector<8x128xf32>, vector<8x128xf32>, vector<8x128xf32>, vector<8x128xf32>, vector<8x128xf32>, vector<8x128xf32>, vector<8x128xf32>, vector<8x128xf32>, vector<8x128xf32>, vector<8x128xf32>, vector<8x128xf32> -> vector<88x128xf32>
    %169 = tpu.concatenate %167, %168 in 0 : vector<128x128xf32>, vector<88x128xf32> -> vector<216x128xf32>
    %170 = vector.extract_strided_slice %11 {offsets = [0, 0], sizes = [8, 128], strides = [1, 1]} : vector<8x150xf32> to vector<8x128xf32>
    %171 = vector.extract_strided_slice %11 {offsets = [0, 1], sizes = [8, 128], strides = [1, 1]} : vector<8x150xf32> to vector<8x128xf32>
    %172 = vector.extract_strided_slice %11 {offsets = [0, 2], sizes = [8, 128], strides = [1, 1]} : vector<8x150xf32> to vector<8x128xf32>
    %173 = vector.extract_strided_slice %11 {offsets = [0, 10], sizes = [8, 128], strides = [1, 1]} : vector<8x150xf32> to vector<8x128xf32>
    %174 = vector.extract_strided_slice %11 {offsets = [0, 11], sizes = [8, 128], strides = [1, 1]} : vector<8x150xf32> to vector<8x128xf32>
    %175 = vector.extract_strided_slice %11 {offsets = [0, 12], sizes = [8, 128], strides = [1, 1]} : vector<8x150xf32> to vector<8x128xf32>
    %176 = vector.extract_strided_slice %11 {offsets = [0, 20], sizes = [8, 128], strides = [1, 1]} : vector<8x150xf32> to vector<8x128xf32>
    %177 = vector.extract_strided_slice %11 {offsets = [0, 21], sizes = [8, 128], strides = [1, 1]} : vector<8x150xf32> to vector<8x128xf32>
    %178 = vector.extract_strided_slice %11 {offsets = [0, 22], sizes = [8, 128], strides = [1, 1]} : vector<8x150xf32> to vector<8x128xf32>
    %179 = vector.extract_strided_slice %13 {offsets = [0, 0], sizes = [8, 128], strides = [1, 1]} : vector<8x150xf32> to vector<8x128xf32>
    %180 = vector.extract_strided_slice %13 {offsets = [0, 1], sizes = [8, 128], strides = [1, 1]} : vector<8x150xf32> to vector<8x128xf32>
    %181 = vector.extract_strided_slice %13 {offsets = [0, 2], sizes = [8, 128], strides = [1, 1]} : vector<8x150xf32> to vector<8x128xf32>
    %182 = vector.extract_strided_slice %13 {offsets = [0, 10], sizes = [8, 128], strides = [1, 1]} : vector<8x150xf32> to vector<8x128xf32>
    %183 = vector.extract_strided_slice %13 {offsets = [0, 11], sizes = [8, 128], strides = [1, 1]} : vector<8x150xf32> to vector<8x128xf32>
    %184 = vector.extract_strided_slice %13 {offsets = [0, 12], sizes = [8, 128], strides = [1, 1]} : vector<8x150xf32> to vector<8x128xf32>
    %185 = vector.extract_strided_slice %13 {offsets = [0, 20], sizes = [8, 128], strides = [1, 1]} : vector<8x150xf32> to vector<8x128xf32>
    %186 = vector.extract_strided_slice %13 {offsets = [0, 21], sizes = [8, 128], strides = [1, 1]} : vector<8x150xf32> to vector<8x128xf32>
    %187 = vector.extract_strided_slice %13 {offsets = [0, 22], sizes = [8, 128], strides = [1, 1]} : vector<8x150xf32> to vector<8x128xf32>
    %188 = vector.extract_strided_slice %15 {offsets = [0, 0], sizes = [8, 128], strides = [1, 1]} : vector<8x150xf32> to vector<8x128xf32>
    %189 = vector.extract_strided_slice %15 {offsets = [0, 1], sizes = [8, 128], strides = [1, 1]} : vector<8x150xf32> to vector<8x128xf32>
    %190 = vector.extract_strided_slice %15 {offsets = [0, 2], sizes = [8, 128], strides = [1, 1]} : vector<8x150xf32> to vector<8x128xf32>
    %191 = vector.extract_strided_slice %15 {offsets = [0, 10], sizes = [8, 128], strides = [1, 1]} : vector<8x150xf32> to vector<8x128xf32>
    %192 = vector.extract_strided_slice %15 {offsets = [0, 11], sizes = [8, 128], strides = [1, 1]} : vector<8x150xf32> to vector<8x128xf32>
    %193 = vector.extract_strided_slice %15 {offsets = [0, 12], sizes = [8, 128], strides = [1, 1]} : vector<8x150xf32> to vector<8x128xf32>
    %194 = vector.extract_strided_slice %15 {offsets = [0, 20], sizes = [8, 128], strides = [1, 1]} : vector<8x150xf32> to vector<8x128xf32>
    %195 = vector.extract_strided_slice %15 {offsets = [0, 21], sizes = [8, 128], strides = [1, 1]} : vector<8x150xf32> to vector<8x128xf32>
    %196 = vector.extract_strided_slice %15 {offsets = [0, 22], sizes = [8, 128], strides = [1, 1]} : vector<8x150xf32> to vector<8x128xf32>
    %197 = tpu.concatenate %170, %171, %172, %173, %174, %175, %176, %177, %178, %179, %180, %181, %182, %183, %184, %185 in 0 : vector<8x128xf32>, vector<8x128xf32>, vector<8x128xf32>, vector<8x128xf32>, vector<8x128xf32>, vector<8x128xf32>, vector<8x128xf32>, vector<8x128xf32>, vector<8x128xf32>, vector<8x128xf32>, vector<8x128xf32>, vector<8x128xf32>, vector<8x128xf32>, vector<8x128xf32>, vector<8x128xf32>, vector<8x128xf32> -> vector<128x128xf32>
    %198 = tpu.concatenate %186, %187, %188, %189, %190, %191, %192, %193, %194, %195, %196 in 0 : vector<8x128xf32>, vector<8x128xf32>, vector<8x128xf32>, vector<8x128xf32>, vector<8x128xf32>, vector<8x128xf32>, vector<8x128xf32>, vector<8x128xf32>, vector<8x128xf32>, vector<8x128xf32>, vector<8x128xf32> -> vector<88x128xf32>
    %199 = tpu.concatenate %197, %198 in 0 : vector<128x128xf32>, vector<88x128xf32> -> vector<216x128xf32>
    %200 = vector.extract_strided_slice %13 {offsets = [0, 0], sizes = [8, 128], strides = [1, 1]} : vector<8x150xf32> to vector<8x128xf32>
    %201 = vector.extract_strided_slice %13 {offsets = [0, 1], sizes = [8, 128], strides = [1, 1]} : vector<8x150xf32> to vector<8x128xf32>
    %202 = vector.extract_strided_slice %13 {offsets = [0, 2], sizes = [8, 128], strides = [1, 1]} : vector<8x150xf32> to vector<8x128xf32>
    %203 = vector.extract_strided_slice %13 {offsets = [0, 10], sizes = [8, 128], strides = [1, 1]} : vector<8x150xf32> to vector<8x128xf32>
    %204 = vector.extract_strided_slice %13 {offsets = [0, 11], sizes = [8, 128], strides = [1, 1]} : vector<8x150xf32> to vector<8x128xf32>
    %205 = vector.extract_strided_slice %13 {offsets = [0, 12], sizes = [8, 128], strides = [1, 1]} : vector<8x150xf32> to vector<8x128xf32>
    %206 = vector.extract_strided_slice %13 {offsets = [0, 20], sizes = [8, 128], strides = [1, 1]} : vector<8x150xf32> to vector<8x128xf32>
    %207 = vector.extract_strided_slice %13 {offsets = [0, 21], sizes = [8, 128], strides = [1, 1]} : vector<8x150xf32> to vector<8x128xf32>
    %208 = vector.extract_strided_slice %13 {offsets = [0, 22], sizes = [8, 128], strides = [1, 1]} : vector<8x150xf32> to vector<8x128xf32>
    %209 = vector.extract_strided_slice %15 {offsets = [0, 0], sizes = [8, 128], strides = [1, 1]} : vector<8x150xf32> to vector<8x128xf32>
    %210 = vector.extract_strided_slice %15 {offsets = [0, 1], sizes = [8, 128], strides = [1, 1]} : vector<8x150xf32> to vector<8x128xf32>
    %211 = vector.extract_strided_slice %15 {offsets = [0, 2], sizes = [8, 128], strides = [1, 1]} : vector<8x150xf32> to vector<8x128xf32>
    %212 = vector.extract_strided_slice %15 {offsets = [0, 10], sizes = [8, 128], strides = [1, 1]} : vector<8x150xf32> to vector<8x128xf32>
    %213 = vector.extract_strided_slice %15 {offsets = [0, 11], sizes = [8, 128], strides = [1, 1]} : vector<8x150xf32> to vector<8x128xf32>
    %214 = vector.extract_strided_slice %15 {offsets = [0, 12], sizes = [8, 128], strides = [1, 1]} : vector<8x150xf32> to vector<8x128xf32>
    %215 = vector.extract_strided_slice %15 {offsets = [0, 20], sizes = [8, 128], strides = [1, 1]} : vector<8x150xf32> to vector<8x128xf32>
    %216 = vector.extract_strided_slice %15 {offsets = [0, 21], sizes = [8, 128], strides = [1, 1]} : vector<8x150xf32> to vector<8x128xf32>
    %217 = vector.extract_strided_slice %15 {offsets = [0, 22], sizes = [8, 128], strides = [1, 1]} : vector<8x150xf32> to vector<8x128xf32>
    %218 = vector.extract_strided_slice %17 {offsets = [0, 0], sizes = [8, 128], strides = [1, 1]} : vector<8x150xf32> to vector<8x128xf32>
    %219 = vector.extract_strided_slice %17 {offsets = [0, 1], sizes = [8, 128], strides = [1, 1]} : vector<8x150xf32> to vector<8x128xf32>
    %220 = vector.extract_strided_slice %17 {offsets = [0, 2], sizes = [8, 128], strides = [1, 1]} : vector<8x150xf32> to vector<8x128xf32>
    %221 = vector.extract_strided_slice %17 {offsets = [0, 10], sizes = [8, 128], strides = [1, 1]} : vector<8x150xf32> to vector<8x128xf32>
    %222 = vector.extract_strided_slice %17 {offsets = [0, 11], sizes = [8, 128], strides = [1, 1]} : vector<8x150xf32> to vector<8x128xf32>
    %223 = vector.extract_strided_slice %17 {offsets = [0, 12], sizes = [8, 128], strides = [1, 1]} : vector<8x150xf32> to vector<8x128xf32>
    %224 = vector.extract_strided_slice %17 {offsets = [0, 20], sizes = [8, 128], strides = [1, 1]} : vector<8x150xf32> to vector<8x128xf32>
    %225 = vector.extract_strided_slice %17 {offsets = [0, 21], sizes = [8, 128], strides = [1, 1]} : vector<8x150xf32> to vector<8x128xf32>
    %226 = vector.extract_strided_slice %17 {offsets = [0, 22], sizes = [8, 128], strides = [1, 1]} : vector<8x150xf32> to vector<8x128xf32>
    %227 = tpu.concatenate %200, %201, %202, %203, %204, %205, %206, %207, %208, %209, %210, %211, %212, %213, %214, %215 in 0 : vector<8x128xf32>, vector<8x128xf32>, vector<8x128xf32>, vector<8x128xf32>, vector<8x128xf32>, vector<8x128xf32>, vector<8x128xf32>, vector<8x128xf32>, vector<8x128xf32>, vector<8x128xf32>, vector<8x128xf32>, vector<8x128xf32>, vector<8x128xf32>, vector<8x128xf32>, vector<8x128xf32>, vector<8x128xf32> -> vector<128x128xf32>
    %228 = tpu.concatenate %216, %217, %218, %219, %220, %221, %222, %223, %224, %225, %226 in 0 : vector<8x128xf32>, vector<8x128xf32>, vector<8x128xf32>, vector<8x128xf32>, vector<8x128xf32>, vector<8x128xf32>, vector<8x128xf32>, vector<8x128xf32>, vector<8x128xf32>, vector<8x128xf32>, vector<8x128xf32> -> vector<88x128xf32>
    %229 = tpu.concatenate %227, %228 in 0 : vector<128x128xf32>, vector<88x128xf32> -> vector<216x128xf32>
    %230 = vector.extract_strided_slice %15 {offsets = [0, 0], sizes = [8, 128], strides = [1, 1]} : vector<8x150xf32> to vector<8x128xf32>
    %231 = vector.extract_strided_slice %15 {offsets = [0, 1], sizes = [8, 128], strides = [1, 1]} : vector<8x150xf32> to vector<8x128xf32>
    %232 = vector.extract_strided_slice %15 {offsets = [0, 2], sizes = [8, 128], strides = [1, 1]} : vector<8x150xf32> to vector<8x128xf32>
    %233 = vector.extract_strided_slice %15 {offsets = [0, 10], sizes = [8, 128], strides = [1, 1]} : vector<8x150xf32> to vector<8x128xf32>
    %234 = vector.extract_strided_slice %15 {offsets = [0, 11], sizes = [8, 128], strides = [1, 1]} : vector<8x150xf32> to vector<8x128xf32>
    %235 = vector.extract_strided_slice %15 {offsets = [0, 12], sizes = [8, 128], strides = [1, 1]} : vector<8x150xf32> to vector<8x128xf32>
    %236 = vector.extract_strided_slice %15 {offsets = [0, 20], sizes = [8, 128], strides = [1, 1]} : vector<8x150xf32> to vector<8x128xf32>
    %237 = vector.extract_strided_slice %15 {offsets = [0, 21], sizes = [8, 128], strides = [1, 1]} : vector<8x150xf32> to vector<8x128xf32>
    %238 = vector.extract_strided_slice %15 {offsets = [0, 22], sizes = [8, 128], strides = [1, 1]} : vector<8x150xf32> to vector<8x128xf32>
    %239 = vector.extract_strided_slice %17 {offsets = [0, 0], sizes = [8, 128], strides = [1, 1]} : vector<8x150xf32> to vector<8x128xf32>
    %240 = vector.extract_strided_slice %17 {offsets = [0, 1], sizes = [8, 128], strides = [1, 1]} : vector<8x150xf32> to vector<8x128xf32>
    %241 = vector.extract_strided_slice %17 {offsets = [0, 2], sizes = [8, 128], strides = [1, 1]} : vector<8x150xf32> to vector<8x128xf32>
    %242 = vector.extract_strided_slice %17 {offsets = [0, 10], sizes = [8, 128], strides = [1, 1]} : vector<8x150xf32> to vector<8x128xf32>
    %243 = vector.extract_strided_slice %17 {offsets = [0, 11], sizes = [8, 128], strides = [1, 1]} : vector<8x150xf32> to vector<8x128xf32>
    %244 = vector.extract_strided_slice %17 {offsets = [0, 12], sizes = [8, 128], strides = [1, 1]} : vector<8x150xf32> to vector<8x128xf32>
    %245 = vector.extract_strided_slice %17 {offsets = [0, 20], sizes = [8, 128], strides = [1, 1]} : vector<8x150xf32> to vector<8x128xf32>
    %246 = vector.extract_strided_slice %17 {offsets = [0, 21], sizes = [8, 128], strides = [1, 1]} : vector<8x150xf32> to vector<8x128xf32>
    %247 = vector.extract_strided_slice %17 {offsets = [0, 22], sizes = [8, 128], strides = [1, 1]} : vector<8x150xf32> to vector<8x128xf32>
    %248 = vector.extract_strided_slice %19 {offsets = [0, 0], sizes = [8, 128], strides = [1, 1]} : vector<8x150xf32> to vector<8x128xf32>
    %249 = vector.extract_strided_slice %19 {offsets = [0, 1], sizes = [8, 128], strides = [1, 1]} : vector<8x150xf32> to vector<8x128xf32>
    %250 = vector.extract_strided_slice %19 {offsets = [0, 2], sizes = [8, 128], strides = [1, 1]} : vector<8x150xf32> to vector<8x128xf32>
    %251 = vector.extract_strided_slice %19 {offsets = [0, 10], sizes = [8, 128], strides = [1, 1]} : vector<8x150xf32> to vector<8x128xf32>
    %252 = vector.extract_strided_slice %19 {offsets = [0, 11], sizes = [8, 128], strides = [1, 1]} : vector<8x150xf32> to vector<8x128xf32>
    %253 = vector.extract_strided_slice %19 {offsets = [0, 12], sizes = [8, 128], strides = [1, 1]} : vector<8x150xf32> to vector<8x128xf32>
    %254 = vector.extract_strided_slice %19 {offsets = [0, 20], sizes = [8, 128], strides = [1, 1]} : vector<8x150xf32> to vector<8x128xf32>
    %255 = vector.extract_strided_slice %19 {offsets = [0, 21], sizes = [8, 128], strides = [1, 1]} : vector<8x150xf32> to vector<8x128xf32>
    %256 = vector.extract_strided_slice %19 {offsets = [0, 22], sizes = [8, 128], strides = [1, 1]} : vector<8x150xf32> to vector<8x128xf32>
    %257 = tpu.concatenate %230, %231, %232, %233, %234, %235, %236, %237, %238, %239, %240, %241, %242, %243, %244, %245 in 0 : vector<8x128xf32>, vector<8x128xf32>, vector<8x128xf32>, vector<8x128xf32>, vector<8x128xf32>, vector<8x128xf32>, vector<8x128xf32>, vector<8x128xf32>, vector<8x128xf32>, vector<8x128xf32>, vector<8x128xf32>, vector<8x128xf32>, vector<8x128xf32>, vector<8x128xf32>, vector<8x128xf32>, vector<8x128xf32> -> vector<128x128xf32>
    %258 = tpu.concatenate %246, %247, %248, %249, %250, %251, %252, %253, %254, %255, %256 in 0 : vector<8x128xf32>, vector<8x128xf32>, vector<8x128xf32>, vector<8x128xf32>, vector<8x128xf32>, vector<8x128xf32>, vector<8x128xf32>, vector<8x128xf32>, vector<8x128xf32>, vector<8x128xf32>, vector<8x128xf32> -> vector<88x128xf32>
    %259 = tpu.concatenate %257, %258 in 0 : vector<128x128xf32>, vector<88x128xf32> -> vector<216x128xf32>
    %260 = tpu.concatenate %49, %79, %109, %139, %169, %199, %229, %259 in 1 : vector<216x128xf32>, vector<216x128xf32>, vector<216x128xf32>, vector<216x128xf32>, vector<216x128xf32>, vector<216x128xf32>, vector<216x128xf32>, vector<216x128xf32> -> vector<216x1024xf32>
    %c0_40 = arith.constant 0 : index
    %c0_41 = arith.constant 0 : index
    %261 = vector.load %arg3[%c0_40, %c0_41] : memref<8x216xf32, #tpu.memory_space<vmem>>, vector<8x216xf32>
    %cst = arith.constant dense<0.000000e+00> : vector<8x1024xf32>
    %262 = tpu.matmul %261, %260, %cst {dimension_numbers = #tpu.dot_dimension_numbers<[1], [0], [0], [1], [0, 0, 1, 1], [], []>} : vector<8x216xf32>, vector<216x1024xf32>, vector<8x1024xf32> -> vector<8x1024xf32>
    %c0_42 = arith.constant 0 : index
    %c0_43 = arith.constant 0 : index
    %c0_44 = arith.constant 0 : index
    %263 = vector.load %arg5[%c0_42, %c0_43, %c0_44] : memref<1x8x1024xf32, #tpu.memory_space<vmem>>, vector<1x8x1024xf32>
    %264 = vector.shape_cast %263 : vector<1x8x1024xf32> to vector<8x1024xf32>
    %265 = vector.shape_cast %262 : vector<8x1024xf32> to vector<1x8x1024xf32>
    tpu.vector_store %arg5[%c0_42, %c0_43, %c0_44], %265 {strides = array<i32>} : memref<1x8x1024xf32, #tpu.memory_space<vmem>>, vector<1x8x1024xf32>,
    %c0_45 = arith.constant 0 : index
    %c0_46 = arith.constant 0 : index
    %266 = vector.load %arg4[%c0_45, %c0_46] : memref<1x1024xf32, #tpu.memory_space<vmem>>, vector<1x1024xf32>
    %267 = vector.broadcast %266 : vector<1x1024xf32> to vector<8x1024xf32>
    %268 = arith.mulf %262, %267 : vector<8x1024xf32>
    %cst_47 = arith.constant dense<0.000000e+00> : vector<8xf32>
    %269 = vector.multi_reduction <add>, %268, %cst_47 [1] : vector<8x1024xf32> to vector<8xf32>
    %270 = vector.shape_cast %269 : vector<8xf32> to vector<8x1xf32>
    %271 = arith.mulf %268, %262 : vector<8x1024xf32>
    %cst_48 = arith.constant dense<0.000000e+00> : vector<8xf32>
    %272 = vector.multi_reduction <add>, %271, %cst_48 [1] : vector<8x1024xf32> to vector<8xf32>
    %273 = vector.shape_cast %272 : vector<8xf32> to vector<8x1xf32>
    %274 = tpu.concatenate %270, %273 in 1 : vector<8x1xf32>, vector<8x1xf32> -> vector<8x2xf32>
    %c0_i32 = arith.constant 0 : i32
    %275 = arith.cmpi eq, %arg1, %c0_i32 : i32
    %276 = arith.extui %275 : i1 to i32
    %c0_i32_49 = arith.constant 0 : i32
    %277 = arith.cmpi ne, %276, %c0_i32_49 : i32
    scf.if %277 {
      %cst_56 = arith.constant 0.000000e+00 : f32
      %284 = vector.broadcast %cst_56 : f32 to vector<8x2xf32>
      %c0_57 = arith.constant 0 : index
      %c0_58 = arith.constant 0 : index
      %c0_59 = arith.constant 0 : index
      %285 = vector.load %arg6[%c0_57, %c0_58, %c0_59] : memref<1x8x2xf32, #tpu.memory_space<vmem>>, vector<1x8x2xf32>
      %286 = vector.shape_cast %285 : vector<1x8x2xf32> to vector<8x2xf32>
      %287 = vector.shape_cast %284 : vector<8x2xf32> to vector<1x8x2xf32>
      tpu.vector_store %arg6[%c0_57, %c0_58, %c0_59], %287 {strides = array<i32>} : memref<1x8x2xf32, #tpu.memory_space<vmem>>, vector<1x8x2xf32>,
    } else {
    }
    %c0_50 = arith.constant 0 : index
    %c0_51 = arith.constant 0 : index
    %c0_52 = arith.constant 0 : index
    %278 = vector.load %arg6[%c0_50, %c0_51, %c0_52] : memref<1x8x2xf32, #tpu.memory_space<vmem>>, vector<1x8x2xf32>
    %279 = vector.shape_cast %278 : vector<1x8x2xf32> to vector<8x2xf32>
    %280 = arith.addf %279, %274 : vector<8x2xf32>
    %c0_53 = arith.constant 0 : index
    %c0_54 = arith.constant 0 : index
    %c0_55 = arith.constant 0 : index
    %281 = vector.load %arg6[%c0_53, %c0_54, %c0_55] : memref<1x8x2xf32, #tpu.memory_space<vmem>>, vector<1x8x2xf32>
    %282 = vector.shape_cast %281 : vector<1x8x2xf32> to vector<8x2xf32>
    %283 = vector.shape_cast %280 : vector<8x2xf32> to vector<1x8x2xf32>
    tpu.vector_store %arg6[%c0_53, %c0_54, %c0_55], %283 {strides = array<i32>} : memref<1x8x2xf32, #tpu.memory_space<vmem>>, vector<1x8x2xf32>,
    return
  }
  func.func @transform_0(%arg0: i32, %arg1: i32) -> (i32, i32, i32, i32, i32) {
    %c0_i32 = arith.constant 0 : i32
    %c0_i32_0 = arith.constant 0 : i32
    %c0_i32_1 = arith.constant 0 : i32
    %c0_i32_2 = arith.constant 0 : i32
    return %arg0, %arg1, %c0_i32, %c0_i32_0, %c0_i32_1 : i32, i32, i32, i32, i32
  }
  func.func @transform_1(%arg0: i32, %arg1: i32) -> (i32, i32) {
    %c0_i32 = arith.constant 0 : i32
    %c0_i32_0 = arith.constant 0 : i32
    %c0_i32_1 = arith.constant 0 : i32
    return %c0_i32, %c0_i32_0 : i32, i32
  }
  func.func @transform_2(%arg0: i32, %arg1: i32) -> (i32, i32) {
    %c0_i32 = arith.constant 0 : i32
    %c0_i32_0 = arith.constant 0 : i32
    %c0_i32_1 = arith.constant 0 : i32
    return %c0_i32, %c0_i32_0 : i32, i32
  }
  func.func @transform_3(%arg0: i32, %arg1: i32) -> (i32, i32, i32) {
    %c0_i32 = arith.constant 0 : i32
    %c0_i32_0 = arith.constant 0 : i32
    return %arg0, %c0_i32, %arg1 : i32, i32, i32
  }
  func.func @transform_4(%arg0: i32, %arg1: i32) -> (i32, i32, i32) {
    %c0_i32 = arith.constant 0 : i32
    %c0_i32_0 = arith.constant 0 : i32
    %c0_i32_1 = arith.constant 0 : i32
    return %arg0, %c0_i32, %c0_i32_0 : i32, i32, i32
  }
}

module attributes {stable_mosaic.version = 11 : i64} {
  func.func @bn_lrelu_kernel(%arg0: i32, %arg1: i32, %arg2: memref<1x8x1024xf32, #tpu.memory_space<vmem>>, %arg3: memref<8x1xf32, #tpu.memory_space<vmem>>, %arg4: memref<8x1xf32, #tpu.memory_space<vmem>>, %arg5: memref<1x8x1024xf32, #tpu.memory_space<vmem>>) attributes {dimension_semantics = [#tpu.dimension_semantics<parallel>, #tpu.dimension_semantics<parallel>], iteration_bounds = array<i64: 2, 1>, scalar_prefetch = 0 : i64, scratch_operands = 0 : i64, tpu.core_type = #tpu.core_type<tc>, window_params = [{transform_indices = @transform_0, window_bounds = array<i64: 1, 8, 1024>}, {pipeline_mode = #tpu.pipeline_mode<synchronous>, transform_indices = @transform_1, window_bounds = array<i64: 8, 1>}, {pipeline_mode = #tpu.pipeline_mode<synchronous>, transform_indices = @transform_2, window_bounds = array<i64: 8, 1>}, {transform_indices = @transform_3, window_bounds = array<i64: 1, 8, 1024>}]} {
    %c0 = arith.constant 0 : index
    %c0_0 = arith.constant 0 : index
    %c0_1 = arith.constant 0 : index
    %0 = vector.load %arg2[%c0, %c0_0, %c0_1] : memref<1x8x1024xf32, #tpu.memory_space<vmem>>, vector<1x8x1024xf32>
    %1 = vector.shape_cast %0 : vector<1x8x1024xf32> to vector<8x1024xf32>
    %c0_2 = arith.constant 0 : index
    %c0_3 = arith.constant 0 : index
    %2 = vector.load %arg3[%c0_2, %c0_3] : memref<8x1xf32, #tpu.memory_space<vmem>>, vector<8x1xf32>
    %3 = vector.broadcast %2 : vector<8x1xf32> to vector<8x1024xf32>
    %4 = arith.mulf %1, %3 : vector<8x1024xf32>
    %c0_4 = arith.constant 0 : index
    %c0_5 = arith.constant 0 : index
    %5 = vector.load %arg4[%c0_4, %c0_5] : memref<8x1xf32, #tpu.memory_space<vmem>>, vector<8x1xf32>
    %6 = vector.broadcast %5 : vector<8x1xf32> to vector<8x1024xf32>
    %7 = arith.addf %4, %6 : vector<8x1024xf32>
    %cst = arith.constant 0.000000e+00 : f32
    %8 = vector.broadcast %cst : f32 to vector<8x1024xf32>
    %9 = arith.cmpf oge, %7, %8 : vector<8x1024xf32>
    %cst_6 = arith.constant 2.000000e-01 : f32
    %10 = vector.broadcast %cst_6 : f32 to vector<8x1024xf32>
    %11 = arith.mulf %10, %7 : vector<8x1024xf32>
    %12 = arith.select %9, %7, %11 : vector<8x1024xi1>, vector<8x1024xf32>
    %c0_7 = arith.constant 0 : index
    %c0_8 = arith.constant 0 : index
    %c0_9 = arith.constant 0 : index
    %13 = vector.load %arg5[%c0_7, %c0_8, %c0_9] : memref<1x8x1024xf32, #tpu.memory_space<vmem>>, vector<1x8x1024xf32>
    %14 = vector.shape_cast %13 : vector<1x8x1024xf32> to vector<8x1024xf32>
    %15 = vector.shape_cast %12 : vector<8x1024xf32> to vector<1x8x1024xf32>
    tpu.vector_store %arg5[%c0_7, %c0_8, %c0_9], %15 {strides = array<i32>} : memref<1x8x1024xf32, #tpu.memory_space<vmem>>, vector<1x8x1024xf32>,
    return
  }
  func.func @transform_0(%arg0: i32, %arg1: i32) -> (i32, i32, i32) {
    %c0_i32 = arith.constant 0 : i32
    %c0_i32_0 = arith.constant 0 : i32
    return %arg0, %c0_i32, %arg1 : i32, i32, i32
  }
  func.func @transform_1(%arg0: i32, %arg1: i32) -> (i32, i32) {
    %c0_i32 = arith.constant 0 : i32
    %c0_i32_0 = arith.constant 0 : i32
    %c0_i32_1 = arith.constant 0 : i32
    return %c0_i32, %c0_i32_0 : i32, i32
  }
  func.func @transform_2(%arg0: i32, %arg1: i32) -> (i32, i32) {
    %c0_i32 = arith.constant 0 : i32
    %c0_i32_0 = arith.constant 0 : i32
    %c0_i32_1 = arith.constant 0 : i32
    return %c0_i32, %c0_i32_0 : i32, i32
  }
  func.func @transform_3(%arg0: i32, %arg1: i32) -> (i32, i32, i32) {
    %c0_i32 = arith.constant 0 : i32
    %c0_i32_0 = arith.constant 0 : i32
    return %arg0, %c0_i32, %arg1 : i32, i32, i32
  }
}

</mosaic_0001>

<bundles_post_ra>
// kernel: tile.8
= control target key start
LH: loop header
LB: loop body
LE: loop exit
PB: predicated region body
PF: predicated region fallthrough
CT: control target
= control target key end

     0   :  { %s22_s0 = inlined_call_operand.vmem [shape: f32[128], index: 0, kind: input, shape index: {}]   ;;  %s23_s1 = inlined_call_operand.vmem [shape: f32[8,128], index: 1, kind: output, shape index: {}]  }
   0x1   :  { %v4_v0 = vld [vmem:[%s22_s0] ss:$0 sm:$0xff] }
   0x2   :  { %5 = vst [vmem:[%s23_s1] sm:$0xff] %v4_v0 }

// kernel: same_block3d.3
= control target key start
LH: loop header
LB: loop body
LE: loop exit
PB: predicated region body
PF: predicated region fallthrough
CT: control target
= control target key end

     0   :  { %s449_s12 = smov 0   ;;  %s451_s13 = smov 0   ;;  %s503_s0 = inlined_call_operand.vmem [shape: f32[2,8,1024], index: 0, kind: input, shape index: {}]   ;;  %s504_s1 = inlined_call_operand.vmem [shape: f32[8,1], index: 1, kind: input, shape index: {}]   ;;  %s505_s2 = inlined_call_operand.vmem [shape: f32[8,1], index: 2, kind: input, shape index: {}]   ;;  %s506_s3 = inlined_call_operand.vmem [shape: f32[2,8,1024], index: 3, kind: output, shape index: {}]  }
   0x1   :  { %s453_s14 = smov 0  }
   0x2 LB: > { %s25_s15 = sadd.s32 1, %s422_s13  ;;  %p369_p0 = scmp.ge.s32.totalorder %s426_s14, 1  ;;  %s426_s14 = sphi %s453_s14, %s13_s14   ;;  %s422_s13 = sphi %s451_s13, %s508_s13   ;;  %s418_s12 = sphi %s449_s12, %s507_s12  }
   0x3   : > { %p27_p1 = scmp.ge.s32.totalorder %s25_s15, 2  ;;  %p158_p2 = scmp.lt.s32.totalorder %s426_s14, 3 }
   0x5   : > { %s510_s15 = smov (%p27_p1, %s25_s15), 0  ;;  %p159_p3 = pnand %p369_p0, %p158_p2 }
   0x6   : > { %p191_p4 = scmp.lt.s32.totalorder (!%p159_p3), %s418_s12, 1 }
   0x7   : > { %162 = sbr.rel (%p159_p3) target bundleno = 154 (0x9a), region = 32 }
   0xc   : > { %v218_v0 = vld [vmem:[%s504_s1] sm:$0xff]  ;;  %v428_v1 = vmov 0   ;;  %s512_s12 = smov (!%p191_p4, %s418_s12), 1 }
   0xd   : > { %403 = vset.pattern.permute.xlu0 %v428_v1  ;;  %v232_v2 = vld [vmem:[%s505_s2] sm:$0xff]  ;;  %s376_s20 = sshll.u32 %s512_s12, 6 }
   0xe   : > { %221 = vperm.xlu0 %403, %v218_v0   ;;  %s198_s23 = scalar_lea.vmem %s503_s0, %s376_s20  ;;  %s208_s26 = scalar_lea.vmem %s506_s3, %s376_s20 }
   0xf   : > { %v210_v3 = vld [vmem:[%s198_s23] sm:$0xff]  ;;  %v211_v4 = vld [vmem:[%s198_s23 + $0x8] sm:$0xff]  ;;  %v212_v6 = vld [vmem:[%s198_s23 + $0x10] sm:$0xff] }
  0x10   : > { %v213_v7 = vld [vmem:[%s198_s23 + $0x18] sm:$0xff]  ;;  %v214_v8 = vld [vmem:[%s198_s23 + $0x20] sm:$0xff]  ;;  %v215_v9 = vld [vmem:[%s198_s23 + $0x28] sm:$0xff] }
  0x11   : > { %v216_v10 = vld [vmem:[%s198_s23 + $0x30] sm:$0xff]  ;;  %v217_v11 = vld [vmem:[%s198_s23 + $0x38] sm:$0xff] }
  0x12   : > { %235 = vperm.xlu0 %403, %v232_v2  }
  0x89   : > { %v222_v5 = vpop.permute.xlu0 %221 }
  0x8a   : > { %v224_v12 = vmul.f32 %v222_v5, %v210_v3  ;;  %v225_v13 = vmul.f32 %v222_v5, %v211_v4  ;;  %v226_v14 = vmul.f32 %v222_v5, %v212_v6  ;;  %v227_v15 = vmul.f32 %v222_v5, %v213_v7 }
  0x8b   : > { %v228_v17 = vmul.f32 %v222_v5, %v214_v8  ;;  %v229_v18 = vmul.f32 %v222_v5, %v215_v9  ;;  %v230_v19 = vmul.f32 %v222_v5, %v216_v10  ;;  %v231_v20 = vmul.f32 %v222_v5, %v217_v11 }
  0x8d   : > { %v236_v16 = vpop.permute.xlu0 %235 }
  0x8e   : > { %v238_v21 = vadd.f32 %v236_v16, %v224_v12  ;;  %v239_v22 = vadd.f32 %v236_v16, %v225_v13  ;;  %v240_v23 = vadd.f32 %v236_v16, %v226_v14  ;;  %v241_v24 = vadd.f32 %v236_v16, %v227_v15 }
  0x8f   : > { %v242_v25 = vadd.f32 %v236_v16, %v228_v17  ;;  %v243_v26 = vadd.f32 %v236_v16, %v229_v18  ;;  %v244_v27 = vadd.f32 %v236_v16, %v230_v19  ;;  %v245_v28 = vadd.f32 %v236_v16, %v231_v20 }
  0x90   : > { %vm246_vm0 = vcmp.ge.f32.partialorder %v238_v21, 0.0  ;;  %vm247_vm1 = vcmp.ge.f32.partialorder %v239_v22, 0.0  ;;  %vm248_vm2 = vcmp.ge.f32.partialorder %v240_v23, 0.0  ;;  %vm249_vm3 = vcmp.ge.f32.partialorder %v241_v24, 0.0 }
  0x91   : > { %vm250_vm4 = vcmp.ge.f32.partialorder %v242_v25, 0.0  ;;  %vm251_vm5 = vcmp.ge.f32.partialorder %v243_v26, 0.0  ;;  %vm252_vm6 = vcmp.ge.f32.partialorder %v244_v27, 0.0  ;;  %vm253_vm7 = vcmp.ge.f32.partialorder %v245_v28, 0.0 }
  0x92   : > { %v254_v29 = vmul.f32 0.2, %v238_v21  ;;  %v255_v30 = vmul.f32 0.2, %v239_v22  ;;  %v256_v31 = vmul.f32 0.2, %v240_v23 }
  0x93   : > { %v257_v32 = vmul.f32 0.2, %v241_v24  ;;  %v258_v33 = vmul.f32 0.2, %v242_v25  ;;  %v259_v34 = vmul.f32 0.2, %v243_v26 }
  0x94   : > { %v260_v35 = vmul.f32 0.2, %v244_v27  ;;  %v261_v36 = vmul.f32 0.2, %v245_v28  ;;  %v262_v37 = vsel %vm246_vm0, %v238_v21, %v254_v29  ;;  %v263_v38 = vsel %vm247_vm1, %v239_v22, %v255_v30 }
  0x95   : > { %v264_v39 = vsel %vm248_vm2, %v240_v23, %v256_v31  ;;  %v265_v40 = vsel %vm249_vm3, %v241_v24, %v257_v32  ;;  %v266_v41 = vsel %vm250_vm4, %v242_v25, %v258_v33  ;;  %v267_v42 = vsel %vm251_vm5, %v243_v26, %v259_v34  ;;  %270 = vst [vmem:[%s208_s26] sm:$0xff] %v262_v37 }
  0x96   : > { %271 = vst [vmem:[%s208_s26 + $0x8] sm:$0xff] %v263_v38  ;;  %v268_v43 = vsel %vm252_vm6, %v244_v27, %v260_v35  ;;  %v269_v44 = vsel %vm253_vm7, %v245_v28, %v261_v36  ;;  %272 = vst [vmem:[%s208_s26 + $0x10] sm:$0xff] %v264_v39 }
  0x97   : > { %273 = vst [vmem:[%s208_s26 + $0x18] sm:$0xff] %v265_v40  ;;  %274 = vst [vmem:[%s208_s26 + $0x20] sm:$0xff] %v266_v41 }
  0x98   : > { %275 = vst [vmem:[%s208_s26 + $0x28] sm:$0xff] %v267_v42  ;;  %276 = vst [vmem:[%s208_s26 + $0x30] sm:$0xff] %v268_v43 }
  0x99   : > { %277 = vst [vmem:[%s208_s26 + $0x38] sm:$0xff] %v269_v44 }
  0x9a PF: > { %s13_s14 = sadd.s32 1, %s426_s14   ;;  %s507_s12 = smov %s422_s13 }
  0x9b   : > { %p10_p5 = scmp.ge.s32.totalorder %s13_s14, 4   ;;  %s508_s13 = smov %s510_s15 }
  0x9d   :  { %12 = sbr.rel (!%p10_p5) target bundleno = 2 (0x2), region = 62 }

// kernel: same_block3d.2
= control target key start
LH: loop header
LB: loop body
LE: loop exit
PB: predicated region body
PF: predicated region fallthrough
CT: control target
= control target key end

     0   :  { %s2020_s15 = smov 0   ;;  %s2022_s16 = smov 0   ;;  %s3676_s0 = inlined_call_operand.vmem [shape: f32[2,1,10,8,150], index: 0, kind: input, shape index: {}]   ;;  %s3677_s1 = inlined_call_operand.vmem [shape: f32[8,216], index: 1, kind: input, shape index: {}]   ;;  %s3678_s2 = inlined_call_operand.vmem [shape: f32[1,1024], index: 2, kind: input, shape index: {}]   ;;  %s3679_s3 = inlined_call_operand.vmem [shape: f32[2,8,1024], index: 3, kind: output, shape index: {0}]   ;;  %s3680_s4 = inlined_call_operand.vmem [shape: f32[2,8,2], index: 4, kind: output, shape index: {1}]  }
   0x1   :  { %s2024_s17 = smov 0  }
   0x2 LB: > { %s27_s18 = sadd.s32 1, %s1973_s16  ;;  %p1878_p0 = scmp.ge.s32.totalorder %s1977_s17, 1  ;;  %s1977_s17 = sphi %s2024_s17, %s15_s17   ;;  %s1973_s16 = sphi %s2022_s16, %s3781_s16   ;;  %s1969_s15 = sphi %s2020_s15, %s3780_s15  }
   0x3   : > { %p29_p1 = scmp.ge.s32.totalorder %s27_s18, 2  ;;  %p185_p2 = scmp.lt.s32.totalorder %s1977_s17, 3 }
   0x5   : > { %s3783_s18 = smov (%p29_p1, %s27_s18), 0  ;;  %p186_p3 = pnand %p1878_p0, %p185_p2 }
   0x7   : > { %189 = sbr.rel (%p186_p3) target bundleno = 1518 (0x5ee), region = 32 }
   0xc   : > { %p223_p4 = scmp.lt.s32.totalorder %s1969_s15, 1  ;;  %s1979_s23 = smov 126   ;;  %vm281_vm0 = vcmask 1039360   ;;  %vm379_vm1 = vcmask 162816   ;;  %vm385_vm2 = vcmask 154624   ;;  %vm391_vm3 = vcmask 89088  }
   0xd   : > { %s1980_s24 = smov 127   ;;  %s1981_s25 = smov 118   ;;  %vm397_vm4 = vcmask 80896   ;;  %vm403_vm5 = vcmask 72704   ;;  %vm409_vm6 = vcmask 7168   ;;  %vm316_vm7 = vcmask 883712  }
   0xe   : > { %s3785_s15 = smov (!%p223_p4, %s1969_s15), 1  ;;  %s1982_s26 = smov 117   ;;  %vm309_vm8 = vcmask 949248   ;;  %vm302_vm9 = vcmask 957440   ;;  %vm295_vm10 = vcmask 965632   ;;  %vm288_vm11 = vcmask 1031168  }
   0xf   : > { %s1908_s19 = smul.u32 160, %s3785_s15  ;;  %s1983_s27 = smov 116   ;;  %vm330_vm12 = vcmask 867328   ;;  %vm323_vm13 = vcmask 875520   ;;  %vm1370_vm14 = vcmask 719872   ;;  %vm1747_vm15 = vcmask 15360  }
  0x10   : > { %s1984_s28 = smov 108   ;;  %s1985_s29 = smov 107  }
  0x11   : > { %s2044_s22 = scalar_lea.vmem %s3676_s0, %s1908_s19  ;;  %s1986_s30 = smov 106  }
  0x12   : > { %v2047_v0 = vld [vmem:[%s2044_s22] sm:$0xff]  ;;  %v247_v1 = vld [vmem:[%s2044_s22 + $0x8] sm:$0xff]  ;;  %v2075_v2 = vld [vmem:[%s2044_s22 + $0x18] sm:$0xff]  ;;  %s1987_s5 = smov 21   ;;  %s1988_s6 = smov 20  }
  0x13   : > { %284 = vrot.lane.b32.xlu1 %v2047_v0, %s1979_s23  ;;  %277 = vrot.lane.b32.xlu0 %v2047_v0, %s1980_s24  ;;  %v2078_v3 = vld [vmem:[%s2044_s22 + $0x10] sm:$0xff]  ;;  %v2105_v4 = vld [vmem:[%s2044_s22 + $0x20] sm:$0xff]  ;;  %s1989_s7 = smov 19   ;;  %s1990_s8 = smov 11  }
  0x14   : > { %v2112_v5 = vld [vmem:[%s2044_s22 + $0x28] sm:$0xff]  ;;  %s1991_s9 = smov 10   ;;  %s1992_s10 = smov 9   ;;  %v2242_v56 = vld [vmem:[%s2044_s22 + $0x30] sm:$0xff]  ;;  %v2249_v58 = vld [vmem:[%s2044_s22 + $0x38] sm:$0xff] }
  0x15   : > { %s1993_s11 = smov 1   ;;  %s1907_s20 = sshll.u32 %s3785_s15, 6 }
  0x17   : > { %286 = vrot.lane.b32.xlu1 %v247_v1, %s1979_s23  ;;  %279 = vrot.lane.b32.xlu0 %v247_v1, %s1980_s24 }
  0x1b   : > { %293 = vrot.lane.b32.xlu1 %v247_v1, %s1981_s25  ;;  %291 = vrot.lane.b32.xlu0 %v2047_v0, %s1981_s25 }
  0x1f   : > { %300 = vrot.lane.b32.xlu1 %v247_v1, %s1982_s26  ;;  %298 = vrot.lane.b32.xlu0 %v2047_v0, %s1982_s26 }
  0x23   : > { %307 = vrot.lane.b32.xlu1 %v247_v1, %s1983_s27  ;;  %305 = vrot.lane.b32.xlu0 %v2047_v0, %s1983_s27 }
  0x27   : > { %314 = vrot.lane.b32.xlu1 %v247_v1, %s1984_s28  ;;  %312 = vrot.lane.b32.xlu0 %v2047_v0, %s1984_s28 }
  0x2b   : > { %321 = vrot.lane.b32.xlu1 %v247_v1, %s1985_s29  ;;  %319 = vrot.lane.b32.xlu0 %v2047_v0, %s1985_s29 }
  0x2f   : > { %328 = vrot.lane.b32.xlu1 %v247_v1, %s1986_s30  ;;  %326 = vrot.lane.b32.xlu0 %v2047_v0, %s1986_s30 }
  0x33   : > { %337 = vrot.lane.b32.xlu1 %v2075_v2, %s1980_s24  ;;  %335 = vrot.lane.b32.xlu0 %v2078_v3, %s1980_s24 }
  0x37   : > { %343 = vrot.lane.b32.xlu1 %v2075_v2, %s1979_s23  ;;  %341 = vrot.lane.b32.xlu0 %v2078_v3, %s1979_s23 }
  0x3b   : > { %349 = vrot.lane.b32.xlu1 %v2075_v2, %s1981_s25  ;;  %347 = vrot.lane.b32.xlu0 %v2078_v3, %s1981_s25 }
  0x3f   : > { %355 = vrot.lane.b32.xlu1 %v2075_v2, %s1982_s26  ;;  %353 = vrot.lane.b32.xlu0 %v2078_v3, %s1982_s26 }
  0x43   : > { %361 = vrot.lane.b32.xlu1 %v2075_v2, %s1983_s27  ;;  %359 = vrot.lane.b32.xlu0 %v2078_v3, %s1983_s27 }
  0x47   : > { %367 = vrot.lane.b32.xlu1 %v2075_v2, %s1984_s28  ;;  %365 = vrot.lane.b32.xlu0 %v2078_v3, %s1984_s28 }
  0x4b   : > { %372 = vrot.lane.b32.xlu0 %v2105_v4, %s1987_s5  ;;  %375 = vrot.lane.b32.xlu1 %v2105_v4, %s1988_s6 }
  0x4f   : > { %377 = vrot.lane.b32.xlu0 %v2112_v5, %s1988_s6  ;;  %381 = vrot.lane.b32.xlu1 %v2105_v4, %s1989_s7 }
  0x53   : > { %383 = vrot.lane.b32.xlu0 %v2112_v5, %s1989_s7  ;;  %387 = vrot.lane.b32.xlu1 %v2105_v4, %s1990_s8 }
  0x57   : > { %389 = vrot.lane.b32.xlu0 %v2112_v5, %s1990_s8  ;;  %393 = vrot.lane.b32.xlu1 %v2105_v4, %s1991_s9 }
  0x5b   : > { %395 = vrot.lane.b32.xlu0 %v2112_v5, %s1991_s9  ;;  %399 = vrot.lane.b32.xlu1 %v2105_v4, %s1992_s10 }
  0x5f   : > { %401 = vrot.lane.b32.xlu0 %v2112_v5, %s1992_s10  ;;  %405 = vrot.lane.b32.xlu1 %v2105_v4, %s1993_s11 }
  0x63   : > { %407 = vrot.lane.b32.xlu0 %v2112_v5, %s1993_s11  ;;  %411 = vrot.lane.b32.xlu1 %v2105_v4, %s1980_s24 }
  0x67   : > { %413 = vrot.lane.b32.xlu0 %v2112_v5, %s1980_s24  ;;  %416 = vrot.lane.b32.xlu1 %v2078_v3, %s1985_s29 }
  0x6b   : > { %418 = vrot.lane.b32.xlu0 %v2075_v2, %s1985_s29  ;;  %452 = vrot.lane.b32.xlu1 %v2112_v5, %s1985_s29 }
  0x6f   : > { %450 = vrot.lane.b32.xlu0 %v2105_v4, %s1985_s29 }
  0x85   : > { %v2148_v6 = vpop.permute.xlu1 %284  ;;  %v2150_v7 = vpop.permute.xlu0 %277 }
  0x89   : > { %v2152_v8 = vpop.permute.xlu1 %286  ;;  %v2154_v9 = vpop.permute.xlu0 %279 }
  0x8d   : > { %v2156_v10 = vpop.permute.xlu1 %293  ;;  %v2158_v11 = vpop.permute.xlu0 %291 }
  0x91   : > { %v2160_v12 = vpop.permute.xlu1 %300  ;;  %v2162_v13 = vpop.permute.xlu0 %298 }
  0x95   : > { %v2164_v14 = vpop.permute.xlu1 %307  ;;  %v2166_v15 = vpop.permute.xlu0 %305 }
  0x99   : > { %v2168_v16 = vpop.permute.xlu1 %314  ;;  %v2170_v17 = vpop.permute.xlu0 %312 }
  0x9d   : > { %v2172_v18 = vpop.permute.xlu1 %321  ;;  %v2174_v19 = vpop.permute.xlu0 %319 }
  0xa1   : > { %v2176_v20 = vpop.permute.xlu1 %328  ;;  %v2178_v21 = vpop.permute.xlu0 %326 }
  0xa5   : > { %v338_v22 = vpop.permute.xlu1 %337  ;;  %v336_v23 = vpop.permute.xlu0 %335 }
  0xa6   : > { %422 = vrot.lane.b32.xlu0 %v338_v22, %s1985_s29  ;;  %v2215_v50 = vsel %vm281_vm0, %v336_v23, %v338_v22 }
  0xa9   : > { %v2181_v24 = vpop.permute.xlu1 %343  ;;  %v2183_v25 = vpop.permute.xlu0 %341 }
  0xad   : > { %v2185_v26 = vpop.permute.xlu1 %349  ;;  %v2187_v27 = vpop.permute.xlu0 %347 }
  0xb1   : > { %v2189_v28 = vpop.permute.xlu1 %355  ;;  %v2191_v29 = vpop.permute.xlu0 %353 }
  0xb5   : > { %v2193_v30 = vpop.permute.xlu1 %361  ;;  %v2195_v31 = vpop.permute.xlu0 %359 }
  0xb9   : > { %v2197_v32 = vpop.permute.xlu1 %367  ;;  %v2199_v33 = vpop.permute.xlu0 %365 }
  0xbd   : > { %v373_v34 = vpop.permute.xlu0 %372  ;;  %v376_v35 = vpop.permute.xlu1 %375 }
  0xbe   : > { %424 = vrot.lane.b32.xlu1 %v373_v34, %s1985_s29  ;;  %426 = vrot.lane.b32.xlu0 %v376_v35, %s1985_s29 }
  0xc1   : > { %v378_v36 = vpop.permute.xlu0 %377  ;;  %v382_v37 = vpop.permute.xlu1 %381 }
  0xc2   : > { %430 = vrot.lane.b32.xlu0 %v382_v37, %s1985_s29  ;;  %v380_v51 = vsel %vm379_vm1, %v376_v35, %v378_v36 }
  0xc5   : > { %v384_v38 = vpop.permute.xlu0 %383  ;;  %v388_v39 = vpop.permute.xlu1 %387 }
  0xc6   : > { %434 = vrot.lane.b32.xlu0 %v388_v39, %s1985_s29  ;;  %v386_v52 = vsel %vm385_vm2, %v382_v37, %v384_v38 }
  0xc9   : > { %v390_v40 = vpop.permute.xlu0 %389  ;;  %v394_v41 = vpop.permute.xlu1 %393 }
  0xca   : > { %438 = vrot.lane.b32.xlu0 %v394_v41, %s1985_s29  ;;  %v392_v53 = vsel %vm391_vm3, %v388_v39, %v390_v40 }
  0xcd   : > { %v396_v42 = vpop.permute.xlu0 %395  ;;  %v400_v43 = vpop.permute.xlu1 %399 }
  0xce   : > { %442 = vrot.lane.b32.xlu0 %v400_v43, %s1985_s29  ;;  %v398_v54 = vsel %vm397_vm4, %v394_v41, %v396_v42 }
  0xd1   : > { %v402_v44 = vpop.permute.xlu0 %401  ;;  %v406_v45 = vpop.permute.xlu1 %405 }
  0xd2   : > { %446 = vrot.lane.b32.xlu0 %v406_v45, %s1985_s29  ;;  %v404_v55 = vsel %vm403_vm5, %v400_v43, %v402_v44 }
  0xd5   : > { %v408_v46 = vpop.permute.xlu0 %407  ;;  %v412_v47 = vpop.permute.xlu1 %411 }
  0xd6   : > { %v410_v57 = vsel %vm409_vm6, %v406_v45, %v408_v46 }
  0xd9   : > { %v414_v48 = vpop.permute.xlu0 %413 }
  0xda   : > { %456 = vrot.lane.b32.xlu1 %v414_v48, %s1985_s29  ;;  %v2210_v49 = vsel %vm281_vm0, %v412_v47, %v414_v48 }
  0xdb   : > { %454 = vrot.lane.b32.xlu0 %v2210_v49, %s1985_s29 }
  0xdd   : > { %v2285_v59 = vpop.permute.xlu0 %418 }
  0xde   : > { %420 = vrot.lane.b32.xlu1 %v2215_v50, %s1985_s29 }
  0xdf   : > { %479 = vrot.lane.b32.xlu0 %v2078_v3, %s1986_s30 }
  0xe1   : > { %v2289_v60 = vpop.permute.xlu0 %450 }
  0xe2   : > { %428 = vrot.lane.b32.xlu1 %v380_v51, %s1985_s29 }
  0xe3   : > { %486 = vrot.lane.b32.xlu0 %v2105_v4, %s1979_s23 }
  0xe6   : > { %432 = vrot.lane.b32.xlu1 %v386_v52, %s1985_s29 }
  0xe7   : > { %492 = vrot.lane.b32.xlu0 %v2105_v4, %s1981_s25 }
  0xea   : > { %436 = vrot.lane.b32.xlu1 %v392_v53, %s1985_s29 }
  0xeb   : > { %498 = vrot.lane.b32.xlu0 %v2105_v4, %s1982_s26 }
  0xee   : > { %440 = vrot.lane.b32.xlu1 %v398_v54, %s1985_s29 }
  0xef   : > { %504 = vrot.lane.b32.xlu0 %v2105_v4, %s1983_s27 }
  0xf2   : > { %444 = vrot.lane.b32.xlu1 %v404_v55, %s1985_s29 }
  0xf3   : > { %510 = vrot.lane.b32.xlu0 %v2105_v4, %s1984_s28 }
  0xf6   : > { %448 = vrot.lane.b32.xlu1 %v410_v57, %s1985_s29 }
  0xf7   : > { %517 = vrot.lane.b32.xlu0 %v2242_v56, %s1987_s5 }
  0xfa   : > { %481 = vrot.lane.b32.xlu1 %v2075_v2, %s1986_s30  ;;  %v2303_v2 = vpop.permute.xlu1 %416 }
  0xfb   : > { %522 = vrot.lane.b32.xlu0 %v2249_v58, %s1988_s6 }
  0xfe   : > { %488 = vrot.lane.b32.xlu1 %v2112_v5, %s1979_s23  ;;  %v2309_v34 = vpop.permute.xlu1 %452 }
  0xff   : > { %527 = vrot.lane.b32.xlu0 %v2249_v58, %s1989_s7 }
 0x102   : > { %494 = vrot.lane.b32.xlu1 %v2112_v5, %s1981_s25 }
 0x103   : > { %532 = vrot.lane.b32.xlu0 %v2249_v58, %s1990_s8 }
 0x106   : > { %500 = vrot.lane.b32.xlu1 %v2112_v5, %s1982_s26 }
 0x107   : > { %537 = vrot.lane.b32.xlu0 %v2249_v58, %s1991_s9 }
 0x10a   : > { %506 = vrot.lane.b32.xlu1 %v2112_v5, %s1983_s27 }
 0x10b   : > { %542 = vrot.lane.b32.xlu0 %v2249_v58, %s1992_s10 }
 0x10e   : > { %512 = vrot.lane.b32.xlu1 %v2112_v5, %s1984_s28 }
 0x10f   : > { %547 = vrot.lane.b32.xlu0 %v2249_v58, %s1993_s11 }
 0x112   : > { %520 = vrot.lane.b32.xlu1 %v2242_v56, %s1988_s6 }
 0x113   : > { %552 = vrot.lane.b32.xlu0 %v2249_v58, %s1980_s24 }
 0x116   : > { %525 = vrot.lane.b32.xlu1 %v2242_v56, %s1989_s7 }
 0x118   : > { %v2295_v61 = vpop.permute.xlu0 %422 }
 0x119   : > { %3700 = vst [vmem:[#allocation2_spill] sm:$0xff] %v2295_v61 }
 0x11a   : > { %530 = vrot.lane.b32.xlu1 %v2242_v56, %s1990_s8 }
 0x11e   : > { %535 = vrot.lane.b32.xlu1 %v2242_v56, %s1991_s9 }
 0x122   : > { %540 = vrot.lane.b32.xlu1 %v2242_v56, %s1992_s10 }
 0x126   : > { %545 = vrot.lane.b32.xlu1 %v2242_v56, %s1993_s11 }
 0x12a   : > { %550 = vrot.lane.b32.xlu1 %v2242_v56, %s1980_s24 }
 0x130   : > { %v2297_v62 = vpop.permute.xlu0 %426  ;;  %v2313_v36 = vpop.permute.xlu1 %424 }
 0x131   : > { %3701 = vst [vmem:[#allocation3_spill] sm:$0xff] %v2297_v62  ;;  %3705 = vst [vmem:[#allocation7_spill] sm:$0xff] %v2313_v36 }
 0x134   : > { %v2299_v63 = vpop.permute.xlu0 %430 }
 0x135   : > { %3702 = vst [vmem:[#allocation4_spill] sm:$0xff] %v2299_v63 }
 0x138   : > { %v2301_v1 = vpop.permute.xlu0 %434 }
 0x139   : > { %3703 = vst [vmem:[#allocation5_spill] sm:$0xff] %v2301_v1  ;;  %v369_v1 = vsel %vm316_vm7, %v2199_v33, %v2197_v32  ;;  %v357_v33 = vsel %vm302_vm9, %v2191_v29, %v2189_v28  ;;  %v345_v29 = vsel %vm288_vm11, %v2183_v25, %v2181_v24 }
 0x13c   : > { %v2305_v22 = vpop.permute.xlu0 %438 }
 0x13d   : > { %3704 = vst [vmem:[#allocation6_spill] sm:$0xff] %v2305_v22  ;;  %v363_v22 = vsel %vm309_vm8, %v2195_v31, %v2193_v30 }
 0x140   : > { %v2307_v23 = vpop.permute.xlu0 %442 }
 0x144   : > { %v2311_v35 = vpop.permute.xlu0 %446 }
 0x14c   : > { %v2315_v37 = vpop.permute.xlu1 %456 }
 0x14d   : > { %v2317_v38 = vpop.permute.xlu0 %454 }
 0x150   : > { %v2319_v39 = vpop.permute.xlu1 %420 }
 0x151   : > { %3706 = vst [vmem:[#allocation8_spill] sm:$0xff] %v2319_v39  ;;  %v2321_v40 = vpop.permute.xlu0 %479 }
 0x154   : > { %v2323_v41 = vpop.permute.xlu1 %428 }
 0x155   : > { %3707 = vst [vmem:[#allocation9_spill] sm:$0xff] %v2323_v41  ;;  %v487_v42 = vpop.permute.xlu0 %486 }
 0x158   : > { %v2325_v43 = vpop.permute.xlu1 %432 }
 0x159   : > { %3708 = vst [vmem:[#allocation10_spill] sm:$0xff] %v2325_v43  ;;  %v493_v44 = vpop.permute.xlu0 %492 }
 0x15c   : > { %v2327_v45 = vpop.permute.xlu1 %436 }
 0x15d   : > { %3709 = vst [vmem:[#allocation11_spill] sm:$0xff] %v2327_v45  ;;  %v499_v46 = vpop.permute.xlu0 %498 }
 0x160   : > { %v2329_v47 = vpop.permute.xlu1 %440 }
 0x161   : > { %v505_v48 = vpop.permute.xlu0 %504 }
 0x164   : > { %v2331_v51 = vpop.permute.xlu1 %444 }
 0x165   : > { %v511_v52 = vpop.permute.xlu0 %510 }
 0x168   : > { %v2333_v53 = vpop.permute.xlu1 %448 }
 0x169   : > { %v518_v54 = vpop.permute.xlu0 %517 }
 0x16a   : > { %555 = vrot.lane.b32.xlu1 %v518_v54, %s1985_s29 }
 0x16c   : > { %v482_v55 = vpop.permute.xlu1 %481 }
 0x16d   : > { %v523_v36 = vpop.permute.xlu0 %522  ;;  %v483_v24 = vsel %vm330_vm12, %v2321_v40, %v482_v55  ;;  %v324_v40 = vsel %vm323_vm13, %v2174_v19, %v2172_v18 }
 0x170   : > { %v489_v57 = vpop.permute.xlu1 %488 }
 0x171   : > { %v528_v41 = vpop.permute.xlu0 %527 }
 0x174   : > { %v495_v39 = vpop.permute.xlu1 %494 }
 0x175   : > { %v2361_v30 = vsel %vm295_vm10, %v493_v44, %v495_v39  ;;  %v331_v39 = vsel %vm330_vm12, %v2178_v21, %v2176_v20  ;;  %v2394_v44 = vsel %vm323_vm13, %v2303_v2, %v2285_v59  ;;  %v317_v21 = vsel %vm316_vm7, %v2170_v17, %v2168_v16 }
 0x176   : > { %v310_v59 = vsel %vm309_vm8, %v2166_v15, %v2164_v14  ;;  %v303_v16 = vsel %vm302_vm9, %v2162_v13, %v2160_v12  ;;  %v296_v14 = vsel %vm295_vm10, %v2158_v11, %v2156_v10  ;;  %v282_v10 = vsel %vm281_vm0, %v2150_v7, %v2154_v9 }
 0x178   : > { %v501_v61 = vpop.permute.xlu1 %500 }
 0x17c   : > { %v507_v62 = vpop.permute.xlu1 %506 }
 0x17d   : > { %v2344_v54 = vsel %vm309_vm8, %v505_v48, %v507_v62  ;;  %v2369_v62 = vsel %vm288_vm11, %v487_v42, %v489_v57 }
 0x180   : > { %v513_v63 = vpop.permute.xlu1 %512 }
 0x181   : > { %v2337_v43 = vsel %vm316_vm7, %v511_v52, %v513_v63  ;;  %v533_v63 = vpop.permute.xlu0 %532  ;;  %v2352_v52 = vsel %vm302_vm9, %v499_v46, %v501_v61  ;;  %v351_v61 = vsel %vm295_vm10, %v2187_v27, %v2185_v26 }
 0x182   : > { %1374 = vmatprep.subr.mxu0 %v2337_v43 }
 0x183   : > { %1375 = vmatpush1.msra.mxu0 %v369_v1 }
 0x184   : > { %v521_v45 = vpop.permute.xlu1 %520  ;;  %1376 = vmatprep.subr.mxu0 %v2344_v54 }
 0x185   : > { %557 = vrot.lane.b32.xlu0 %v521_v45, %s1985_s29  ;;  %1377 = vmatpush1.msra.mxu0 %v363_v22  ;;  %v524_v32 = vsel %vm379_vm1, %v521_v45, %v523_v36  ;;  %v538_v36 = vpop.permute.xlu0 %537 }
 0x186   : > { %1378 = vmatprep.subr.mxu0 %v2352_v52  ;;  %559 = vrot.lane.b32.xlu1 %v524_v32, %s1985_s29 }
 0x187   : > { %1379 = vmatpush1.msra.mxu0 %v357_v33 }
 0x188   : > { %v526_v31 = vpop.permute.xlu1 %525  ;;  %1380 = vmatprep.subr.mxu0 %v2361_v30 }
 0x189   : > { %561 = vrot.lane.b32.xlu0 %v526_v31, %s1985_s29  ;;  %1381 = vmatpush1.msra.mxu0 %v351_v61  ;;  %v529_v28 = vsel %vm385_vm2, %v526_v31, %v528_v41  ;;  %v543_v41 = vpop.permute.xlu0 %542 }
 0x18a   : > { %1382 = vmatprep.subr.mxu0 %v2369_v62  ;;  %563 = vrot.lane.b32.xlu1 %v529_v28, %s1985_s29 }
 0x18b   : > { %1383 = vmatpush1.msra.mxu0 %v345_v29 }
 0x18c   : > { %v531_v26 = vpop.permute.xlu1 %530  ;;  %1384 = vmatprep.subr.mxu0 %v2210_v49 }
 0x18d   : > { %565 = vrot.lane.b32.xlu0 %v531_v26, %s1985_s29  ;;  %1385 = vmatpush1.msra.mxu0 %v2215_v50  ;;  %v534_v27 = vsel %vm391_vm3, %v531_v26, %v533_v63  ;;  %v548_v18 = vpop.permute.xlu0 %547  ;;  %v2516_v26 = vsel %vm323_vm13, %v2289_v60, %v2309_v34  ;;  %v464_v60 = vsel %vm323_vm13, %v2307_v23, %v2331_v51 }
 0x18e   : > { %1386 = vmatprep.subr.mxu0 %v2105_v4  ;;  %567 = vrot.lane.b32.xlu1 %v534_v27, %s1985_s29 }
 0x18f   : > { %1387 = vmatpush1.msra.mxu0 %v2078_v3 }
 0x190   : > { %v536_v25 = vpop.permute.xlu1 %535  ;;  %1388 = vmatprep.subr.mxu0 %v483_v24 }
 0x191   : > { %v539_v42 = vsel %vm397_vm4, %v536_v25, %v538_v36  ;;  %569 = vrot.lane.b32.xlu0 %v536_v25, %s1985_s29  ;;  %1389 = vmatpush1.msra.mxu0 %v331_v39  ;;  %v553_v15 = vpop.permute.xlu0 %552  ;;  %v3711_v39 = vld [vmem:[#allocation6_spill] sm:$0xff] }
 0x192   : > { %1390 = vmatprep.subr.mxu0 %v2394_v44  ;;  %571 = vrot.lane.b32.xlu1 %v539_v42, %s1985_s29 }
 0x193   : > { %1391 = vmatpush1.msra.mxu0 %v324_v40  ;;  %v3712_v40 = vld [vmem:[#allocation11_spill] sm:$0xff] }
 0x194   : > { %v541_v20 = vpop.permute.xlu1 %540  ;;  %1392 = vmatprep.subr.mxu0 %v369_v1  ;;  %v289_v1 = vsel %vm288_vm11, %v2148_v6, %v2152_v8 }
 0x195   : > { %v544_v45 = vsel %vm403_vm5, %v541_v20, %v543_v41  ;;  %573 = vrot.lane.b32.xlu0 %v541_v20, %s1985_s29  ;;  %1393 = vmatpush1.msra.mxu0 %v317_v21  ;;  %v3713_v20 = vld [vmem:[#allocation5_spill] sm:$0xff]  ;;  %v3714_v21 = vld [vmem:[#allocation10_spill] sm:$0xff] }
 0x196   : > { %1394 = vmatprep.subr.mxu0 %v363_v22  ;;  %575 = vrot.lane.b32.xlu1 %v544_v45, %s1985_s29  ;;  %v462_v23 = vsel %vm323_vm13, %v3713_v20, %v3712_v40  ;;  %v3715_v45 = vld [vmem:[#allocation4_spill] sm:$0xff]  ;;  %v2679_v40 = vld [vmem:[%s2044_s22 + $0x98] sm:$0xff]  ;;  %v2686_v20 = vld [vmem:[%s2044_s22 + $0x80] sm:$0xff] }
 0x197   : > { %1395 = vmatpush1.msra.mxu0 %v310_v59 }
 0x198   : > { %v546_v19 = vpop.permute.xlu1 %545  ;;  %1396 = vmatprep.subr.mxu0 %v357_v33 }
 0x199   : > { %v549_v17 = vsel %vm409_vm6, %v546_v19, %v548_v18  ;;  %577 = vrot.lane.b32.xlu0 %v546_v19, %s1985_s29  ;;  %1397 = vmatpush1.msra.mxu0 %v303_v16  ;;  %v3716_v16 = vld [vmem:[#allocation9_spill] sm:$0xff] }
 0x19a   : > { %1398 = vmatprep.subr.mxu0 %v351_v61  ;;  %579 = vrot.lane.b32.xlu1 %v549_v17, %s1985_s29  ;;  %v467_v61 = vsel %vm323_vm13, %v2317_v38, %v2315_v37  ;;  %v465_v37 = vsel %vm323_vm13, %v2311_v35, %v2333_v53  ;;  %v463_v35 = vsel %vm323_vm13, %v3711_v39, %v2329_v47  ;;  %v3717_v17 = vld [vmem:[#allocation3_spill] sm:$0xff]  ;;  %v2655_v39 = vld [vmem:[%s2044_s22 + $0x78] sm:$0xff] }
 0x19b   : > { %1399 = vmatpush1.msra.mxu0 %v296_v14  ;;  %v461_v47 = vsel %vm323_vm13, %v3715_v45, %v3714_v21  ;;  %v460_v14 = vsel %vm323_vm13, %v3717_v17, %v3716_v16 }
 0x19c   : > { %1400 = vmatprep.subr.mxu0 %v345_v29  ;;  %v551_v12 = vpop.permute.xlu1 %550 }
 0x19d   : > { %581 = vrot.lane.b32.xlu0 %v2242_v56, %s1985_s29  ;;  %1401 = vmatpush1.msra.mxu0 %v289_v1  ;;  %v2431_v11 = vsel %vm281_vm0, %v551_v12, %v553_v15 }
 0x19e   : > { %1402 = vmatprep.subr.mxu0 %v2215_v50  ;;  %583 = vrot.lane.b32.xlu1 %v2249_v58, %s1985_s29 }
 0x19f   : > { %1403 = vmatpush1.msra.mxu0 %v282_v10  ;;  %v3719_v10 = vld [vmem:[#allocation2_spill] sm:$0xff] }
 0x1a0   : > { %1404 = vmatprep.subr.mxu0 %v2078_v3  ;;  %v2470_v3 = vld [vmem:[%s2044_s22 + $0x48] sm:$0xff] }
 0x1a1   : > { %585 = vrot.lane.b32.xlu0 %v2431_v11, %s1985_s29  ;;  %1405 = vmatpush1.msra.mxu0 %v2047_v0  ;;  %v2463_v0 = vld [vmem:[%s2044_s22 + $0x40] sm:$0xff] }
 0x1a2   : > { %587 = vrot.lane.b32.xlu1 %v553_v15, %s1985_s29  ;;  %v3718_v15 = vld [vmem:[#allocation7_spill] sm:$0xff] }
 0x1a5   : > { %606 = vrot.lane.b32.xlu0 %v2105_v4, %s1986_s30 }
 0x1a6   : > { %608 = vrot.lane.b32.xlu1 %v2112_v5, %s1986_s30 }
 0x1a9   : > { %613 = vrot.lane.b32.xlu0 %v2242_v56, %s1979_s23 }
 0x1aa   : > { %615 = vrot.lane.b32.xlu1 %v2249_v58, %s1979_s23 }
 0x1ad   : > { %619 = vrot.lane.b32.xlu0 %v2242_v56, %s1981_s25 }
 0x1ae   : > { %621 = vrot.lane.b32.xlu1 %v2249_v58, %s1981_s25 }
 0x1b1   : > { %625 = vrot.lane.b32.xlu0 %v2242_v56, %s1982_s26 }
 0x1b2   : > { %627 = vrot.lane.b32.xlu1 %v2249_v58, %s1982_s26 }
 0x1b5   : > { %631 = vrot.lane.b32.xlu0 %v2242_v56, %s1983_s27 }
 0x1b6   : > { %633 = vrot.lane.b32.xlu1 %v2249_v58, %s1983_s27 }
 0x1b9   : > { %637 = vrot.lane.b32.xlu0 %v2242_v56, %s1984_s28 }
 0x1ba   : > { %639 = vrot.lane.b32.xlu1 %v2249_v58, %s1984_s28 }
 0x1bd   : > { %644 = vrot.lane.b32.xlu0 %v2463_v0, %s1987_s5 }
 0x1be   : > { %647 = vrot.lane.b32.xlu1 %v2463_v0, %s1988_s6 }
 0x1c1   : > { %649 = vrot.lane.b32.xlu0 %v2470_v3, %s1988_s6 }
 0x1c2   : > { %652 = vrot.lane.b32.xlu1 %v2463_v0, %s1989_s7 }
 0x1c5   : > { %654 = vrot.lane.b32.xlu0 %v2470_v3, %s1989_s7 }
 0x1c6   : > { %657 = vrot.lane.b32.xlu1 %v2463_v0, %s1990_s8 }
 0x1c9   : > { %659 = vrot.lane.b32.xlu0 %v2470_v3, %s1990_s8 }
 0x1ca   : > { %662 = vrot.lane.b32.xlu1 %v2463_v0, %s1991_s9 }
 0x1cd   : > { %664 = vrot.lane.b32.xlu0 %v2470_v3, %s1991_s9 }
 0x1ce   : > { %667 = vrot.lane.b32.xlu1 %v2463_v0, %s1992_s10 }
 0x1d1   : > { %669 = vrot.lane.b32.xlu0 %v2470_v3, %s1992_s10 }
 0x1d2   : > { %672 = vrot.lane.b32.xlu1 %v2463_v0, %s1993_s11 }
 0x1d5   : > { %674 = vrot.lane.b32.xlu0 %v2470_v3, %s1993_s11 }
 0x1d6   : > { %677 = vrot.lane.b32.xlu1 %v2463_v0, %s1980_s24 }
 0x1d9   : > { %679 = vrot.lane.b32.xlu0 %v2470_v3, %s1980_s24 }
 0x1dc   : > { %v556_v4 = vpop.permute.xlu1 %555 }
 0x1f7   : > { %v558_v5 = vpop.permute.xlu0 %557 }
 0x1f8   : > { %v560_v6 = vpop.permute.xlu1 %559 }
 0x1f9   : > { %v589_v18 = vsel %vm323_vm13, %v558_v5, %v560_v6 }
 0x1fb   : > { %v562_v7 = vpop.permute.xlu0 %561 }
 0x1fc   : > { %v564_v8 = vpop.permute.xlu1 %563 }
 0x1fd   : > { %v590_v51 = vsel %vm323_vm13, %v562_v7, %v564_v8  ;;  %v3720_v7 = vld [vmem:[#allocation8_spill] sm:$0xff] }
 0x1fe   : > { %v459_v5 = vsel %vm323_vm13, %v3720_v7, %v3719_v10 }
 0x1ff   : > { %v566_v9 = vpop.permute.xlu0 %565 }
 0x200   : > { %v568_v13 = vpop.permute.xlu1 %567 }
 0x201   : > { %v591_v41 = vsel %vm323_vm13, %v566_v9, %v568_v13 }
 0x203   : > { %v570_v50 = vpop.permute.xlu0 %569 }
 0x204   : > { %v572_v2 = vpop.permute.xlu1 %571 }
 0x205   : > { %v592_v34 = vsel %vm323_vm13, %v570_v50, %v572_v2 }
 0x207   : > { %v574_v22 = vpop.permute.xlu0 %573 }
 0x208   : > { %v576_v46 = vpop.permute.xlu1 %575 }
 0x209   : > { %v593_v24 = vsel %vm323_vm13, %v574_v22, %v576_v46 }
 0x20b   : > { %v578_v48 = vpop.permute.xlu0 %577 }
 0x20c   : > { %v580_v55 = vpop.permute.xlu1 %579 }
 0x20d   : > { %v594_v27 = vsel %vm323_vm13, %v578_v48, %v580_v55 }
 0x20f   : > { %v582_v57 = vpop.permute.xlu0 %581 }
 0x210   : > { %v584_v63 = vpop.permute.xlu1 %583 }
 0x211   : > { %v2508_v29 = vsel %vm323_vm13, %v582_v57, %v584_v63 }
 0x213   : > { %v586_v32 = vpop.permute.xlu0 %585 }
 0x214   : > { %v588_v33 = vpop.permute.xlu1 %587 }
 0x215   : > { %v2499_v31 = vsel %vm323_vm13, %v586_v32, %v588_v33 }
 0x216   : > { %3710 = vst [vmem:[#allocation12_spill] sm:$0xff] %v2499_v31  ;;  %1416 = vmatprep.subr.mxu0 %v2499_v31 }
 0x217   : > { %1417 = vmatpush2.msra.mxu0 %v467_v61  ;;  %v2505_v28 = vpop.permute.xlu0 %606 }
 0x218   : > { %v2510_v36 = vpop.permute.xlu1 %608  ;;  %1418 = vmatprep.subr.mxu0 %v2508_v29 }
 0x219   : > { %1419 = vmatpush2.msra.mxu0 %v2516_v26 }
 0x21a   : > { %1420 = vmatprep.subr.mxu0 %v594_v27 }
 0x21b   : > { %1421 = vmatpush2.msra.mxu0 %v465_v37  ;;  %v2523_v38 = vpop.permute.xlu0 %613 }
 0x21c   : > { %v2526_v25 = vpop.permute.xlu1 %615  ;;  %1422 = vmatprep.subr.mxu0 %v593_v24  ;;  %v2590_v24 = vld [vmem:[%s2044_s22 + $0x58] sm:$0xff] }
 0x21d   : > { %1423 = vmatpush2.msra.mxu0 %v464_v60  ;;  %v2593_v60 = vld [vmem:[%s2044_s22 + $0x50] sm:$0xff] }
 0x21e   : > { %1424 = vmatprep.subr.mxu0 %v592_v34  ;;  %v2648_v34 = vld [vmem:[%s2044_s22 + $0x70] sm:$0xff] }
 0x21f   : > { %1425 = vmatpush2.msra.mxu0 %v463_v35  ;;  %v2535_v53 = vpop.permute.xlu0 %619  ;;  %v2658_v35 = vld [vmem:[%s2044_s22 + $0x60] sm:$0xff] }
 0x220   : > { %v2538_v42 = vpop.permute.xlu1 %621  ;;  %1426 = vmatprep.subr.mxu0 %v591_v41  ;;  %v2665_v41 = vld [vmem:[%s2044_s22 + $0x68] sm:$0xff] }
 0x221   : > { %1427 = vmatpush2.msra.mxu0 %v462_v23  ;;  %v2693_v23 = vld [vmem:[%s2044_s22 + $0x88] sm:$0xff] }
 0x222   : > { %1428 = vmatprep.subr.mxu0 %v590_v51 }
 0x223   : > { %1429 = vmatpush2.msra.mxu0 %v461_v47  ;;  %v2547_v59 = vpop.permute.xlu0 %625 }
 0x224   : > { %v2550_v19 = vpop.permute.xlu1 %627  ;;  %1430 = vmatprep.subr.mxu0 %v589_v18 }
 0x225   : > { %1431 = vmatpush2.msra.mxu0 %v460_v14 }
 0x226   : > { %1432 = vmatprep.subr.mxu0 %v556_v4 }
 0x227   : > { %1433 = vmatpush2.msra.mxu0 %v3718_v15  ;;  %v2556_v1 = vpop.permute.xlu0 %631 }
 0x228   : > { %v2558_v12 = vpop.permute.xlu1 %633  ;;  %1434 = vmatprep.subr.mxu0 %v467_v61 }
 0x229   : > { %1435 = vmatpush2.msra.mxu0 %v459_v5 }
 0x22a   : > { %1436 = vmatprep.subr.mxu0 %v2516_v26 }
 0x22b   : > { %1437 = vmatpush2.msra.mxu0 %v2394_v44  ;;  %v2565_v6 = vpop.permute.xlu0 %637 }
 0x22c   : > { %v2567_v8 = vpop.permute.xlu1 %639 }
 0x22f   : > { %v645_v4 = vpop.permute.xlu0 %644 }
 0x230   : > { %v648_v9 = vpop.permute.xlu1 %647  ;;  %682 = vrot.lane.b32.xlu1 %v645_v4, %s1985_s29 }
 0x231   : > { %684 = vrot.lane.b32.xlu0 %v648_v9, %s1985_s29 }
 0x233   : > { %v650_v13 = vpop.permute.xlu0 %649 }
 0x234   : > { %v651_v50 = vsel %vm379_vm1, %v648_v9, %v650_v13  ;;  %v653_v2 = vpop.permute.xlu1 %652 }
 0x235   : > { %688 = vrot.lane.b32.xlu0 %v653_v2, %s1985_s29  ;;  %686 = vrot.lane.b32.xlu1 %v651_v50, %s1985_s29 }
 0x237   : > { %v655_v22 = vpop.permute.xlu0 %654 }
 0x238   : > { %v656_v44 = vsel %vm385_vm2, %v653_v2, %v655_v22  ;;  %v658_v46 = vpop.permute.xlu1 %657 }
 0x239   : > { %692 = vrot.lane.b32.xlu0 %v658_v46, %s1985_s29  ;;  %690 = vrot.lane.b32.xlu1 %v656_v44, %s1985_s29 }
 0x23b   : > { %v660_v48 = vpop.permute.xlu0 %659 }
 0x23c   : > { %v661_v55 = vsel %vm391_vm3, %v658_v46, %v660_v48  ;;  %v663_v57 = vpop.permute.xlu1 %662 }
 0x23d   : > { %696 = vrot.lane.b32.xlu0 %v663_v57, %s1985_s29  ;;  %694 = vrot.lane.b32.xlu1 %v661_v55, %s1985_s29 }
 0x23f   : > { %v665_v63 = vpop.permute.xlu0 %664 }
 0x240   : > { %v666_v32 = vsel %vm397_vm4, %v663_v57, %v665_v63  ;;  %v668_v33 = vpop.permute.xlu1 %667 }
 0x241   : > { %700 = vrot.lane.b32.xlu0 %v668_v33, %s1985_s29  ;;  %698 = vrot.lane.b32.xlu1 %v666_v32, %s1985_s29 }
 0x243   : > { %v670_v61 = vpop.permute.xlu0 %669 }
 0x244   : > { %v671_v27 = vsel %vm403_vm5, %v668_v33, %v670_v61  ;;  %v2584_v37 = vpop.permute.xlu1 %672 }
 0x245   : > { %704 = vrot.lane.b32.xlu0 %v2584_v37, %s1985_s29  ;;  %702 = vrot.lane.b32.xlu1 %v671_v27, %s1985_s29 }
 0x247   : > { %v2699_v51 = vpop.permute.xlu0 %674 }
 0x248   : > { %v678_v21 = vpop.permute.xlu1 %677 }
 0x249   : > { %806 = vrot.lane.b32.xlu0 %v2590_v24, %s1980_s24  ;;  %804 = vrot.lane.b32.xlu1 %v2593_v60, %s1980_s24 }
 0x24b   : > { %v680_v45 = vpop.permute.xlu0 %679 }
 0x24c   : > { %v2765_v32 = vsel %vm281_vm0, %v678_v21, %v680_v45 }
 0x24d   : > { %799 = vrot.lane.b32.xlu1 %v2593_v60, %s1993_s11  ;;  %801 = vrot.lane.b32.xlu0 %v2590_v24, %s1993_s11  ;;  %3728 = vst [vmem:[#allocation7_spill] sm:$0xff] %v2765_v32 }
 0x251   : > { %794 = vrot.lane.b32.xlu1 %v2593_v60, %s1992_s10  ;;  %796 = vrot.lane.b32.xlu0 %v2590_v24, %s1992_s10 }
 0x255   : > { %789 = vrot.lane.b32.xlu1 %v2593_v60, %s1991_s9  ;;  %791 = vrot.lane.b32.xlu0 %v2590_v24, %s1991_s9 }
 0x259   : > { %784 = vrot.lane.b32.xlu1 %v2593_v60, %s1990_s8  ;;  %786 = vrot.lane.b32.xlu0 %v2590_v24, %s1990_s8 }
 0x25d   : > { %779 = vrot.lane.b32.xlu1 %v2593_v60, %s1989_s7  ;;  %781 = vrot.lane.b32.xlu0 %v2590_v24, %s1989_s7 }
 0x261   : > { %774 = vrot.lane.b32.xlu1 %v2593_v60, %s1988_s6  ;;  %776 = vrot.lane.b32.xlu0 %v2590_v24, %s1988_s6 }
 0x265   : > { %771 = vrot.lane.b32.xlu1 %v2593_v60, %s1987_s5  ;;  %764 = vrot.lane.b32.xlu0 %v2463_v0, %s1984_s28 }
 0x269   : > { %766 = vrot.lane.b32.xlu1 %v2470_v3, %s1984_s28  ;;  %758 = vrot.lane.b32.xlu0 %v2463_v0, %s1983_s27 }
 0x26d   : > { %760 = vrot.lane.b32.xlu1 %v2470_v3, %s1983_s27  ;;  %752 = vrot.lane.b32.xlu0 %v2463_v0, %s1982_s26 }
 0x271   : > { %754 = vrot.lane.b32.xlu1 %v2470_v3, %s1982_s26  ;;  %746 = vrot.lane.b32.xlu0 %v2463_v0, %s1981_s25 }
 0x275   : > { %748 = vrot.lane.b32.xlu1 %v2470_v3, %s1981_s25  ;;  %740 = vrot.lane.b32.xlu0 %v2463_v0, %s1979_s23 }
 0x279   : > { %742 = vrot.lane.b32.xlu1 %v2470_v3, %s1979_s23  ;;  %733 = vrot.lane.b32.xlu0 %v2242_v56, %s1986_s30 }
 0x27d   : > { %735 = vrot.lane.b32.xlu1 %v2249_v58, %s1986_s30  ;;  %1058 = vrot.lane.b32.xlu0 %v2648_v34, %s1980_s24  ;;  %v2672_v58 = vld [vmem:[%s2044_s22 + $0x90] sm:$0xff] }
 0x281   : > { %1060 = vrot.lane.b32.xlu1 %v2655_v39, %s1980_s24  ;;  %931 = vrot.lane.b32.xlu0 %v2658_v35, %s1980_s24 }
 0x285   : > { %933 = vrot.lane.b32.xlu1 %v2665_v41, %s1980_s24  ;;  %1053 = vrot.lane.b32.xlu0 %v2648_v34, %s1993_s11 }
 0x289   : > { %1055 = vrot.lane.b32.xlu1 %v2655_v39, %s1993_s11  ;;  %1312 = vrot.lane.b32.xlu0 %v2672_v58, %s1980_s24 }
 0x28d   : > { %1314 = vrot.lane.b32.xlu1 %v2679_v40, %s1980_s24  ;;  %926 = vrot.lane.b32.xlu0 %v2658_v35, %s1993_s11 }
 0x291   : > { %928 = vrot.lane.b32.xlu1 %v2665_v41, %s1993_s11  ;;  %1185 = vrot.lane.b32.xlu0 %v2686_v20, %s1980_s24 }
 0x295   : > { %1187 = vrot.lane.b32.xlu1 %v2693_v23, %s1980_s24  ;;  %1048 = vrot.lane.b32.xlu0 %v2648_v34, %s1992_s10  ;;  %s3559_s24 = scalar_lea.vmem %s3679_s3, %s1907_s20 }
 0x299   : > { %1050 = vrot.lane.b32.xlu1 %v2655_v39, %s1992_s10  ;;  %921 = vrot.lane.b32.xlu0 %v2658_v35, %s1992_s10 }
 0x29d   : > { %923 = vrot.lane.b32.xlu1 %v2665_v41, %s1992_s10  ;;  %1043 = vrot.lane.b32.xlu0 %v2648_v34, %s1991_s9 }
 0x2a1   : > { %1045 = vrot.lane.b32.xlu1 %v2655_v39, %s1991_s9  ;;  %1307 = vrot.lane.b32.xlu0 %v2672_v58, %s1993_s11 }
 0x2a2   : > { %v2713_v47 = vpop.permute.xlu1 %682 }
 0x2a3   : > { %3721 = vst [vmem:[#allocation6_spill] sm:$0xff] %v2713_v47  ;;  %v2715_v18 = vpop.permute.xlu0 %684 }
 0x2a4   : > { %3722 = vst [vmem:[#allocation11_spill] sm:$0xff] %v2715_v18 }
 0x2a5   : > { %1309 = vrot.lane.b32.xlu1 %v2679_v40, %s1993_s11 }
 0x2a7   : > { %v2719_v16 = vpop.permute.xlu1 %686  ;;  %v2721_v17 = vpop.permute.xlu0 %688 }
 0x2a8   : > { %3723 = vst [vmem:[#allocation5_spill] sm:$0xff] %v2719_v16  ;;  %3724 = vst [vmem:[#allocation10_spill] sm:$0xff] %v2721_v17  ;;  %v641_v16 = vsel %vm316_vm7, %v2565_v6, %v2567_v8 }
 0x2ab   : > { %v2723_v14 = vpop.permute.xlu1 %690  ;;  %v2725_v15 = vpop.permute.xlu0 %692 }
 0x2ac   : > { %3725 = vst [vmem:[#allocation4_spill] sm:$0xff] %v2723_v14  ;;  %3726 = vst [vmem:[#allocation9_spill] sm:$0xff] %v2725_v15 }
 0x2af   : > { %v2727_v10 = vpop.permute.xlu1 %694  ;;  %v2729_v7 = vpop.permute.xlu0 %696 }
 0x2b3   : > { %v2731_v5 = vpop.permute.xlu1 %698  ;;  %v2733_v4 = vpop.permute.xlu0 %700 }
 0x2b7   : > { %v2735_v9 = vpop.permute.xlu1 %702  ;;  %v2737_v13 = vpop.permute.xlu0 %704 }
 0x2bb   : > { %v805_v50 = vpop.permute.xlu1 %804  ;;  %v807_v2 = vpop.permute.xlu0 %806 }
 0x2bc   : > { %841 = vrot.lane.b32.xlu1 %v807_v2, %s1985_s29  ;;  %v2741_v22 = vsel %vm281_vm0, %v805_v50, %v807_v2 }
 0x2bd   : > { %3727 = vst [vmem:[#allocation3_spill] sm:$0xff] %v2741_v22  ;;  %839 = vrot.lane.b32.xlu0 %v2741_v22, %s1985_s29 }
 0x2bf   : > { %v2745_v44 = vpop.permute.xlu1 %799  ;;  %v802_v46 = vpop.permute.xlu0 %801 }
 0x2c0   : > { %918 = vrot.lane.b32.xlu1 %v2665_v41, %s1991_s9 }
 0x2c1   : > { %916 = vrot.lane.b32.xlu0 %v2658_v35, %s1991_s9 }
 0x2c3   : > { %v2751_v48 = vpop.permute.xlu1 %794  ;;  %v2753_v55 = vpop.permute.xlu0 %796 }
 0x2c4   : > { %1182 = vrot.lane.b32.xlu1 %v2693_v23, %s1993_s11 }
 0x2c5   : > { %1180 = vrot.lane.b32.xlu0 %v2686_v20, %s1993_s11 }
 0x2c7   : > { %v2759_v57 = vpop.permute.xlu1 %789  ;;  %v2761_v63 = vpop.permute.xlu0 %791 }
 0x2c8   : > { %714 = vrot.lane.b32.xlu1 %v680_v45, %s1985_s29 }
 0x2c9   : > { %712 = vrot.lane.b32.xlu0 %v2765_v32, %s1985_s29 }
 0x2cb   : > { %v2769_v33 = vpop.permute.xlu1 %784  ;;  %v2771_v61 = vpop.permute.xlu0 %786 }
 0x2cc   : > { %1040 = vrot.lane.b32.xlu1 %v2655_v39, %s1990_s8 }
 0x2cd   : > { %1038 = vrot.lane.b32.xlu0 %v2648_v34, %s1990_s8 }
 0x2cf   : > { %v2777_v27 = vpop.permute.xlu1 %779  ;;  %v2779_v50 = vpop.permute.xlu0 %781 }
 0x2d0   : > { %1304 = vrot.lane.b32.xlu1 %v2679_v40, %s1992_s10 }
 0x2d1   : > { %1302 = vrot.lane.b32.xlu0 %v2672_v58, %s1992_s10 }
 0x2d3   : > { %v2785_v21 = vpop.permute.xlu1 %774  ;;  %v2787_v45 = vpop.permute.xlu0 %776 }
 0x2d4   : > { %837 = vrot.lane.b32.xlu1 %v2590_v24, %s1985_s29 }
 0x2d5   : > { %835 = vrot.lane.b32.xlu0 %v2593_v60, %s1985_s29 }
 0x2d7   : > { %v2793_v2 = vpop.permute.xlu1 %771  ;;  %v765_v22 = vpop.permute.xlu0 %764 }
 0x2d8   : > { %913 = vrot.lane.b32.xlu1 %v2665_v41, %s1990_s8 }
 0x2d9   : > { %911 = vrot.lane.b32.xlu0 %v2658_v35, %s1990_s8 }
 0x2db   : > { %v767_v31 = vpop.permute.xlu1 %766  ;;  %v759_v47 = vpop.permute.xlu0 %758 }
 0x2dc   : > { %1177 = vrot.lane.b32.xlu1 %v2693_v23, %s1992_s10  ;;  %v2802_v18 = vsel %vm316_vm7, %v765_v22, %v767_v31  ;;  %v635_v31 = vsel %vm309_vm8, %v2556_v1, %v2558_v12 }
 0x2dd   : > { %3729 = vst [vmem:[#allocation2_spill] sm:$0xff] %v2802_v18  ;;  %1175 = vrot.lane.b32.xlu0 %v2686_v20, %s1992_s10  ;;  %1445 = vmatprep.subr.mxu1 %v2802_v18 }
 0x2de   : > { %1446 = vmatpush1.msra.mxu1 %v641_v16 }
 0x2df   : > { %v761_v17 = vpop.permute.xlu1 %760  ;;  %v753_v14 = vpop.permute.xlu0 %752 }
 0x2e0   : > { %710 = vrot.lane.b32.xlu1 %v2470_v3, %s1985_s29  ;;  %v2813_v15 = vsel %vm309_vm8, %v759_v47, %v761_v17  ;;  %v629_v47 = vsel %vm302_vm9, %v2547_v59, %v2550_v19  ;;  %v623_v17 = vsel %vm295_vm10, %v2535_v53, %v2538_v42  ;;  %v803_v59 = vsel %vm409_vm6, %v2745_v44, %v802_v46 }
 0x2e1   : > { %3730 = vst [vmem:[#allocation8_spill] sm:$0xff] %v2813_v15  ;;  %708 = vrot.lane.b32.xlu0 %v2463_v0, %s1985_s29  ;;  %1447 = vmatprep.subr.mxu1 %v2813_v15  ;;  %v617_v53 = vsel %vm288_vm11, %v2523_v38, %v2526_v25  ;;  %v610_v38 = vsel %vm330_vm12, %v2505_v28, %v2510_v36 }
 0x2e2   : > { %1448 = vmatpush1.msra.mxu1 %v635_v31  ;;  %v676_v28 = vsel %vm409_vm6, %v2584_v37, %v2699_v51  ;;  %v793_v51 = vsel %vm397_vm4, %v2759_v57, %v2761_v63  ;;  %v788_v63 = vsel %vm391_vm3, %v2769_v33, %v2771_v61 }
 0x2e3   : > { %v755_v6 = vpop.permute.xlu1 %754  ;;  %v747_v8 = vpop.permute.xlu0 %746 }
 0x2e4   : > { %1035 = vrot.lane.b32.xlu1 %v2655_v39, %s1989_s7  ;;  %v2824_v22 = vsel %vm302_vm9, %v753_v14, %v755_v6 }
 0x2e5   : > { %3731 = vst [vmem:[#allocation13_spill] sm:$0xff] %v2824_v22  ;;  %1033 = vrot.lane.b32.xlu0 %v2648_v34, %s1989_s7  ;;  %1449 = vmatprep.subr.mxu1 %v2824_v22 }
 0x2e6   : > { %1450 = vmatpush1.msra.mxu1 %v629_v47 }
 0x2e7   : > { %v749_v1 = vpop.permute.xlu1 %748  ;;  %v741_v14 = vpop.permute.xlu0 %740 }
 0x2e8   : > { %1299 = vrot.lane.b32.xlu1 %v2679_v40, %s1991_s9  ;;  %v2835_v12 = vsel %vm295_vm10, %v747_v8, %v749_v1 }
 0x2e9   : > { %3732 = vst [vmem:[#allocation14_spill] sm:$0xff] %v2835_v12  ;;  %1297 = vrot.lane.b32.xlu0 %v2672_v58, %s1991_s9  ;;  %1451 = vmatprep.subr.mxu1 %v2835_v12 }
 0x2ea   : > { %1452 = vmatpush1.msra.mxu1 %v623_v17 }
 0x2eb   : > { %v743_v19 = vpop.permute.xlu1 %742  ;;  %v734_v42 = vpop.permute.xlu0 %733 }
 0x2ec   : > { %833 = vrot.lane.b32.xlu1 %v803_v59, %s1985_s29  ;;  %v2847_v6 = vsel %vm288_vm11, %v741_v14, %v743_v19  ;;  %v778_v59 = vsel %vm379_vm1, %v2785_v21, %v2787_v45 }
 0x2ed   : > { %3733 = vst [vmem:[#allocation15_spill] sm:$0xff] %v2847_v6  ;;  %831 = vrot.lane.b32.xlu0 %v2745_v44, %s1985_s29  ;;  %1453 = vmatprep.subr.mxu1 %v2847_v6 }
 0x2ee   : > { %1454 = vmatpush1.msra.mxu1 %v617_v53 }
 0x2ef   : > { %1455 = vmatprep.subr.mxu1 %v2765_v32  ;;  %v736_v46 = vpop.permute.xlu1 %735  ;;  %v2869_v44 = vpop.permute.xlu0 %1058 }
 0x2f0   : > { %908 = vrot.lane.b32.xlu1 %v2665_v41, %s1989_s7  ;;  %1456 = vmatpush1.msra.mxu1 %v2431_v11  ;;  %v737_v8 = vsel %vm330_vm12, %v734_v42, %v736_v46 }
 0x2f1   : > { %906 = vrot.lane.b32.xlu0 %v2658_v35, %s1989_s7  ;;  %1457 = vmatprep.subr.mxu1 %v2463_v0 }
 0x2f2   : > { %1458 = vmatpush1.msra.mxu1 %v2242_v56 }
 0x2f3   : > { %1459 = vmatprep.subr.mxu1 %v737_v8  ;;  %v2867_v25 = vpop.permute.xlu1 %1060  ;;  %v2886_v1 = vpop.permute.xlu0 %931 }
 0x2f4   : > { %1172 = vrot.lane.b32.xlu1 %v2693_v23, %s1991_s9  ;;  %1460 = vmatpush1.msra.mxu1 %v610_v38 }
 0x2f5   : > { %1170 = vrot.lane.b32.xlu0 %v2686_v20, %s1991_s9  ;;  %1461 = vmatprep.subr.mxu1 %v2508_v29 }
 0x2f6   : > { %1462 = vmatpush1.msra.mxu1 %v2516_v26 }
 0x2f7   : > { %1463 = vmatprep.subr.mxu1 %v641_v16  ;;  %v2883_v36 = vpop.permute.xlu1 %933  ;;  %v2897_v26 = vpop.permute.xlu0 %1053 }
 0x2f8   : > { %1028 = vrot.lane.b32.xlu1 %v2648_v34, %s1988_s6  ;;  %1464 = vmatpush1.msra.mxu1 %v2337_v43 }
 0x2f9   : > { %706 = vrot.lane.b32.xlu0 %v676_v28, %s1985_s29  ;;  %1465 = vmatprep.subr.mxu1 %v635_v31 }
 0x2fa   : > { %1466 = vmatpush1.msra.mxu1 %v2344_v54  ;;  %v798_v54 = vsel %vm403_vm5, %v2751_v48, %v2753_v55 }
 0x2fb   : > { %1467 = vmatprep.subr.mxu1 %v629_v47  ;;  %v2895_v43 = vpop.permute.xlu1 %1055 }
 0x2fc   : > { %1292 = vrot.lane.b32.xlu1 %v2672_v58, %s1990_s8  ;;  %1468 = vmatpush1.msra.mxu1 %v2352_v52 }
 0x2fd   : > { %1030 = vrot.lane.b32.xlu0 %v2655_v39, %s1988_s6  ;;  %1469 = vmatprep.subr.mxu1 %v623_v17 }
 0x2fe   : > { %1470 = vmatpush1.msra.mxu1 %v2361_v30  ;;  %v1949_v30 = vld [vmem:[%s2044_s22 + $0x20] sm:$0xff] }
 0x2ff   : > { %1471 = vmatprep.subr.mxu1 %v617_v53  ;;  %v2912_v52 = vpop.permute.xlu1 %1314  ;;  %v2994_v53 = vld [vmem:[%s3677_s1 + $0x8] sm:$0xff] }
 0x300   : > { %827 = vrot.lane.b32.xlu1 %v2751_v48, %s1985_s29  ;;  %1472 = vmatpush1.msra.mxu1 %v2369_v62  ;;  %v2916_v62 = vpop.permute.xlu0 %1312 }
 0x301   : > { %1294 = vrot.lane.b32.xlu0 %v2679_v40, %s1990_s8  ;;  %1473 = vmatprep.subr.mxu1 %v2431_v11 }
 0x302   : > { %1474 = vmatpush1.msra.mxu1 %v2210_v49  ;;  %1901 = vmatprep.mubr.msk.f32.mxu0 %vm1370_vm14, %v2994_v53 }
 0x303   : > { %1475 = vmatprep.subr.mxu1 %v2242_v56  ;;  %v2922_v49 = vpop.permute.xlu1 %928  ;;  %1902 = vmatprep.mubr.msk.f32.mxu1 %vm1370_vm14, %v2994_v53 }
 0x304   : > { %901 = vrot.lane.b32.xlu1 %v2658_v35, %s1988_s6  ;;  %1476 = vmatpush1.msra.mxu1 %v1949_v30  ;;  %v2924_v56 = vpop.permute.xlu0 %926 }
 0x305   : > { %829 = vrot.lane.b32.xlu0 %v798_v54, %s1985_s29 }
 0x307   : > { %v2932_v11 = vpop.permute.xlu1 %1187 }
 0x308   : > { %1165 = vrot.lane.b32.xlu1 %v2686_v20, %s1990_s8  ;;  %v2936_v37 = vpop.permute.xlu0 %1185 }
 0x309   : > { %903 = vrot.lane.b32.xlu0 %v2665_v41, %s1988_s6 }
 0x30b   : > { %v2944_v16 = vpop.permute.xlu1 %1050 }
 0x30c   : > { %1287 = vrot.lane.b32.xlu1 %v2672_v58, %s1989_s7  ;;  %v2946_v48 = vpop.permute.xlu0 %1048 }
 0x30d   : > { %1167 = vrot.lane.b32.xlu0 %v2693_v23, %s1990_s8 }
 0x30f   : > { %v2954_v55 = vpop.permute.xlu1 %923 }
 0x310   : > { %823 = vrot.lane.b32.xlu1 %v2759_v57, %s1985_s29  ;;  %v2958_v57 = vpop.permute.xlu0 %921 }
 0x311   : > { %1289 = vrot.lane.b32.xlu0 %v2679_v40, %s1989_s7 }
 0x313   : > { %v2966_v31 = vpop.permute.xlu1 %1045 }
 0x314   : > { %1160 = vrot.lane.b32.xlu1 %v2686_v20, %s1989_s7  ;;  %v2968_v47 = vpop.permute.xlu0 %1043 }
 0x315   : > { %825 = vrot.lane.b32.xlu0 %v793_v51, %s1985_s29 }
 0x317   : > { %v2976_v17 = vpop.permute.xlu1 %1309 }
 0x318   : > { %1025 = vrot.lane.b32.xlu1 %v2648_v34, %s1987_s5  ;;  %v2980_v61 = vpop.permute.xlu0 %1307 }
 0x319   : > { %1162 = vrot.lane.b32.xlu0 %v2693_v23, %s1989_s7 }
 0x31c   : > { %1284 = vrot.lane.b32.xlu1 %v2679_v40, %s1988_s6 }
 0x31d   : > { %1282 = vrot.lane.b32.xlu0 %v2672_v58, %s1988_s6 }
 0x320   : > { %821 = vrot.lane.b32.xlu1 %v788_v63, %s1985_s29 }
 0x321   : > { %819 = vrot.lane.b32.xlu0 %v2769_v33, %s1985_s29  ;;  %v783_v33 = vsel %vm385_vm2, %v2777_v27, %v2779_v50  ;;  %v3005_v50 = vld [vmem:[%s3677_s1] sm:$0xff] }
 0x322   : > { %1439 = vmatmul.mubr.f32.vlgmr.msra.gmra.mxu0 %v3005_v50 }
 0x323   : > { %1903 = vmatprep.mubr.msk.f32.mxu0 %vm1370_vm14, %v2994_v53 }
 0x324   : > { %1155 = vrot.lane.b32.xlu1 %v2686_v20, %s1988_s6 }
 0x325   : > { %898 = vrot.lane.b32.xlu0 %v2658_v35, %s1987_s5 }
 0x328   : > { %815 = vrot.lane.b32.xlu1 %v2777_v27, %s1985_s29 }
 0x329   : > { %1157 = vrot.lane.b32.xlu0 %v2693_v23, %s1988_s6 }
 0x32c   : > { %1279 = vrot.lane.b32.xlu1 %v2672_v58, %s1987_s5 }
 0x32d   : > { %817 = vrot.lane.b32.xlu0 %v783_v33, %s1985_s29 }
 0x32e   : > { %v842_v14 = vpop.permute.xlu1 %841 }
 0x32f   : > { %v840_v19 = vpop.permute.xlu0 %839 }
 0x330   : > { %813 = vrot.lane.b32.xlu1 %v778_v59, %s1985_s29  ;;  %v2998_v27 = vsel %vm323_vm13, %v840_v19, %v842_v14 }
 0x331   : > { %3734 = vst [vmem:[#allocation16_spill] sm:$0xff] %v2998_v27  ;;  %811 = vrot.lane.b32.xlu0 %v2785_v21, %s1985_s29  ;;  %1487 = vmatprep.subr.mxu1 %v2998_v27 }
 0x332   : > { %v3010_v45 = vpop.permute.xlu1 %918 }
 0x333   : > { %v3015_v42 = vpop.permute.xlu0 %916 }
 0x334   : > { %809 = vrot.lane.b32.xlu1 %v2793_v2, %s1985_s29 }
 0x335   : > { %1152 = vrot.lane.b32.xlu0 %v2686_v20, %s1987_s5 }
 0x336   : > { %v3023_v21 = vpop.permute.xlu1 %1182 }
 0x337   : > { %v3025_v46 = vpop.permute.xlu0 %1180 }
 0x338   : > { %1020 = vrot.lane.b32.xlu1 %v2665_v41, %s1984_s28 }
 0x339   : > { %1018 = vrot.lane.b32.xlu0 %v2658_v35, %s1984_s28 }
 0x33a   : > { %v715_v8 = vpop.permute.xlu1 %714 }
 0x33b   : > { %v713_v38 = vpop.permute.xlu0 %712 }
 0x33c   : > { %893 = vrot.lane.b32.xlu1 %v2590_v24, %s1984_s28  ;;  %v3034_v2 = vsel %vm323_vm13, %v713_v38, %v715_v8 }
 0x33d   : > { %891 = vrot.lane.b32.xlu0 %v2593_v60, %s1984_s28  ;;  %1488 = vmatpush2.msra.mxu1 %v3034_v2 }
 0x33e   : > { %v3039_v28 = vpop.permute.xlu1 %1040 }
 0x33f   : > { %v3041_v54 = vpop.permute.xlu0 %1038 }
 0x340   : > { %1014 = vrot.lane.b32.xlu1 %v2665_v41, %s1983_s27 }
 0x341   : > { %1012 = vrot.lane.b32.xlu0 %v2658_v35, %s1983_s27 }
 0x342   : > { %v3047_v30 = vpop.permute.xlu1 %1304 }
 0x343   : > { %v3049_v51 = vpop.permute.xlu0 %1302 }
 0x344   : > { %887 = vrot.lane.b32.xlu1 %v2590_v24, %s1983_s27 }
 0x345   : > { %885 = vrot.lane.b32.xlu0 %v2593_v60, %s1983_s27 }
 0x346   : > { %v838_v63 = vpop.permute.xlu1 %837 }
 0x347   : > { %v836_v33 = vpop.permute.xlu0 %835 }
 0x348   : > { %1008 = vrot.lane.b32.xlu1 %v2665_v41, %s1982_s26  ;;  %v3058_v14 = vsel %vm323_vm13, %v836_v33, %v838_v63 }
 0x349   : > { %3735 = vst [vmem:[#allocation17_spill] sm:$0xff] %v3058_v14  ;;  %1006 = vrot.lane.b32.xlu0 %v2658_v35, %s1982_s26  ;;  %1489 = vmatprep.subr.mxu1 %v3058_v14 }
 0x34a   : > { %v3063_v59 = vpop.permute.xlu1 %913 }
 0x34b   : > { %v3065_v19 = vpop.permute.xlu0 %911 }
 0x34c   : > { %1274 = vrot.lane.b32.xlu1 %v2693_v23, %s1984_s28 }
 0x34d   : > { %1272 = vrot.lane.b32.xlu0 %v2686_v20, %s1984_s28 }
 0x34e   : > { %v3071_v8 = vpop.permute.xlu1 %1177 }
 0x34f   : > { %v3073_v38 = vpop.permute.xlu0 %1175 }
 0x350   : > { %881 = vrot.lane.b32.xlu1 %v2590_v24, %s1982_s26 }
 0x351   : > { %879 = vrot.lane.b32.xlu0 %v2593_v60, %s1982_s26 }
 0x352   : > { %v711_v63 = vpop.permute.xlu1 %710 }
 0x353   : > { %v709_v33 = vpop.permute.xlu0 %708 }
 0x354   : > { %1147 = vrot.lane.b32.xlu1 %v2655_v39, %s1984_s28  ;;  %v3082_v27 = vsel %vm323_vm13, %v709_v33, %v711_v63 }
 0x355   : > { %1145 = vrot.lane.b32.xlu0 %v2648_v34, %s1984_s28  ;;  %1490 = vmatpush2.msra.mxu1 %v3082_v27  ;;  %s1882_s28 = sshll.u32 %s3785_s15, 3 }
 0x356   : > { %v3087_v32 = vpop.permute.xlu1 %1035  ;;  %s245_s5 = scalar_lea.vmem %s3680_s4, %s1882_s28 }
 0x357   : > { %v3089_v6 = vpop.permute.xlu0 %1033 }
 0x358   : > { %1002 = vrot.lane.b32.xlu1 %v2665_v41, %s1981_s25 }
 0x359   : > { %1000 = vrot.lane.b32.xlu0 %v2658_v35, %s1981_s25 }
 0x35a   : > { %v3095_v12 = vpop.permute.xlu1 %1299 }
 0x35b   : > { %3736 = vst [vmem:[#allocation18_spill] sm:$0xff] %v3095_v12  ;;  %v3097_v22 = vpop.permute.xlu0 %1297 }
 0x35c   : > { %3737 = vst [vmem:[#allocation19_spill] sm:$0xff] %v3097_v22  ;;  %1268 = vrot.lane.b32.xlu1 %v2693_v23, %s1983_s27 }
 0x35d   : > { %1266 = vrot.lane.b32.xlu0 %v2686_v20, %s1983_s27 }
 0x35e   : > { %v834_v63 = vpop.permute.xlu1 %833 }
 0x35f   : > { %v832_v33 = vpop.permute.xlu0 %831 }
 0x360   : > { %875 = vrot.lane.b32.xlu1 %v2590_v24, %s1981_s25  ;;  %v848_v15 = vsel %vm323_vm13, %v832_v33, %v834_v63 }
 0x361   : > { %873 = vrot.lane.b32.xlu0 %v2593_v60, %s1981_s25  ;;  %1491 = vmatprep.subr.mxu1 %v848_v15 }
 0x362   : > { %v3108_v18 = vpop.permute.xlu1 %908 }
 0x363   : > { %v3110_v14 = vpop.permute.xlu0 %906 }
 0x364   : > { %3738 = vst [vmem:[#allocation20_spill] sm:$0xff] %v3110_v14  ;;  %1141 = vrot.lane.b32.xlu1 %v2655_v39, %s1983_s27 }
 0x365   : > { %1139 = vrot.lane.b32.xlu0 %v2648_v34, %s1983_s27 }
 0x366   : > { %v3116_v22 = vpop.permute.xlu1 %1172 }
 0x367   : > { %3739 = vst [vmem:[#allocation21_spill] sm:$0xff] %v3116_v22  ;;  %v3118_v12 = vpop.permute.xlu0 %1170 }
 0x368   : > { %3740 = vst [vmem:[#allocation22_spill] sm:$0xff] %v3118_v12  ;;  %996 = vrot.lane.b32.xlu1 %v2665_v41, %s1979_s23 }
 0x369   : > { %994 = vrot.lane.b32.xlu0 %v2658_v35, %s1979_s23 }
 0x36a   : > { %v3124_v15 = vpop.permute.xlu1 %1028 }
 0x36b   : > { %3741 = vst [vmem:[#allocation23_spill] sm:$0xff] %v3124_v15  ;;  %v707_v63 = vpop.permute.xlu0 %706 }
 0x36c   : > { %1262 = vrot.lane.b32.xlu1 %v2693_v23, %s1982_s26  ;;  %v721_v33 = vsel %vm323_vm13, %v2737_v13, %v707_v63 }
 0x36d   : > { %1260 = vrot.lane.b32.xlu0 %v2686_v20, %s1982_s26  ;;  %1492 = vmatpush2.msra.mxu1 %v721_v33 }
 0x36e   : > { %v3132_v12 = vpop.permute.xlu1 %1292 }
 0x36f   : > { %3742 = vst [vmem:[#allocation24_spill] sm:$0xff] %v3132_v12  ;;  %v3134_v22 = vpop.permute.xlu0 %1030  ;;  %v720_v12 = vsel %vm323_vm13, %v2733_v4, %v2735_v9 }
 0x370   : > { %3743 = vst [vmem:[#allocation25_spill] sm:$0xff] %v3134_v22  ;;  %869 = vrot.lane.b32.xlu1 %v2590_v24, %s1979_s23 }
 0x371   : > { %867 = vrot.lane.b32.xlu0 %v2593_v60, %s1979_s23 }
 0x372   : > { %v828_v15 = vpop.permute.xlu1 %827 }
 0x373   : > { %v3140_v14 = vpop.permute.xlu0 %1294 }
 0x374   : > { %3744 = vst [vmem:[#allocation26_spill] sm:$0xff] %v3140_v14  ;;  %1135 = vrot.lane.b32.xlu1 %v2655_v39, %s1982_s26 }
 0x375   : > { %1133 = vrot.lane.b32.xlu0 %v2648_v34, %s1982_s26 }
 0x376   : > { %v3146_v13 = vpop.permute.xlu1 %901 }
 0x377   : > { %v830_v63 = vpop.permute.xlu0 %829 }
 0x378   : > { %1256 = vrot.lane.b32.xlu1 %v2693_v23, %s1981_s25  ;;  %v847_v33 = vsel %vm323_vm13, %v828_v15, %v830_v63 }
 0x379   : > { %1254 = vrot.lane.b32.xlu0 %v2686_v20, %s1981_s25  ;;  %1493 = vmatprep.subr.mxu1 %v847_v33 }
 0x37a   : > { %v3156_v14 = vpop.permute.xlu1 %1165  ;;  %1494 = vmatpush2.msra.mxu1 %v720_v12 }
 0x37b   : > { %3745 = vst [vmem:[#allocation27_spill] sm:$0xff] %v3156_v14  ;;  %v3158_v22 = vpop.permute.xlu0 %903 }
 0x37c   : > { %1129 = vrot.lane.b32.xlu1 %v2655_v39, %s1981_s25 }
 0x37d   : > { %1127 = vrot.lane.b32.xlu0 %v2648_v34, %s1981_s25 }
 0x37e   : > { %v3164_v15 = vpop.permute.xlu1 %1287 }
 0x37f   : > { %3746 = vst [vmem:[#allocation28_spill] sm:$0xff] %v3164_v15  ;;  %v3166_v63 = vpop.permute.xlu0 %1167 }
 0x380   : > { %3747 = vst [vmem:[#allocation29_spill] sm:$0xff] %v3166_v63  ;;  %1250 = vrot.lane.b32.xlu1 %v2693_v23, %s1979_s23 }
 0x381   : > { %1248 = vrot.lane.b32.xlu0 %v2686_v20, %s1979_s23 }
 0x382   : > { %v824_v4 = vpop.permute.xlu1 %823 }
 0x383   : > { %v3172_v9 = vpop.permute.xlu0 %1289 }
 0x384   : > { %3748 = vst [vmem:[#allocation30_spill] sm:$0xff] %v3172_v9  ;;  %1123 = vrot.lane.b32.xlu1 %v2655_v39, %s1979_s23  ;;  %v719_v9 = vsel %vm323_vm13, %v2729_v7, %v2731_v5 }
 0x385   : > { %1121 = vrot.lane.b32.xlu0 %v2648_v34, %s1979_s23 }
 0x386   : > { %v3178_v12 = vpop.permute.xlu1 %1160 }
 0x387   : > { %v826_v33 = vpop.permute.xlu0 %825 }
 0x388   : > { %989 = vrot.lane.b32.xlu1 %v2590_v24, %s1986_s30  ;;  %v846_v15 = vsel %vm323_vm13, %v824_v4, %v826_v33 }
 0x389   : > { %987 = vrot.lane.b32.xlu0 %v2593_v60, %s1986_s30  ;;  %1495 = vmatprep.subr.mxu1 %v846_v15 }
 0x38a   : > { %v3188_v14 = vpop.permute.xlu1 %1025  ;;  %1496 = vmatpush2.msra.mxu1 %v719_v9 }
 0x38b   : > { %v3190_v63 = vpop.permute.xlu0 %1162 }
 0x38c   : > { %862 = vrot.lane.b32.xlu1 %v2470_v3, %s1986_s30 }
 0x38d   : > { %860 = vrot.lane.b32.xlu0 %v2463_v0, %s1986_s30  ;;  %v3749_v0 = vld [vmem:[#allocation9_spill] sm:$0xff] }
 0x38e   : > { %v3196_v24 = vpop.permute.xlu1 %1284  ;;  %v718_v5 = vsel %vm323_vm13, %v3749_v0, %v2727_v10 }
 0x38f   : > { %v3198_v4 = vpop.permute.xlu0 %1282 }
 0x390   : > { %1243 = vrot.lane.b32.xlu1 %v2655_v39, %s1986_s30 }
 0x391   : > { %1241 = vrot.lane.b32.xlu0 %v2648_v34, %s1986_s30 }
 0x392   : > { %v822_v60 = vpop.permute.xlu1 %821 }
 0x393   : > { %v820_v7 = vpop.permute.xlu0 %819 }
 0x394   : > { %1116 = vrot.lane.b32.xlu1 %v2665_v41, %s1986_s30  ;;  %v845_v3 = vsel %vm323_vm13, %v820_v7, %v822_v60 }
 0x395   : > { %1114 = vrot.lane.b32.xlu0 %v2658_v35, %s1986_s30  ;;  %1497 = vmatprep.subr.mxu1 %v845_v3  ;;  %v3231_v3 = vsel %vm281_vm0, %v2869_v44, %v2867_v25  ;;  %v3244_v44 = vsel %vm281_vm0, %v2886_v1, %v2883_v36  ;;  %v1057_v1 = vsel %vm409_vm6, %v2897_v26, %v2895_v43 }
 0x396   : > { %v3212_v15 = vpop.permute.xlu1 %1155  ;;  %1498 = vmatpush2.msra.mxu1 %v718_v5 }
 0x397   : > { %v3214_v9 = vpop.permute.xlu0 %898 }
 0x398   : > { %1091 = vrot.lane.b32.xlu1 %v2655_v39, %s1985_s29  ;;  %v3751_v39 = vld [vmem:[#allocation4_spill] sm:$0xff] }
 0x399   : > { %1089 = vrot.lane.b32.xlu0 %v2648_v34, %s1985_s29 }
 0x39a   : > { %v816_v33 = vpop.permute.xlu1 %815 }
 0x39b   : > { %v3220_v60 = vpop.permute.xlu0 %1157 }
 0x39c   : > { %964 = vrot.lane.b32.xlu1 %v2665_v41, %s1985_s29  ;;  %v3752_v41 = vld [vmem:[#allocation10_spill] sm:$0xff] }
 0x39d   : > { %962 = vrot.lane.b32.xlu0 %v2658_v35, %s1985_s29  ;;  %v717_v0 = vsel %vm323_vm13, %v3752_v41, %v3751_v39 }
 0x39e   : > { %v3226_v10 = vpop.permute.xlu1 %1279 }
 0x39f   : > { %3750 = vst [vmem:[#allocation9_spill] sm:$0xff] %v3226_v10  ;;  %v818_v7 = vpop.permute.xlu0 %817 }
 0x3a0   : > { %1095 = vrot.lane.b32.xlu1 %v2867_v25, %s1985_s29  ;;  %v844_v34 = vsel %vm323_vm13, %v816_v33, %v818_v7  ;;  %v3753_v33 = vld [vmem:[#allocation5_spill] sm:$0xff]  ;;  %v3754_v7 = vld [vmem:[#allocation11_spill] sm:$0xff] }
 0x3a1   : > { %1093 = vrot.lane.b32.xlu0 %v3231_v3, %s1985_s29  ;;  %1499 = vmatprep.subr.mxu1 %v844_v34  ;;  %v716_v34 = vsel %vm323_vm13, %v3754_v7, %v3753_v33  ;;  %v3293_v33 = vsel %vm281_vm0, %v2936_v37, %v2932_v11  ;;  %v1052_v7 = vsel %vm403_vm5, %v2946_v48, %v2944_v16 }
 0x3a2   : > { %v814_v5 = vpop.permute.xlu1 %813  ;;  %1500 = vmatpush2.msra.mxu1 %v717_v0  ;;  %v3756_v0 = vld [vmem:[#allocation12_spill] sm:$0xff] }
 0x3a3   : > { %v812_v10 = vpop.permute.xlu0 %811 }
 0x3a4   : > { %968 = vrot.lane.b32.xlu1 %v2883_v36, %s1985_s29  ;;  %v843_v25 = vsel %vm323_vm13, %v812_v10, %v814_v5  ;;  %v3755_v36 = vld [vmem:[#allocation6_spill] sm:$0xff] }
 0x3a5   : > { %966 = vrot.lane.b32.xlu0 %v3244_v44, %s1985_s29  ;;  %1501 = vmatprep.subr.mxu1 %v843_v25  ;;  %v1316_v25 = vsel %vm281_vm0, %v2916_v62, %v2912_v52  ;;  %v930_v62 = vsel %vm409_vm6, %v2924_v56, %v2922_v49 }
 0x3a6   : > { %v810_v39 = vpop.permute.xlu1 %809  ;;  %1502 = vmatpush2.msra.mxu1 %v716_v34 }
 0x3a7   : > { %1503 = vmatprep.subr.mxu1 %v810_v39  ;;  %v3254_v41 = vpop.permute.xlu0 %1152 }
 0x3a8   : > { %1087 = vrot.lane.b32.xlu1 %v1057_v1, %s1985_s29  ;;  %1504 = vmatpush2.msra.mxu1 %v3755_v36 }
 0x3a9   : > { %1085 = vrot.lane.b32.xlu0 %v2897_v26, %s1985_s29  ;;  %1505 = vmatprep.subr.mxu1 %v3034_v2 }
 0x3aa   : > { %v1021_v10 = vpop.permute.xlu1 %1020  ;;  %1506 = vmatpush2.msra.mxu1 %v3756_v0 }
 0x3ab   : > { %1507 = vmatprep.subr.mxu1 %v3082_v27  ;;  %v1019_v5 = vpop.permute.xlu0 %1018 }
 0x3ac   : > { %1349 = vrot.lane.b32.xlu1 %v2912_v52, %s1985_s29  ;;  %1508 = vmatpush2.msra.mxu1 %v2508_v29  ;;  %v3273_v43 = vsel %vm316_vm7, %v1019_v5, %v1021_v10 }
 0x3ad   : > { %1347 = vrot.lane.b32.xlu0 %v1316_v25, %s1985_s29  ;;  %1516 = vmatprep.subr.mxu0 %v3273_v43 }
 0x3ae   : > { %v894_v26 = vpop.permute.xlu1 %893  ;;  %1510 = vmatmul.mubr.f32.vlgmr.msra.gmra.mxu1 %v3005_v50 }
 0x3af   : > { %v892_v2 = vpop.permute.xlu0 %891  ;;  %1904 = vmatprep.mubr.msk.f32.mxu1 %vm1370_vm14, %v2994_v53 }
 0x3b0   : > { %v3284_v29 = vsel %vm316_vm7, %v892_v2, %v894_v26  ;;  %960 = vrot.lane.b32.xlu1 %v930_v62, %s1985_s29  ;;  %v1311_v26 = vsel %vm409_vm6, %v2980_v61, %v2976_v17  ;;  %v920_v62 = vsel %vm397_vm4, %v3015_v42, %v3010_v45 }
 0x3b1   : > { %958 = vrot.lane.b32.xlu0 %v2924_v56, %s1985_s29  ;;  %1517 = vmatpush1.msra.mxu0 %v3284_v29 }
 0x3b2   : > { %v1015_v52 = vpop.permute.xlu1 %1014 }
 0x3b3   : > { %v1013_v50 = vpop.permute.xlu0 %1012 }
 0x3b4   : > { %1222 = vrot.lane.b32.xlu1 %v2932_v11, %s1985_s29  ;;  %v3298_v49 = vsel %vm309_vm8, %v1013_v50, %v1015_v52 }
 0x3b5   : > { %1220 = vrot.lane.b32.xlu0 %v3293_v33, %s1985_s29  ;;  %1518 = vmatprep.subr.mxu0 %v3298_v49 }
 0x3b6   : > { %v888_v56 = vpop.permute.xlu1 %887 }
 0x3b7   : > { %v886_v53 = vpop.permute.xlu0 %885 }
 0x3b8   : > { %v3307_v37 = vsel %vm309_vm8, %v886_v53, %v888_v56  ;;  %1083 = vrot.lane.b32.xlu1 %v1052_v7, %s1985_s29 }
 0x3b9   : > { %1081 = vrot.lane.b32.xlu0 %v2946_v48, %s1985_s29  ;;  %1519 = vmatpush1.msra.mxu0 %v3307_v37  ;;  %v925_v48 = vsel %vm403_vm5, %v2958_v57, %v2954_v55 }
 0x3ba   : > { %v1009_v11 = vpop.permute.xlu1 %1008 }
 0x3bb   : > { %v1007_v34 = vpop.permute.xlu0 %1006 }
 0x3bc   : > { %1345 = vrot.lane.b32.xlu1 %v2679_v40, %s1985_s29  ;;  %v3316_v39 = vsel %vm302_vm9, %v1007_v34, %v1009_v11  ;;  %v1306_v11 = vsel %vm403_vm5, %v3049_v51, %v3047_v30 }
 0x3bd   : > { %1343 = vrot.lane.b32.xlu0 %v2672_v58, %s1985_s29  ;;  %1520 = vmatprep.subr.mxu0 %v3316_v39 }
 0x3be   : > { %v1275_v16 = vpop.permute.xlu1 %1274 }
 0x3bf   : > { %v1273_v1 = vpop.permute.xlu0 %1272 }
 0x3c0   : > { %956 = vrot.lane.b32.xlu1 %v925_v48, %s1985_s29  ;;  %v1276_v36 = vsel %vm316_vm7, %v1273_v1, %v1275_v16  ;;  %v915_v16 = vsel %vm391_vm3, %v3065_v19, %v3063_v59 }
 0x3c1   : > { %954 = vrot.lane.b32.xlu0 %v2958_v57, %s1985_s29  ;;  %1587 = vmatprep.subr.mxu1 %v1276_v36  ;;  %v1047_v57 = vsel %vm397_vm4, %v2968_v47, %v2966_v31 }
 0x3c2   : > { %v882_v40 = vpop.permute.xlu1 %881 }
 0x3c3   : > { %v880_v10 = vpop.permute.xlu0 %879 }
 0x3c4   : > { %v3329_v58 = vsel %vm302_vm9, %v880_v10, %v882_v40  ;;  %1218 = vrot.lane.b32.xlu1 %v2693_v23, %s1985_s29 }
 0x3c5   : > { %1216 = vrot.lane.b32.xlu0 %v2686_v20, %s1985_s29  ;;  %1521 = vmatpush1.msra.mxu0 %v3329_v58 }
 0x3c6   : > { %v1148_v55 = vpop.permute.xlu1 %1147 }
 0x3c7   : > { %v1146_v0 = vpop.permute.xlu0 %1145 }
 0x3c8   : > { %v3340_v5 = vsel %vm316_vm7, %v1146_v0, %v1148_v55  ;;  %1079 = vrot.lane.b32.xlu1 %v1047_v57, %s1985_s29  ;;  %v3424_v55 = vld [vmem:[%s2044_s22 + $0x50] sm:$0xff]  ;;  %v3758_v57 = vld [vmem:[#allocation18_spill] sm:$0xff] }
 0x3c9   : > { %1077 = vrot.lane.b32.xlu0 %v2968_v47, %s1985_s29  ;;  %1588 = vmatpush1.msra.mxu1 %v3340_v5 }
 0x3ca   : > { %v1003_v23 = vpop.permute.xlu1 %1002 }
 0x3cb   : > { %v1001_v25 = vpop.permute.xlu0 %1000 }
 0x3cc   : > { %1341 = vrot.lane.b32.xlu1 %v1311_v26, %s1985_s29  ;;  %v3351_v31 = vsel %vm295_vm10, %v1001_v25, %v1003_v23  ;;  %v3760_v26 = vld [vmem:[#allocation20_spill] sm:$0xff] }
 0x3cd   : > { %1339 = vrot.lane.b32.xlu0 %v2980_v61, %s1985_s29  ;;  %1522 = vmatprep.subr.mxu0 %v3351_v31  ;;  %v1184_v61 = vsel %vm409_vm6, %v3025_v46, %v3023_v21 }
 0x3ce   : > { %v1269_v2 = vpop.permute.xlu1 %1268 }
 0x3cf   : > { %v1267_v47 = vpop.permute.xlu0 %1266 }
 0x3d0   : > { %952 = vrot.lane.b32.xlu1 %v920_v62, %s1985_s29  ;;  %v1270_v17 = vsel %vm309_vm8, %v1267_v47, %v1269_v2  ;;  %v910_v2 = vsel %vm385_vm2, %v3760_v26, %v3108_v18 }
 0x3d1   : > { %950 = vrot.lane.b32.xlu0 %v3015_v42, %s1985_s29  ;;  %1589 = vmatprep.subr.mxu1 %v1270_v17  ;;  %v1042_v42 = vsel %vm391_vm3, %v3041_v54, %v3039_v28 }
 0x3d2   : > { %v876_v52 = vpop.permute.xlu1 %875 }
 0x3d3   : > { %v874_v50 = vpop.permute.xlu0 %873 }
 0x3d4   : > { %v3367_v56 = vsel %vm295_vm10, %v874_v50, %v876_v52  ;;  %1214 = vrot.lane.b32.xlu1 %v1184_v61, %s1985_s29  ;;  %v3761_v52 = vld [vmem:[#allocation21_spill] sm:$0xff]  ;;  %v3762_v50 = vld [vmem:[#allocation22_spill] sm:$0xff] }
 0x3d5   : > { %1212 = vrot.lane.b32.xlu0 %v3025_v46, %s1985_s29  ;;  %1523 = vmatpush1.msra.mxu0 %v3367_v56  ;;  %v1174_v61 = vsel %vm397_vm4, %v3762_v50, %v3761_v52 }
 0x3d6   : > { %v1142_v45 = vpop.permute.xlu1 %1141 }
 0x3d7   : > { %v1140_v53 = vpop.permute.xlu0 %1139 }
 0x3d8   : > { %v3377_v7 = vsel %vm309_vm8, %v1140_v53, %v1142_v45  ;;  %1075 = vrot.lane.b32.xlu1 %v1042_v42, %s1985_s29  ;;  %v3763_v53 = vld [vmem:[#allocation25_spill] sm:$0xff]  ;;  %v3764_v42 = vld [vmem:[#allocation23_spill] sm:$0xff] }
 0x3d9   : > { %1073 = vrot.lane.b32.xlu0 %v3041_v54, %s1985_s29  ;;  %1590 = vmatpush1.msra.mxu1 %v3377_v7 }
 0x3da   : > { %v997_v21 = vpop.permute.xlu1 %996 }
 0x3db   : > { %v995_v46 = vpop.permute.xlu0 %994 }
 0x3dc   : > { %1337 = vrot.lane.b32.xlu1 %v1306_v11, %s1985_s29  ;;  %v3388_v28 = vsel %vm288_vm11, %v995_v46, %v997_v21  ;;  %v1032_v21 = vsel %vm379_vm1, %v3764_v42, %v3763_v53 }
 0x3dd   : > { %1335 = vrot.lane.b32.xlu0 %v3049_v51, %s1985_s29  ;;  %1524 = vmatprep.subr.mxu0 %v3388_v28  ;;  %v1179_v51 = vsel %vm403_vm5, %v3073_v38, %v3071_v8  ;;  %v1037_v8 = vsel %vm385_vm2, %v3089_v6, %v3087_v32  ;;  %v3759_v32 = vld [vmem:[#allocation19_spill] sm:$0xff] }
 0x3de   : > { %v1263_v34 = vpop.permute.xlu1 %1262  ;;  %v1301_v23 = vsel %vm397_vm4, %v3759_v32, %v3758_v57  ;;  %v3769_v57 = vld [vmem:[#allocation27_spill] sm:$0xff] }
 0x3df   : > { %v1261_v54 = vpop.permute.xlu0 %1260 }
 0x3e0   : > { %948 = vrot.lane.b32.xlu1 %v915_v16, %s1985_s29  ;;  %v1264_v30 = vsel %vm302_vm9, %v1261_v54, %v1263_v34  ;;  %v3765_v54 = vld [vmem:[#allocation26_spill] sm:$0xff]  ;;  %v3766_v16 = vld [vmem:[#allocation24_spill] sm:$0xff] }
 0x3e1   : > { %946 = vrot.lane.b32.xlu0 %v3065_v19, %s1985_s29  ;;  %1591 = vmatprep.subr.mxu1 %v1264_v30  ;;  %v3757_v19 = vld [vmem:[#allocation3_spill] sm:$0xff]  ;;  %v1296_v30 = vsel %vm391_vm3, %v3766_v16, %v3765_v54 }
 0x3e2   : > { %v870_v1 = vpop.permute.xlu1 %869 }
 0x3e3   : > { %v868_v48 = vpop.permute.xlu0 %867 }
 0x3e4   : > { %v3404_v36 = vsel %vm288_vm11, %v868_v48, %v870_v1  ;;  %1210 = vrot.lane.b32.xlu1 %v1179_v51, %s1985_s29 }
 0x3e5   : > { %1208 = vrot.lane.b32.xlu0 %v3073_v38, %s1985_s29  ;;  %1525 = vmatpush1.msra.mxu0 %v3404_v36 }
 0x3e6   : > { %v1136_v59 = vpop.permute.xlu1 %1135  ;;  %1526 = vmatprep.subr.mxu0 %v3244_v44 }
 0x3e7   : > { %1527 = vmatpush1.msra.mxu0 %v3757_v19  ;;  %v1134_v40 = vpop.permute.xlu0 %1133 }
 0x3e8   : > { %v3416_v10 = vsel %vm302_vm9, %v1134_v40, %v1136_v59  ;;  %1071 = vrot.lane.b32.xlu1 %v1037_v8, %s1985_s29  ;;  %1528 = vmatprep.subr.mxu0 %v2658_v35  ;;  %v3472_v59 = vld [vmem:[%s2044_s22 + $0x70] sm:$0xff] }
 0x3e9   : > { %1069 = vrot.lane.b32.xlu0 %v3089_v6, %s1985_s29  ;;  %1592 = vmatpush1.msra.mxu1 %v3416_v10 }
 0x3ea   : > { %v1257_v38 = vpop.permute.xlu1 %1256  ;;  %1529 = vmatpush1.msra.mxu0 %v3424_v55 }
 0x3eb   : > { %v1255_v0 = vpop.permute.xlu0 %1254 }
 0x3ec   : > { %1333 = vrot.lane.b32.xlu1 %v1301_v23, %s1985_s29  ;;  %v1258_v25 = vsel %vm295_vm10, %v1255_v0, %v1257_v38  ;;  %v3767_v38 = vld [vmem:[#allocation17_spill] sm:$0xff] }
 0x3ed   : > { %1331 = vrot.lane.b32.xlu0 %v3759_v32, %s1985_s29  ;;  %1593 = vmatprep.subr.mxu1 %v1258_v25  ;;  %v3768_v0 = vld [vmem:[#allocation29_spill] sm:$0xff] }
 0x3ee   : > { %v1130_v35 = vpop.permute.xlu1 %1129  ;;  %v1169_v32 = vsel %vm391_vm3, %v3769_v57, %v3768_v0 }
 0x3ef   : > { %v1128_v6 = vpop.permute.xlu0 %1127 }
 0x3f0   : > { %v3438_v47 = vsel %vm295_vm10, %v1128_v6, %v1130_v35  ;;  %944 = vrot.lane.b32.xlu1 %v910_v2, %s1985_s29  ;;  %v3771_v35 = vld [vmem:[#allocation30_spill] sm:$0xff]  ;;  %v3772_v6 = vld [vmem:[#allocation28_spill] sm:$0xff] }
 0x3f1   : > { %942 = vrot.lane.b32.xlu0 %v3760_v26, %s1985_s29  ;;  %1594 = vmatpush1.msra.mxu1 %v3438_v47  ;;  %v3773_v26 = vld [vmem:[#allocation8_spill] sm:$0xff] }
 0x3f2   : > { %v1251_v62 = vpop.permute.xlu1 %1250 }
 0x3f3   : > { %v1249_v17 = vpop.permute.xlu0 %1248 }
 0x3f4   : > { %1206 = vrot.lane.b32.xlu1 %v1174_v61, %s1985_s29  ;;  %v1252_v18 = vsel %vm288_vm11, %v1249_v17, %v1251_v62  ;;  %v3774_v62 = vld [vmem:[#allocation13_spill] sm:$0xff]  ;;  %v3775_v17 = vld [vmem:[#allocation14_spill] sm:$0xff]  ;;  %v3777_v61 = vld [vmem:[#allocation7_spill] sm:$0xff] }
 0x3f5   : > { %1204 = vrot.lane.b32.xlu0 %v3762_v50, %s1985_s29  ;;  %1595 = vmatprep.subr.mxu1 %v1252_v18 }
 0x3f6   : > { %v1124_v45 = vpop.permute.xlu1 %1123 }
 0x3f7   : > { %v1122_v46 = vpop.permute.xlu0 %1121 }
 0x3f8   : > { %v3455_v11 = vsel %vm288_vm11, %v1122_v46, %v1124_v45  ;;  %1067 = vrot.lane.b32.xlu1 %v1032_v21, %s1985_s29 }
 0x3f9   : > { %1065 = vrot.lane.b32.xlu0 %v3764_v42, %s1985_s29  ;;  %1596 = vmatpush1.msra.mxu1 %v3455_v11 }
 0x3fa   : > { %v990_v34 = vpop.permute.xlu1 %989  ;;  %1597 = vmatprep.subr.mxu1 %v3293_v33  ;;  %v905_v33 = vsel %vm379_vm1, %v3146_v13, %v3158_v22 }
 0x3fb   : > { %1598 = vmatpush1.msra.mxu1 %v3231_v3  ;;  %v988_v1 = vpop.permute.xlu0 %987 }
 0x3fc   : > { %1329 = vrot.lane.b32.xlu1 %v1296_v30, %s1985_s29  ;;  %v991_v48 = vsel %vm330_vm12, %v988_v1, %v990_v34  ;;  %1599 = vmatprep.subr.mxu1 %v2686_v20 }
 0x3fd   : > { %1327 = vrot.lane.b32.xlu0 %v3766_v16, %s1985_s29  ;;  %1530 = vmatprep.subr.mxu0 %v991_v48 }
 0x3fe   : > { %v863_v51 = vpop.permute.xlu1 %862  ;;  %1600 = vmatpush1.msra.mxu1 %v3472_v59 }
 0x3ff   : > { %v861_v40 = vpop.permute.xlu0 %860 }
 0x400   : > { %v864_v8 = vsel %vm330_vm12, %v861_v40, %v863_v51  ;;  %940 = vrot.lane.b32.xlu1 %v905_v33, %s1985_s29 }
 0x401   : > { %938 = vrot.lane.b32.xlu0 %v3146_v13, %s1985_s29  ;;  %1531 = vmatpush1.msra.mxu0 %v864_v8  ;;  %v3770_v13 = vld [vmem:[#allocation2_spill] sm:$0xff] }
 0x402   : > { %v1244_v20 = vpop.permute.xlu1 %1243  ;;  %1532 = vmatprep.subr.mxu0 %v3767_v38 }
 0x403   : > { %1533 = vmatpush1.msra.mxu0 %v3082_v27  ;;  %v1242_v23 = vpop.permute.xlu0 %1241  ;;  %v1291_v27 = vsel %vm385_vm2, %v3772_v6, %v3771_v35 }
 0x404   : > { %1202 = vrot.lane.b32.xlu1 %v1169_v32, %s1985_s29  ;;  %1534 = vmatprep.subr.mxu0 %v3284_v29  ;;  %v1245_v22 = vsel %vm330_vm12, %v1242_v23, %v1244_v20 }
 0x405   : > { %1200 = vrot.lane.b32.xlu0 %v3769_v57, %s1985_s29  ;;  %1535 = vmatpush1.msra.mxu0 %v3770_v13 }
 0x406   : > { %1601 = vmatprep.subr.mxu1 %v1245_v22  ;;  %v1117_v25 = vpop.permute.xlu1 %1116  ;;  %1536 = vmatprep.subr.mxu0 %v3307_v37 }
 0x407   : > { %1537 = vmatpush1.msra.mxu0 %v3773_v26  ;;  %v1115_v2 = vpop.permute.xlu0 %1114 }
 0x408   : > { %v1118_v29 = vsel %vm330_vm12, %v1115_v2, %v1117_v25  ;;  %1325 = vrot.lane.b32.xlu1 %v1291_v27, %s1985_s29  ;;  %1538 = vmatprep.subr.mxu0 %v3329_v58  ;;  %v3776_v58 = vld [vmem:[#allocation15_spill] sm:$0xff] }
 0x409   : > { %1323 = vrot.lane.b32.xlu0 %v3772_v6, %s1985_s29  ;;  %1539 = vmatpush1.msra.mxu0 %v3774_v62 }
 0x40a   : > { %1602 = vmatpush1.msra.mxu1 %v1118_v29  ;;  %v1092_v37 = vpop.permute.xlu1 %1091  ;;  %1540 = vmatprep.subr.mxu0 %v3367_v56 }
 0x40b   : > { %1541 = vmatpush1.msra.mxu0 %v3775_v17  ;;  %v1090_v52 = vpop.permute.xlu0 %1089 }
 0x40c   : > { %1196 = vrot.lane.b32.xlu1 %v3178_v12, %s1985_s29  ;;  %1542 = vmatprep.subr.mxu0 %v3404_v36  ;;  %v3510_v50 = vsel %vm323_vm13, %v1090_v52, %v1092_v37  ;;  %v1164_v36 = vsel %vm385_vm2, %v3178_v12, %v3190_v63  ;;  %v1286_v12 = vsel %vm379_vm1, %v3198_v4, %v3196_v24 }
 0x40d   : > { %1063 = vrot.lane.b32.xlu0 %v3188_v14, %s1985_s29  ;;  %1543 = vmatpush1.msra.mxu0 %v3776_v58 }
 0x40e   : > { %1603 = vmatprep.subr.mxu1 %v3510_v50  ;;  %v965_v56 = vpop.permute.xlu1 %964  ;;  %1544 = vmatprep.subr.mxu0 %v3757_v19  ;;  %v1952_v19 = vld [vmem:[%s2044_s22 + $0x40] sm:$0xff] }
 0x40f   : > { %1545 = vmatpush1.msra.mxu0 %v3777_v61  ;;  %v963_v18 = vpop.permute.xlu0 %962 }
 0x410   : > { %v3522_v45 = vsel %vm323_vm13, %v963_v18, %v965_v56  ;;  %936 = vrot.lane.b32.xlu1 %v3214_v9, %s1985_s29  ;;  %1546 = vmatprep.subr.mxu0 %v3424_v55 }
 0x411   : > { %1198 = vrot.lane.b32.xlu0 %v1164_v36, %s1985_s29  ;;  %1604 = vmatpush1.msra.mxu1 %v3522_v45  ;;  %v1668_v36 = vlaneseq }
 0x412   : > { %v1096_v14 = vpop.permute.xlu1 %1095  ;;  %1605 = vmatprep.subr.mxu1 %v3340_v5  ;;  %1547 = vmatpush1.msra.mxu0 %v1952_v19  ;;  %v1159_v5 = vsel %vm379_vm1, %v3212_v15, %v3220_v60 }
 0x413   : > { %1606 = vmatpush1.msra.mxu1 %v3273_v43  ;;  %v1094_v63 = vpop.permute.xlu0 %1093 }
 0x414   : > { %1321 = vrot.lane.b32.xlu1 %v1286_v12, %s1985_s29  ;;  %1607 = vmatprep.subr.mxu1 %v3377_v7  ;;  %v3538_v9 = vsel %vm323_vm13, %v1094_v63, %v1096_v14  ;;  %v3549_v7 = vpop.f32.mrf.mxu0  ;;  %v3606_v12 = vshrl.u32 %v1668_v36, 7  ;;  %v1954_v36 = vld [vmem:[%s3677_s1] sm:$0xff] }
 0x415   : > { %1319 = vrot.lane.b32.xlu0 %v3198_v4, %s1985_s29  ;;  %1558 = vmatprep.subr.mxu0 %v3538_v9  ;;  %1658 = vst [vmem:[%s3559_s24] sm:$0xff] %v3549_v7 }
 0x416   : > { %1608 = vmatpush1.msra.mxu1 %v3298_v49  ;;  %v969_v43 = vpop.permute.xlu1 %968  ;;  %v3566_v4 = vpop.f32.mrf.mxu0 }
 0x417   : > { %1609 = vmatprep.subr.mxu1 %v3416_v10  ;;  %v967_v24 = vpop.permute.xlu0 %966  ;;  %1659 = vst [vmem:[%s3559_s24 + $0x8] sm:$0xff] %v3566_v4 }
 0x418   : > { %1610 = vmatpush1.msra.mxu1 %v3316_v39  ;;  %v3553_v55 = vsel %vm323_vm13, %v967_v24, %v969_v43  ;;  %1194 = vrot.lane.b32.xlu1 %v1159_v5, %s1985_s29  ;;  %v3778_v39 = vld [vmem:[#allocation9_spill] sm:$0xff] }
 0x419   : > { %1611 = vmatprep.subr.mxu1 %v3438_v47  ;;  %1192 = vrot.lane.b32.xlu0 %v3212_v15, %s1985_s29 }
 0x41a   : > { %1559 = vmatpush2.msra.mxu0 %v3553_v55  ;;  %1612 = vmatpush1.msra.mxu1 %v3351_v31  ;;  %v1088_v60 = vpop.permute.xlu1 %1087 }
 0x41b   : > { %1560 = vmatprep.subr.mxu0 %v3510_v50  ;;  %1613 = vmatprep.subr.mxu1 %v3455_v11  ;;  %v1086_v49 = vpop.permute.xlu0 %1085 }
 0x41c   : > { %1561 = vmatpush2.msra.mxu0 %v3522_v45  ;;  %1614 = vmatpush1.msra.mxu1 %v3388_v28  ;;  %v1102_v15 = vsel %vm323_vm13, %v1086_v49, %v1088_v60  ;;  %v1953_v28 = vld [vmem:[%s2044_s22 + $0x60] sm:$0xff]  ;;  %v1670_v60 = vsub.s32 0, %v3606_v12  ;;  %v1674_v49 = vsub.s32 1, %v3606_v12 }
 0x41d   : > { %1190 = vrot.lane.b32.xlu1 %v3254_v41, %s1985_s29  ;;  %1615 = vmatprep.subr.mxu1 %v3231_v3 }
 0x41e   : > { %1317 = vrot.lane.b32.xlu0 %v3778_v39, %s1985_s29  ;;  %1562 = vmatprep.subr.mxu0 %v1102_v15  ;;  %v1350_v31 = vpop.permute.xlu1 %1349  ;;  %v3615_v39 = vld [vmem:[%s3678_s2] sm:$0xff] }
 0x41f   : > { %1616 = vmatpush1.msra.mxu1 %v3244_v44  ;;  %v1348_v10 = vpop.permute.xlu0 %1347 }
 0x420   : > { %1617 = vmatprep.subr.mxu1 %v3472_v59  ;;  %v1358_v47 = vsel %vm323_vm13, %v1348_v10, %v1350_v31 }
 0x421   : > { %1618 = vmatpush1.msra.mxu1 %v1953_v28  ;;  %v1675_v28 = vrot.slane %v3615_v39, %v1674_v49 }
 0x422   : > { %1629 = vmatprep.subr.mxu1 %v1358_v47  ;;  %v961_v53 = vpop.permute.xlu1 %960  ;;  %v1671_v47 = vrot.slane %v3615_v39, %v1670_v60 }
 0x423   : > { %v959_v42 = vpop.permute.xlu0 %958 }
 0x424   : > { %v975_v41 = vsel %vm323_vm13, %v959_v42, %v961_v53 }
 0x425   : > { %1563 = vmatpush2.msra.mxu0 %v975_v41 }
 0x426   : > { %v1223_v3 = vpop.permute.xlu1 %1222 }
 0x427   : > { %v1221_v21 = vpop.permute.xlu0 %1220 }
 0x428   : > { %v3588_v46 = vsel %vm323_vm13, %v1221_v21, %v1223_v3  ;;  %v1708_v3 = vmul.f32 %v1671_v47, %v3549_v7  ;;  %v1709_v21 = vmul.f32 %v1675_v28, %v3566_v4 }
 0x429   : > { %1630 = vmatpush2.msra.mxu1 %v3588_v46 }
 0x42a   : > { %v1084_v44 = vpop.permute.xlu1 %1083 }
 0x42b   : > { %v1082_v11 = vpop.permute.xlu0 %1081 }
 0x42c   : > { %v1101_v34 = vsel %vm323_vm13, %v1082_v11, %v1084_v44  ;;  %v1678_v44 = vsub.s32 2, %v3606_v12 }
 0x42d   : > { %1564 = vmatprep.subr.mxu0 %v1101_v34 }
 0x42e   : > { %v1346_v54 = vpop.permute.xlu1 %1345 }
 0x42f   : > { %v1344_v16 = vpop.permute.xlu0 %1343 }
 0x430   : > { %v1357_v30 = vsel %vm323_vm13, %v1344_v16, %v1346_v54  ;;  %v1725_v16 = vmul.f32 %v1708_v3, %v3549_v7 }
 0x431   : > { %1631 = vmatprep.subr.mxu1 %v1357_v30  ;;  %v1726_v30 = vmul.f32 %v1709_v21, %v3566_v4 }
 0x432   : > { %v957_v1 = vpop.permute.xlu1 %956 }
 0x433   : > { %v955_v48 = vpop.permute.xlu0 %954 }
 0x434   : > { %v974_v51 = vsel %vm323_vm13, %v955_v48, %v957_v1  ;;  %v1679_v1 = vrot.slane %v3615_v39, %v1678_v44 }
 0x435   : > { %1565 = vmatpush2.msra.mxu0 %v974_v51  ;;  %v1716_v51 = vadd.f32 %v1709_v21, %v1708_v3 }
 0x436   : > { %v1219_v59 = vpop.permute.xlu1 %1218 }
 0x437   : > { %v1217_v33 = vpop.permute.xlu0 %1216 }
 0x438   : > { %v3595_v40 = vsel %vm323_vm13, %v1217_v33, %v1219_v59 }
 0x439   : > { %1632 = vmatpush2.msra.mxu1 %v3595_v40 }
 0x43a   : > { %v1080_v8 = vpop.permute.xlu1 %1079 }
 0x43b   : > { %v1078_v20 = vpop.permute.xlu0 %1077 }
 0x43c   : > { %v1100_v0 = vsel %vm323_vm13, %v1078_v20, %v1080_v8  ;;  %v1733_v20 = vadd.f32 %v1726_v30, %v1725_v16 }
 0x43d   : > { %1566 = vmatprep.subr.mxu0 %v1100_v0 }
 0x43e   : > { %v1342_v57 = vpop.permute.xlu1 %1341 }
 0x43f   : > { %v1340_v32 = vpop.permute.xlu0 %1339 }
 0x440   : > { %v1356_v23 = vsel %vm323_vm13, %v1340_v32, %v1342_v57 }
 0x441   : > { %1633 = vmatprep.subr.mxu1 %v1356_v23 }
 0x442   : > { %v953_v22 = vpop.permute.xlu1 %952 }
 0x443   : > { %v951_v13 = vpop.permute.xlu0 %950 }
 0x444   : > { %v973_v25 = vsel %vm323_vm13, %v951_v13, %v953_v22 }
 0x445   : > { %1567 = vmatpush2.msra.mxu0 %v973_v25 }
 0x446   : > { %v1215_v35 = vpop.permute.xlu1 %1214 }
 0x447   : > { %v1213_v6 = vpop.permute.xlu0 %1212 }
 0x448   : > { %v1229_v27 = vsel %vm323_vm13, %v1213_v6, %v1215_v35 }
 0x449   : > { %1634 = vmatpush2.msra.mxu1 %v1229_v27 }
 0x44a   : > { %v1076_v26 = vpop.permute.xlu1 %1075 }
 0x44b   : > { %v1074_v2 = vpop.permute.xlu0 %1073 }
 0x44c   : > { %v1099_v29 = vsel %vm323_vm13, %v1074_v2, %v1076_v26 }
 0x44d   : > { %1568 = vmatprep.subr.mxu0 %v1099_v29 }
 0x44e   : > { %v1338_v62 = vpop.permute.xlu1 %1337 }
 0x44f   : > { %v1336_v37 = vpop.permute.xlu0 %1335 }
 0x450   : > { %v1355_v17 = vsel %vm323_vm13, %v1336_v37, %v1338_v62 }
 0x451   : > { %1635 = vmatprep.subr.mxu1 %v1355_v17 }
 0x452   : > { %v949_v52 = vpop.permute.xlu1 %948 }
 0x453   : > { %v947_v58 = vpop.permute.xlu0 %946 }
 0x454   : > { %v972_v56 = vsel %vm323_vm13, %v947_v58, %v949_v52 }
 0x455   : > { %1569 = vmatpush2.msra.mxu0 %v972_v56  ;;  %v3779_v56 = vld [vmem:[#allocation16_spill] sm:$0xff] }
 0x456   : > { %v1211_v61 = vpop.permute.xlu1 %1210 }
 0x457   : > { %v1209_v18 = vpop.permute.xlu0 %1208 }
 0x458   : > { %v1228_v14 = vsel %vm323_vm13, %v1209_v18, %v1211_v61 }
 0x459   : > { %1636 = vmatpush2.msra.mxu1 %v1228_v14 }
 0x45a   : > { %v1072_v19 = vpop.permute.xlu1 %1071 }
 0x45b   : > { %v1070_v63 = vpop.permute.xlu0 %1069 }
 0x45c   : > { %v1098_v43 = vsel %vm323_vm13, %v1070_v63, %v1072_v19 }
 0x45d   : > { %1570 = vmatprep.subr.mxu0 %v1098_v43 }
 0x45e   : > { %v1334_v5 = vpop.permute.xlu1 %1333 }
 0x45f   : > { %v1332_v24 = vpop.permute.xlu0 %1331 }
 0x460   : > { %v1354_v15 = vsel %vm323_vm13, %v1332_v24, %v1334_v5 }
 0x461   : > { %1637 = vmatprep.subr.mxu1 %v1354_v15 }
 0x462   : > { %v945_v31 = vpop.permute.xlu1 %944 }
 0x463   : > { %v943_v10 = vpop.permute.xlu0 %942 }
 0x464   : > { %v971_v53 = vsel %vm323_vm13, %v943_v10, %v945_v31  ;;  %v1694_v10 = vsub.s32 6, %v3606_v12 }
 0x465   : > { %1571 = vmatpush2.msra.mxu0 %v971_v53 }
 0x466   : > { %v1207_v42 = vpop.permute.xlu1 %1206  ;;  %v1695_v21 = vrot.slane %v3615_v39, %v1694_v10 }
 0x467   : > { %v1205_v41 = vpop.permute.xlu0 %1204 }
 0x468   : > { %v1227_v11 = vsel %vm323_vm13, %v1205_v41, %v1207_v42  ;;  %v1698_v42 = vsub.s32 7, %v3606_v12 }
 0x469   : > { %1638 = vmatpush2.msra.mxu1 %v1227_v11 }
 0x46a   : > { %v1068_v34 = vpop.permute.xlu1 %1067 }
 0x46b   : > { %v1066_v54 = vpop.permute.xlu0 %1065 }
 0x46c   : > { %v1097_v48 = vsel %vm323_vm13, %v1066_v54, %v1068_v34  ;;  %v1699_v34 = vrot.slane %v3615_v39, %v1698_v42 }
 0x46d   : > { %1572 = vmatprep.subr.mxu0 %v1097_v48 }
 0x46e   : > { %v1330_v59 = vpop.permute.xlu1 %1329  ;;  %v1511_v33 = vpop.f32.mrf.mxu1 }
 0x46f   : > { %v1328_v8 = vpop.permute.xlu0 %1327  ;;  %1660 = vst [vmem:[%s3559_s24 + $0x10] sm:$0xff] %v1511_v33  ;;  %v1710_v0 = vmul.f32 %v1679_v1, %v1511_v33 }
 0x470   : > { %v1353_v57 = vsel %vm323_vm13, %v1328_v8, %v1330_v59  ;;  %v1513_v32 = vpop.f32.mrf.mxu1 }
 0x471   : > { %1639 = vmatprep.subr.mxu1 %v1353_v57  ;;  %v1717_v7 = vadd.f32 %v1716_v51, %v1710_v0  ;;  %v1727_v23 = vmul.f32 %v1710_v0, %v1511_v33  ;;  %1661 = vst [vmem:[%s3559_s24 + $0x18] sm:$0xff] %v1513_v32 }
 0x472   : > { %v941_v4 = vpop.permute.xlu1 %940 }
 0x473   : > { %v939_v22 = vpop.permute.xlu0 %938  ;;  %v1734_v13 = vadd.f32 %v1733_v20, %v1727_v23 }
 0x474   : > { %v970_v25 = vsel %vm323_vm13, %v939_v22, %v941_v4 }
 0x475   : > { %1573 = vmatpush2.msra.mxu0 %v970_v25 }
 0x476   : > { %v1203_v35 = vpop.permute.xlu1 %1202 }
 0x477   : > { %v1201_v6 = vpop.permute.xlu0 %1200 }
 0x478   : > { %v1226_v27 = vsel %vm323_vm13, %v1201_v6, %v1203_v35 }
 0x479   : > { %1640 = vmatpush2.msra.mxu1 %v1226_v27 }
 0x47a   : > { %v1326_v26 = vpop.permute.xlu1 %1325 }
 0x47b   : > { %v1324_v2 = vpop.permute.xlu0 %1323 }
 0x47c   : > { %v1352_v29 = vsel %vm323_vm13, %v1324_v2, %v1326_v26 }
 0x47d   : > { %1641 = vmatprep.subr.mxu1 %v1352_v29 }
 0x47e   : > { %v1197_v62 = vpop.permute.xlu1 %1196 }
 0x47f   : > { %v1064_v37 = vpop.permute.xlu0 %1063 }
 0x480   : > { %1574 = vmatprep.subr.mxu0 %v1064_v37 }
 0x482   : > { %v937_v17 = vpop.permute.xlu1 %936 }
 0x483   : > { %1575 = vmatpush2.msra.mxu0 %v937_v17  ;;  %v1199_v52 = vpop.permute.xlu0 %1198 }
 0x484   : > { %v1225_v58 = vsel %vm323_vm13, %v1197_v62, %v1199_v52  ;;  %1576 = vmatprep.subr.mxu0 %v3553_v55 }
 0x485   : > { %1577 = vmatpush2.msra.mxu0 %v3779_v56  ;;  %1642 = vmatpush2.msra.mxu1 %v1225_v58 }
 0x486   : > { %v1322_v61 = vpop.permute.xlu1 %1321  ;;  %1578 = vmatprep.subr.mxu0 %v3522_v45  ;;  %v1686_v45 = vsub.s32 4, %v3606_v12 }
 0x487   : > { %1579 = vmatpush2.msra.mxu0 %v3767_v38  ;;  %v1320_v18 = vpop.permute.xlu0 %1319  ;;  %v1682_v38 = vsub.s32 3, %v3606_v12 }
 0x488   : > { %1581 = vmatmul.mubr.f32.vlgmr.msra.gmra.mxu0 %v1954_v36  ;;  %v1351_v14 = vsel %vm323_vm13, %v1320_v18, %v1322_v61  ;;  %v1687_v49 = vrot.slane %v3615_v39, %v1686_v45 }
 0x489   : > { %1643 = vmatprep.subr.mxu1 %v1351_v14  ;;  %v1683_v24 = vrot.slane %v3615_v39, %v1682_v38 }
 0x48a   : > { %v1195_v19 = vpop.permute.xlu1 %1194 }
 0x48b   : > { %v1193_v63 = vpop.permute.xlu0 %1192 }
 0x48c   : > { %v1224_v55 = vsel %vm323_vm13, %v1193_v63, %v1195_v19 }
 0x48d   : > { %1644 = vmatpush2.msra.mxu1 %v1224_v55 }
 0x48f   : > { %v1191_v5 = vpop.permute.xlu1 %1190 }
 0x490   : > { %v1318_v43 = vpop.permute.xlu0 %1317 }
 0x491   : > { %1645 = vmatprep.subr.mxu1 %v1318_v43 }
 0x492   : > { %1646 = vmatpush2.msra.mxu1 %v1191_v5 }
 0x493   : > { %1647 = vmatprep.subr.mxu1 %v3588_v46  ;;  %v1690_v46 = vsub.s32 5, %v3606_v12 }
 0x494   : > { %1648 = vmatpush2.msra.mxu1 %v3538_v9  ;;  %v1711_v9 = vmul.f32 %v1683_v24, %v1513_v32 }
 0x495   : > { %1649 = vmatprep.subr.mxu1 %v3595_v40 }
 0x496   : > { %1650 = vmatpush2.msra.mxu1 %v3510_v50  ;;  %v1691_v50 = vrot.slane %v3615_v39, %v1690_v46  ;;  %v1728_v40 = vmul.f32 %v1711_v9, %v1513_v32  ;;  %v1718_v47 = vadd.f32 %v1717_v7, %v1711_v9  ;;  %v1994_v39 = vmov 0.0  }
 0x497   : > { %1652 = vmatmul.mubr.f32.vlgmr.msra.gmra.mxu1 %v1954_v36  ;;  %1748 = vst.msk [vmem:[%s245_s5] sm:$0xff] %vm1747_vm15, %v1994_v39 }
 0x498   : > { %v1735_v41 = vadd.f32 %v1734_v13, %v1728_v40 }
 0x49e   : > { %v1749_v57 = vld [vmem:[%s245_s5] sm:$0xff] }
 0x548   : > { %v1582_v60 = vpop.f32.mrf.mxu0 }
 0x549   : > { %1662 = vst [vmem:[%s3559_s24 + $0x20] sm:$0xff] %v1582_v60  ;;  %v1712_v31 = vmul.f32 %v1687_v49, %v1582_v60 }
 0x54a   : > { %v1584_v15 = vpop.f32.mrf.mxu0 }
 0x54b   : > { %1663 = vst [vmem:[%s3559_s24 + $0x28] sm:$0xff] %v1584_v15  ;;  %v1729_v28 = vmul.f32 %v1712_v31, %v1582_v60  ;;  %v1713_v53 = vmul.f32 %v1691_v50, %v1584_v15  ;;  %v1719_v3 = vadd.f32 %v1718_v47, %v1712_v31 }
 0x54d   : > { %v1736_v44 = vadd.f32 %v1735_v41, %v1729_v28  ;;  %v1730_v11 = vmul.f32 %v1713_v53, %v1584_v15  ;;  %v1720_v16 = vadd.f32 %v1719_v3, %v1713_v53 }
 0x54f   : > { %v1737_v48 = vadd.f32 %v1736_v44, %v1730_v11 }
 0x557   : > { %v1653_v54 = vpop.f32.mrf.mxu1 }
 0x558   : > { %1664 = vst [vmem:[%s3559_s24 + $0x30] sm:$0xff] %v1653_v54  ;;  %v1714_v30 = vmul.f32 %v1695_v21, %v1653_v54 }
 0x559   : > { %v1655_v1 = vpop.f32.mrf.mxu1 }
 0x55a   : > { %v1721_v51 = vadd.f32 %v1720_v16, %v1714_v30  ;;  %v1731_v59 = vmul.f32 %v1714_v30, %v1653_v54  ;;  %1665 = vst [vmem:[%s3559_s24 + $0x38] sm:$0xff] %v1655_v1  ;;  %v1715_v33 = vmul.f32 %v1699_v34, %v1655_v1 }
 0x55c   : > { %v1738_v12 = vadd.f32 %v1737_v48, %v1731_v59  ;;  %v1722_v8 = vadd.f32 %v1721_v51, %v1715_v33  ;;  %v1732_v20 = vmul.f32 %v1715_v33, %v1655_v1 }
 0x55e   : > { %v1739_v0 = vadd.f32 %v1738_v12, %v1732_v20  ;;  %1723 = vadd.xlane.f32.xlu0 %v1722_v8 }
 0x560   : > { %1740 = vadd.xlane.f32.xlu1 %v1739_v0 }
 0x5e7   : > { %v1724_v32 = vpop.xlane.xlu0 %1723 }
 0x5e9   : > { %v1741_v7 = vpop.xlane.xlu1 %1740 }
 0x5ea   : > { %v1742_v23 = vsel %vm409_vm6, %v1724_v32, %v1741_v7 }
 0x5eb   : > { %v1750_v4 = vadd.f32 %v1749_v57, %v1742_v23 }
 0x5ed   : > { %1752 = vst.msk [vmem:[%s245_s5] sm:$0xff] %vm1747_vm15, %v1750_v4 }
 0x5ee PF: > { %s15_s17 = sadd.s32 1, %s1977_s17   ;;  %s3780_s15 = smov %s1973_s16 }
 0x5ef   : > { %p12_p5 = scmp.ge.s32.totalorder %s15_s17, 4   ;;  %s3781_s16 = smov %s3783_s18 }
 0x5f1   :  { %14 = sbr.rel (!%p12_p5) target bundleno = 2 (0x2), region = 87 }

</bundles_post_ra>
